<compile_context>
chip_gen: v7x
topology: tpu7x:2x2x1
jax: 0.10.0
libtpu: 0.0.40
codegen_flags: <defaults>
</compile_context>

<pallas_src>
import functools

import jax
import jax.numpy as jnp
from jax.experimental import pallas as pl
from jax.experimental.pallas import tpu as pltpu

BN_EPS = 1e-5
LRELU_SLOPE = 0.2


# ---------------------------------------------------------------------------
# Small helpers for tile / padding selection
# ---------------------------------------------------------------------------

def _round_up(x, m):
    return ((x + m - 1) // m) * m


def _pick_tm(m, pref=512):
    """Row-tile (sublane dim): multiple of 8, padded M divisible by tile."""
    m_pad = _round_up(max(m, 8), 8)
    tm = min(pref, m_pad)
    m_pad = _round_up(m_pad, tm)
    return tm, m_pad


def _pick_tk(k_true, pref=512):
    """K-tile (lane dim of cols): multiple of 128, padded K divisible by tile."""
    k_pad = _round_up(k_true, 128)
    tk = min(pref, k_pad)
    k_pad = _round_up(k_pad, tk)
    return tk, k_pad


# ---------------------------------------------------------------------------
# Pallas kernels
# ---------------------------------------------------------------------------

def _make_conv_bias_stats_kernel(tm, m_true):
    """Tiled conv-as-matmul + bias, also emits per-M-tile sum / sum-of-squares
    (masked to the valid rows) so BatchNorm stats can be finished cheaply outside.

    cols_ref : [TM, TK]  bf16       w_ref : [TK, C_pad]  bf16
    b_ref    : [1, C_pad] f32
    y_ref    : [TM, C_pad] f32      s1_ref / s2_ref : [1, 1, C_pad] f32
    acc_ref  : [TM, C_pad] f32 scratch
    """

    def kernel(cols_ref, w_ref, b_ref, y_ref, s1_ref, s2_ref, acc_ref):
        # NOTE: program_id / num_programs must be read at the kernel top level
        # (outside any pl.when branch) so they lower correctly.
        i = pl.program_id(0)
        k = pl.program_id(1)
        k_last = pl.num_programs(1) - 1
        row0 = i * tm

        @pl.when(k == 0)
        def _init():
            acc_ref[...] = jnp.zeros_like(acc_ref)

        acc_ref[...] += jnp.dot(cols_ref[...], w_ref[...],
                                preferred_element_type=jnp.float32)

        @pl.when(k == k_last)
        def _finalize():
            y = acc_ref[...] + b_ref[...]
            y_ref[...] = y
            rows = row0 + jax.lax.broadcasted_iota(
                jnp.int32, y.shape, 0)
            ym = jnp.where(rows < m_true, y, 0.0)
            s1_ref[...] = jnp.sum(ym, axis=0, keepdims=True)[None]
            s2_ref[...] = jnp.sum(ym * ym, axis=0, keepdims=True)[None]

    return kernel


def _matmul_bias_kernel(cols_ref, w_ref, b_ref, o_ref, acc_ref):
    """Tiled conv-as-matmul + bias (final conv, lane-dense padded output)."""
    k = pl.program_id(1)
    k_last = pl.num_programs(1) - 1

    @pl.when(k == 0)
    def _init():
        acc_ref[...] = jnp.zeros_like(acc_ref)

    acc_ref[...] += jnp.dot(cols_ref[...], w_ref[...],
                            preferred_element_type=jnp.float32)

    @pl.when(k == k_last)
    def _finalize():
        o_ref[...] = acc_ref[...] + b_ref[...]


def _bn_lrelu_kernel(y_ref, scale_ref, shift_ref, o_ref):
    """Pass 2: y * scale + shift followed by LeakyReLU(0.2)."""
    z = y_ref[...] * scale_ref[...] + shift_ref[...]
    o_ref[...] = jnp.where(z >= 0, z, LRELU_SLOPE * z)


def _mbstd_kernel(x_ref, o_ref):
    """MinibatchStdLayer statistic: mean over (C,H,W) of unbiased std over batch.

    x_ref : [N, C*H*W] f32   o_ref : [1, 1] f32
    """
    x = x_ref[...]
    n = x.shape[0]
    mean = jnp.mean(x, axis=0, keepdims=True)
    # TODO(synk): matches torch.std default (unbiased, /(n-1)); NaN/inf if n == 1.
    var = jnp.sum((x - mean) * (x - mean), axis=0, keepdims=True) / (n - 1)
    std = jnp.sqrt(var)
    o_ref[...] = jnp.mean(std, axis=1, keepdims=True)


# ---------------------------------------------------------------------------
# Pallas wrappers
# ---------------------------------------------------------------------------

def conv_bias_stats(cols, w2d, b_row, m_true, tm, tk):
    m_pad, k_pad = cols.shape
    _, c_pad = w2d.shape
    grid = (m_pad // tm, k_pad // tk)
    kernel = _make_conv_bias_stats_kernel(tm, m_true)
    out_shape = (
        jax.ShapeDtypeStruct((m_pad, c_pad), jnp.float32),
        jax.ShapeDtypeStruct((grid[0], 1, c_pad), jnp.float32),
        jax.ShapeDtypeStruct((grid[0], 1, c_pad), jnp.float32),
    )
    return pl.pallas_call(
        kernel,
        out_shape=out_shape,
        grid_spec=pltpu.PrefetchScalarGridSpec(
            num_scalar_prefetch=0,
            grid=grid,
            in_specs=[
                pl.BlockSpec((tm, tk), lambda i, k: (i, k)),
                pl.BlockSpec((tk, c_pad), lambda i, k: (k, 0)),
                pl.BlockSpec((1, c_pad), lambda i, k: (0, 0)),
            ],
            out_specs=(
                pl.BlockSpec((tm, c_pad), lambda i, k: (i, 0)),
                pl.BlockSpec((1, 1, c_pad), lambda i, k: (i, 0, 0)),
                pl.BlockSpec((1, 1, c_pad), lambda i, k: (i, 0, 0)),
            ),
            scratch_shapes=[pltpu.VMEM((tm, c_pad), jnp.float32)],
        ),
        compiler_params=pltpu.CompilerParams(
            dimension_semantics=("parallel", "arbitrary")),
    )(cols, w2d, b_row)


def matmul_bias(cols, w2d, b_row, tm, tk):
    m_pad, k_pad = cols.shape
    _, c_pad = w2d.shape
    grid = (m_pad // tm, k_pad // tk)
    return pl.pallas_call(
        _matmul_bias_kernel,
        out_shape=jax.ShapeDtypeStruct((m_pad, c_pad), jnp.float32),
        grid_spec=pltpu.PrefetchScalarGridSpec(
            num_scalar_prefetch=0,
            grid=grid,
            in_specs=[
                pl.BlockSpec((tm, tk), lambda i, k: (i, k)),
                pl.BlockSpec((tk, c_pad), lambda i, k: (k, 0)),
                pl.BlockSpec((1, c_pad), lambda i, k: (0, 0)),
            ],
            out_specs=pl.BlockSpec((tm, c_pad), lambda i, k: (i, 0)),
            scratch_shapes=[pltpu.VMEM((tm, c_pad), jnp.float32)],
        ),
        compiler_params=pltpu.CompilerParams(
            dimension_semantics=("parallel", "arbitrary")),
    )(cols, w2d, b_row)


def bn_lrelu_apply(y, scale_row, shift_row, tm):
    m_pad, c_pad = y.shape
    grid = (m_pad // tm,)
    return pl.pallas_call(
        _bn_lrelu_kernel,
        out_shape=jax.ShapeDtypeStruct((m_pad, c_pad), jnp.float32),
        grid_spec=pltpu.PrefetchScalarGridSpec(
            num_scalar_prefetch=0,
            grid=grid,
            in_specs=[
                pl.BlockSpec((tm, c_pad), lambda i: (i, 0)),
                pl.BlockSpec((1, c_pad), lambda i: (0, 0)),
                pl.BlockSpec((1, c_pad), lambda i: (0, 0)),
            ],
            out_specs=pl.BlockSpec((tm, c_pad), lambda i: (i, 0)),
        ),
        compiler_params=pltpu.CompilerParams(
            dimension_semantics=("parallel",)),
    )(y, scale_row, shift_row)


def minibatch_std_scalar(x2d):
    return pl.pallas_call(
        _mbstd_kernel,
        out_shape=jax.ShapeDtypeStruct((1, 1), jnp.float32),
        in_specs=[pl.BlockSpec(memory_space=pltpu.MemorySpace.VMEM)],
        out_specs=pl.BlockSpec(memory_space=pltpu.MemorySpace.VMEM),
    )(x2d)


# ---------------------------------------------------------------------------
# Glue: NHWC im2col (patch ordering kh, kw, cin — contiguous, no transpose)
# ---------------------------------------------------------------------------

def im2col_nhwc(x, k, stride, pad):
    """x: [N, H, W, C] -> ([N*Ho*Wo, k*k*C], (N, Ho, Wo))."""
    n, h, w, c = x.shape
    if pad:
        x = jnp.pad(x, ((0, 0), (pad, pad), (pad, pad), (0, 0)))
    ho = (h + 2 * pad - k) // stride + 1
    wo = (w + 2 * pad - k) // stride + 1
    ih = (jnp.arange(ho) * stride)[:, None] + jnp.arange(k)[None, :]   # [Ho,k]
    iw = (jnp.arange(wo) * stride)[:, None] + jnp.arange(k)[None, :]   # [Wo,k]
    patches = x[:, ih[:, None, :, None], iw[None, :, None, :], :]      # [N,Ho,Wo,k,k,C]
    cols = patches.reshape(n * ho * wo, k * k * c)
    return cols, (n, ho, wo)


# ---------------------------------------------------------------------------
# Parameter preparation (reshape/pad/cast weights once at init)
# ---------------------------------------------------------------------------

def _prep_down(w, b, gamma, beta):
    cout, cin, kh, kw = w.shape
    k_true = kh * kw * cin
    tk, k_pad = _pick_tk(k_true)
    c_pad = _round_up(cout, 128)
    w2d = jnp.transpose(w, (2, 3, 1, 0)).reshape(k_true, cout)            # kh,kw,cin -> cout
    w2d = jnp.pad(w2d, ((0, k_pad - k_true), (0, c_pad - cout))).astype(jnp.bfloat16)
    return dict(
        w2d=w2d,
        b=jnp.pad(b, (0, c_pad - cout)).reshape(1, c_pad).astype(jnp.float32),
        gamma=jnp.pad(gamma, (0, c_pad - cout)).astype(jnp.float32),
        beta=jnp.pad(beta, (0, c_pad - cout)).astype(jnp.float32),
        cout=cout, tk=tk, k_true=k_true,
    )


def _prep_final(w, b):
    cout, cin_p1, kh, kw = w.shape            # cout == 1
    cin = cin_p1 - 1
    k_true = kh * kw * cin
    tk, k_pad = _pick_tk(k_true)
    c_pad = 128                               # lane-dense padded output channel
    w_main = jnp.transpose(w[:, :cin], (2, 3, 1, 0)).reshape(k_true, cout)
    w2d = jnp.pad(w_main, ((0, k_pad - k_true), (0, c_pad - cout))).astype(jnp.bfloat16)
    return dict(
        w2d=w2d,
        # extra (minibatch-std) channel is spatially constant -> folds into bias
        w_extra_sum=jnp.sum(w[:, cin]).astype(jnp.float32),
        b=b[0].astype(jnp.float32),
        tk=tk, k_true=k_true,
    )


def init_discriminator_params(key, in_ch, levels):
    down = []
    for out_ch in levels:
        key, k1, k2, k3, k4 = jax.random.split(key, 5)
        w = 0.1 * jax.random.normal(k1, (out_ch, in_ch, 4, 4), jnp.float32)
        b = 0.01 * jax.random.normal(k2, (out_ch,), jnp.float32)
        gamma = 1.0 + 0.1 * jax.random.normal(k3, (out_ch,), jnp.float32)
        beta = 0.01 * jax.random.normal(k4, (out_ch,), jnp.float32)
        down.append(_prep_down(w, b, gamma, beta))
        in_ch = out_ch
    key, k1, k2 = jax.random.split(key, 3)
    wf = 0.1 * jax.random.normal(k1, (1, in_ch + 1, 4, 4), jnp.float32)
    bf = 0.01 * jax.random.normal(k2, (1,), jnp.float32)
    return {"down": down, "final": _prep_final(wf, bf)}


# ---------------------------------------------------------------------------
# Forward pass
# ---------------------------------------------------------------------------

def downblock_forward(x, p):
    """Conv(4,2,1) + BatchNorm2d(batch stats) + LeakyReLU(0.2), NHWC in/out."""
    cols, (n, ho, wo) = im2col_nhwc(x.astype(jnp.bfloat16), 4, 2, 1)
    m, k_true = cols.shape
    k_pad, c_pad = p["w2d"].shape
    tm, m_pad = _pick_tm(m)
    cols = jnp.pad(cols, ((0, m_pad - m), (0, k_pad - k_true)))

    # Pass 1: tiled matmul + bias, with per-tile sum / sumsq side outputs.
    y, s1p, s2p = conv_bias_stats(cols, p["w2d"], p["b"], m, tm, p["tk"])

    # Finish BN stats (tiny XLA reduce over M-tiles); biased variance = training mode.
    s1 = jnp.sum(s1p, axis=(0, 1))
    s2 = jnp.sum(s2p, axis=(0, 1))
    mean = s1 / m
    var = jnp.maximum(s2 / m - mean * mean, 0.0)
    scale = p["gamma"] * jax.lax.rsqrt(var + BN_EPS)
    shift = p["beta"] - mean * scale

    # Pass 2: elementwise BN apply + LeakyReLU, tiled over M.
    act = bn_lrelu_apply(y, scale.reshape(1, -1), shift.reshape(1, -1), tm)
    return act[:m, :p["cout"]].reshape(n, ho, wo, p["cout"])


def discriminator_forward(x_nchw, params):
    """x: [N, C, H, W] (NCHW) -> logit [N, 1, Ho, Wo] (NCHW)."""
    x = jnp.transpose(x_nchw.astype(jnp.float32), (0, 2, 3, 1))   # NHWC internally
    for p in params["down"]:
        x = downblock_forward(x, p)

    # MinibatchStdLayer scalar (extra channel is constant -> folded into final bias).
    n, h, w, c = x.shape
    s = minibatch_std_scalar(x.reshape(n, h * w * c))[0, 0]

    # Final Conv2DSN(in+1, 1, kernel_size=4, stride=1, padding=0)
    pf = params["final"]
    cols, (n, ho, wo) = im2col_nhwc(x.astype(jnp.bfloat16), 4, 1, 0)
    m, k_true = cols.shape
    k_pad, c_pad = pf["w2d"].shape
    tm, m_pad = _pick_tm(m)
    cols = jnp.pad(cols, ((0, m_pad - m), (0, k_pad - k_true)))
    b_eff = pf["b"] + s * pf["w_extra_sum"]
    b_row = jnp.zeros((1, c_pad), jnp.float32).at[0, 0].set(b_eff)
    y = matmul_bias(cols, pf["w2d"], b_row, tm, pf["tk"])         # [M_pad, 128]
    logit = y[:m, :1].reshape(n, ho, wo, 1)
    return jnp.transpose(logit, (0, 3, 1, 2))                     # back to NCHW


class MultiScaleDiscriminatorPallas:
    def __init__(self, feature_channels, level_channels=None, seed=0):
        if level_channels is None:
            level_channels = [64, 128, 256, 512]
        levels = [level_channels[i:] for i in range(len(level_channels))]
        key = jax.random.PRNGKey(seed)
        self.params = []
        for i in range(len(feature_channels)):
            key, sub = jax.random.split(key)
            self.params.append(
                init_discriminator_params(sub, feature_channels[i], levels[i]))
        self._fwds = [
            jax.jit(functools.partial(discriminator_forward, params=p))
            for p in self.params
        ]

    def __call__(self, feats: dict):
        logits = {}
        for fwd, feat_idx in zip(self._fwds, feats):
            logits[feat_idx] = fwd(feats[feat_idx])
        return logits


# ---------------------------------------------------------------------------
# Demo
# ---------------------------------------------------------------------------

if __name__ == "__main__":
    key = jax.random.PRNGKey(0)
    k0, k1 = jax.random.split(key)

    # Small, self-consistent shapes:
    #  disc0: 4 DownBlocks (64x64 -> 4x4 before the final 4x4 conv)
    #  disc1: 3 DownBlocks (32x32 -> 4x4 before the final 4x4 conv)
    feature_channels = [4, 6]
    level_channels = [8, 12, 16, 16]

    feats = {
        "f0": jax.random.normal(k0, (2, 4, 64, 64), jnp.float32),
        "f1": jax.random.normal(k1, (2, 6, 32, 32), jnp.float32),
    }

    model = MultiScaleDiscriminatorPallas(feature_channels, level_channels, seed=0)
    logits = model(feats)
    logits = jax.block_until_ready(logits)

    assert logits["f0"].shape == (2, 1, 1, 1), logits["f0"].shape
    assert logits["f1"].shape == (2, 1, 1, 1), logits["f1"].shape
    assert all(bool(jnp.all(jnp.isfinite(v))) for v in logits.values())
    print("KERNEL_OK")
</pallas_src>

<mosaic_0001>
module attributes {stable_mosaic.version = 11 : i64} {
  func.func @kernel(%arg0: i32, %arg1: i32, %arg2: memref<512x128xbf16, #tpu.memory_space<vmem>>, %arg3: memref<128x128xbf16, #tpu.memory_space<vmem>>, %arg4: memref<1x128xf32, #tpu.memory_space<vmem>>, %arg5: memref<512x128xf32, #tpu.memory_space<vmem>>, %arg6: memref<1x1x128xf32, #tpu.memory_space<vmem>>, %arg7: memref<1x1x128xf32, #tpu.memory_space<vmem>>, %arg8: memref<512x128xf32, #tpu.memory_space<vmem>>) attributes {dimension_semantics = [#tpu.dimension_semantics<parallel>, #tpu.dimension_semantics<arbitrary>], iteration_bounds = array<i64: 4, 1>, scalar_prefetch = 0 : i64, scratch_operands = 1 : i64, tpu.core_type = #tpu.core_type<tc>, window_params = [{transform_indices = @transform_0, window_bounds = array<i64: 512, 128>}, {transform_indices = @transform_1, window_bounds = array<i64: 128, 128>}, {pipeline_mode = #tpu.pipeline_mode<synchronous>, transform_indices = @transform_2, window_bounds = array<i64: 1, 128>}, {transform_indices = @transform_3, window_bounds = array<i64: 512, 128>}, {transform_indices = @transform_4, window_bounds = array<i64: 1, 1, 128>}, {transform_indices = @transform_5, window_bounds = array<i64: 1, 1, 128>}]} {
    %c512_i32 = arith.constant 512 : i32
    %0 = arith.muli %arg0, %c512_i32 : i32
    %c0_i32 = arith.constant 0 : i32
    %1 = arith.cmpi eq, %arg1, %c0_i32 : i32
    %2 = arith.extui %1 : i1 to i32
    %c0_i32_0 = arith.constant 0 : i32
    %3 = arith.cmpi ne, %2, %c0_i32_0 : i32
    scf.if %3 {
      %cst_10 = arith.constant 0.000000e+00 : f32
      %13 = vector.broadcast %cst_10 : f32 to vector<512x128xf32>
      %c0_11 = arith.constant 0 : index
      %c0_12 = arith.constant 0 : index
      %14 = vector.load %arg8[%c0_11, %c0_12] : memref<512x128xf32, #tpu.memory_space<vmem>>, vector<512x128xf32>
      tpu.vector_store %arg8[%c0_11, %c0_12], %13 {strides = array<i32>} : memref<512x128xf32, #tpu.memory_space<vmem>>, vector<512x128xf32>,
    } else {
    }
    %c0 = arith.constant 0 : index
    %c0_1 = arith.constant 0 : index
    %4 = vector.load %arg8[%c0, %c0_1] : memref<512x128xf32, #tpu.memory_space<vmem>>, vector<512x128xf32>
    %c0_2 = arith.constant 0 : index
    %c0_3 = arith.constant 0 : index
    %5 = vector.load %arg2[%c0_2, %c0_3] : memref<512x128xbf16, #tpu.memory_space<vmem>>, vector<512x128xbf16>
    %c0_4 = arith.constant 0 : index
    %c0_5 = arith.constant 0 : index
    %6 = vector.load %arg3[%c0_4, %c0_5] : memref<128x128xbf16, #tpu.memory_space<vmem>>, vector<128x128xbf16>
    %cst = arith.constant dense<0.000000e+00> : vector<512x128xf32>
    %7 = tpu.matmul %5, %6, %cst {dimension_numbers = #tpu.dot_dimension_numbers<[1], [0], [0], [1], [0, 0, 1, 1], [], []>} : vector<512x128xbf16>, vector<128x128xbf16>, vector<512x128xf32> -> vector<512x128xf32>
    %8 = arith.addf %4, %7 : vector<512x128xf32>
    %c0_6 = arith.constant 0 : index
    %c0_7 = arith.constant 0 : index
    %9 = vector.load %arg8[%c0_6, %c0_7] : memref<512x128xf32, #tpu.memory_space<vmem>>, vector<512x128xf32>
    tpu.vector_store %arg8[%c0_6, %c0_7], %8 {strides = array<i32>} : memref<512x128xf32, #tpu.memory_space<vmem>>, vector<512x128xf32>,
    %c0_i32_8 = arith.constant 0 : i32
    %10 = arith.cmpi eq, %arg1, %c0_i32_8 : i32
    %11 = arith.extui %10 : i1 to i32
    %c0_i32_9 = arith.constant 0 : i32
    %12 = arith.cmpi ne, %11, %c0_i32_9 : i32
    scf.if %12 {
      %c0_10 = arith.constant 0 : index
      %c0_11 = arith.constant 0 : index
      %13 = vector.load %arg8[%c0_10, %c0_11] : memref<512x128xf32, #tpu.memory_space<vmem>>, vector<512x128xf32>
      %c0_12 = arith.constant 0 : index
      %c0_13 = arith.constant 0 : index
      %14 = vector.load %arg4[%c0_12, %c0_13] : memref<1x128xf32, #tpu.memory_space<vmem>>, vector<1x128xf32>
      %15 = vector.broadcast %14 : vector<1x128xf32> to vector<512x128xf32>
      %16 = arith.addf %13, %15 : vector<512x128xf32>
      %c0_14 = arith.constant 0 : index
      %c0_15 = arith.constant 0 : index
      %17 = vector.load %arg5[%c0_14, %c0_15] : memref<512x128xf32, #tpu.memory_space<vmem>>, vector<512x128xf32>
      tpu.vector_store %arg5[%c0_14, %c0_15], %16 {strides = array<i32>} : memref<512x128xf32, #tpu.memory_space<vmem>>, vector<512x128xf32>,
      %18 = tpu.iota {dimensions = array<i32: 0>} : vector<512x128xi32>
      %19 = vector.broadcast %0 : i32 to vector<512x128xi32>
      %20 = arith.addi %19, %18 : vector<512x128xi32>
      %c2048_i32 = arith.constant 2048 : i32
      %21 = vector.broadcast %c2048_i32 : i32 to vector<512x128xi32>
      %22 = arith.cmpi slt, %20, %21 : vector<512x128xi32>
      %cst_16 = arith.constant 0.000000e+00 : f32
      %23 = vector.broadcast %cst_16 : f32 to vector<512x128xf32>
      %24 = arith.select %22, %16, %23 : vector<512x128xi1>, vector<512x128xf32>
      %cst_17 = arith.constant dense<0.000000e+00> : vector<128xf32>
      %25 = vector.multi_reduction <add>, %24, %cst_17 [0] : vector<512x128xf32> to vector<128xf32>
      %26 = vector.shape_cast %25 : vector<128xf32> to vector<1x128xf32>
      %27 = vector.shape_cast %26 : vector<1x128xf32> to vector<1x1x128xf32>
      %c0_18 = arith.constant 0 : index
      %c0_19 = arith.constant 0 : index
      %c0_20 = arith.constant 0 : index
      %28 = vector.load %arg6[%c0_18, %c0_19, %c0_20] : memref<1x1x128xf32, #tpu.memory_space<vmem>>, vector<1x1x128xf32>
      tpu.vector_store %arg6[%c0_18, %c0_19, %c0_20], %27 {strides = array<i32>} : memref<1x1x128xf32, #tpu.memory_space<vmem>>, vector<1x1x128xf32>,
      %29 = arith.mulf %24, %24 : vector<512x128xf32>
      %cst_21 = arith.constant dense<0.000000e+00> : vector<128xf32>
      %30 = vector.multi_reduction <add>, %29, %cst_21 [0] : vector<512x128xf32> to vector<128xf32>
      %31 = vector.shape_cast %30 : vector<128xf32> to vector<1x128xf32>
      %32 = vector.shape_cast %31 : vector<1x128xf32> to vector<1x1x128xf32>
      %c0_22 = arith.constant 0 : index
      %c0_23 = arith.constant 0 : index
      %c0_24 = arith.constant 0 : index
      %33 = vector.load %arg7[%c0_22, %c0_23, %c0_24] : memref<1x1x128xf32, #tpu.memory_space<vmem>>, vector<1x1x128xf32>
      tpu.vector_store %arg7[%c0_22, %c0_23, %c0_24], %32 {strides = array<i32>} : memref<1x1x128xf32, #tpu.memory_space<vmem>>, vector<1x1x128xf32>,
    } else {
    }
    return
  }
  func.func @transform_0(%arg0: i32, %arg1: i32) -> (i32, i32) {
    %c0_i32 = arith.constant 0 : i32
    return %arg0, %arg1 : i32, i32
  }
  func.func @transform_1(%arg0: i32, %arg1: i32) -> (i32, i32) {
    %c0_i32 = arith.constant 0 : i32
    %c0_i32_0 = arith.constant 0 : i32
    return %arg1, %c0_i32 : i32, i32
  }
  func.func @transform_2(%arg0: i32, %arg1: i32) -> (i32, i32) {
    %c0_i32 = arith.constant 0 : i32
    %c0_i32_0 = arith.constant 0 : i32
    %c0_i32_1 = arith.constant 0 : i32
    return %c0_i32, %c0_i32_0 : i32, i32
  }
  func.func @transform_3(%arg0: i32, %arg1: i32) -> (i32, i32) {
    %c0_i32 = arith.constant 0 : i32
    %c0_i32_0 = arith.constant 0 : i32
    return %arg0, %c0_i32 : i32, i32
  }
  func.func @transform_4(%arg0: i32, %arg1: i32) -> (i32, i32, i32) {
    %c0_i32 = arith.constant 0 : i32
    %c0_i32_0 = arith.constant 0 : i32
    %c0_i32_1 = arith.constant 0 : i32
    return %arg0, %c0_i32, %c0_i32_0 : i32, i32, i32
  }
  func.func @transform_5(%arg0: i32, %arg1: i32) -> (i32, i32, i32) {
    %c0_i32 = arith.constant 0 : i32
    %c0_i32_0 = arith.constant 0 : i32
    %c0_i32_1 = arith.constant 0 : i32
    return %arg0, %c0_i32, %c0_i32_0 : i32, i32, i32
  }
}

module attributes {stable_mosaic.version = 11 : i64} {
  func.func @_bn_lrelu_kernel(%arg0: i32, %arg1: memref<512x128xf32, #tpu.memory_space<vmem>>, %arg2: memref<1x128xf32, #tpu.memory_space<vmem>>, %arg3: memref<1x128xf32, #tpu.memory_space<vmem>>, %arg4: memref<512x128xf32, #tpu.memory_space<vmem>>) attributes {dimension_semantics = [#tpu.dimension_semantics<parallel>], iteration_bounds = array<i64: 4>, scalar_prefetch = 0 : i64, scratch_operands = 0 : i64, tpu.core_type = #tpu.core_type<tc>, window_params = [{transform_indices = @transform_0, window_bounds = array<i64: 512, 128>}, {pipeline_mode = #tpu.pipeline_mode<synchronous>, transform_indices = @transform_1, window_bounds = array<i64: 1, 128>}, {pipeline_mode = #tpu.pipeline_mode<synchronous>, transform_indices = @transform_2, window_bounds = array<i64: 1, 128>}, {transform_indices = @transform_3, window_bounds = array<i64: 512, 128>}]} {
    %c0 = arith.constant 0 : index
    %c0_0 = arith.constant 0 : index
    %0 = vector.load %arg1[%c0, %c0_0] : memref<512x128xf32, #tpu.memory_space<vmem>>, vector<512x128xf32>
    %c0_1 = arith.constant 0 : index
    %c0_2 = arith.constant 0 : index
    %1 = vector.load %arg2[%c0_1, %c0_2] : memref<1x128xf32, #tpu.memory_space<vmem>>, vector<1x128xf32>
    %2 = vector.broadcast %1 : vector<1x128xf32> to vector<512x128xf32>
    %3 = arith.mulf %0, %2 : vector<512x128xf32>
    %c0_3 = arith.constant 0 : index
    %c0_4 = arith.constant 0 : index
    %4 = vector.load %arg3[%c0_3, %c0_4] : memref<1x128xf32, #tpu.memory_space<vmem>>, vector<1x128xf32>
    %5 = vector.broadcast %4 : vector<1x128xf32> to vector<512x128xf32>
    %6 = arith.addf %3, %5 : vector<512x128xf32>
    %cst = arith.constant 0.000000e+00 : f32
    %7 = vector.broadcast %cst : f32 to vector<512x128xf32>
    %8 = arith.cmpf oge, %6, %7 : vector<512x128xf32>
    %cst_5 = arith.constant 2.000000e-01 : f32
    %9 = vector.broadcast %cst_5 : f32 to vector<512x128xf32>
    %10 = arith.mulf %9, %6 : vector<512x128xf32>
    %11 = arith.select %8, %6, %10 : vector<512x128xi1>, vector<512x128xf32>
    %c0_6 = arith.constant 0 : index
    %c0_7 = arith.constant 0 : index
    %12 = vector.load %arg4[%c0_6, %c0_7] : memref<512x128xf32, #tpu.memory_space<vmem>>, vector<512x128xf32>
    tpu.vector_store %arg4[%c0_6, %c0_7], %11 {strides = array<i32>} : memref<512x128xf32, #tpu.memory_space<vmem>>, vector<512x128xf32>,
    return
  }
  func.func @transform_0(%arg0: i32) -> (i32, i32) {
    %c0_i32 = arith.constant 0 : i32
    %c0_i32_0 = arith.constant 0 : i32
    return %arg0, %c0_i32 : i32, i32
  }
  func.func @transform_1(%arg0: i32) -> (i32, i32) {
    %c0_i32 = arith.constant 0 : i32
    %c0_i32_0 = arith.constant 0 : i32
    %c0_i32_1 = arith.constant 0 : i32
    return %c0_i32, %c0_i32_0 : i32, i32
  }
  func.func @transform_2(%arg0: i32) -> (i32, i32) {
    %c0_i32 = arith.constant 0 : i32
    %c0_i32_0 = arith.constant 0 : i32
    %c0_i32_1 = arith.constant 0 : i32
    return %c0_i32, %c0_i32_0 : i32, i32
  }
  func.func @transform_3(%arg0: i32) -> (i32, i32) {
    %c0_i32 = arith.constant 0 : i32
    %c0_i32_0 = arith.constant 0 : i32
    return %arg0, %c0_i32 : i32, i32
  }
}

module attributes {stable_mosaic.version = 11 : i64} {
  func.func @kernel(%arg0: i32, %arg1: i32, %arg2: memref<512x128xbf16, #tpu.memory_space<vmem>>, %arg3: memref<128x128xbf16, #tpu.memory_space<vmem>>, %arg4: memref<1x128xf32, #tpu.memory_space<vmem>>, %arg5: memref<512x128xf32, #tpu.memory_space<vmem>>, %arg6: memref<1x1x128xf32, #tpu.memory_space<vmem>>, %arg7: memref<1x1x128xf32, #tpu.memory_space<vmem>>, %arg8: memref<512x128xf32, #tpu.memory_space<vmem>>) attributes {dimension_semantics = [#tpu.dimension_semantics<parallel>, #tpu.dimension_semantics<arbitrary>], iteration_bounds = array<i64: 1, 1>, scalar_prefetch = 0 : i64, scratch_operands = 1 : i64, tpu.core_type = #tpu.core_type<tc>, window_params = [{transform_indices = @transform_0, window_bounds = array<i64: 512, 128>}, {transform_indices = @transform_1, window_bounds = array<i64: 128, 128>}, {pipeline_mode = #tpu.pipeline_mode<synchronous>, transform_indices = @transform_2, window_bounds = array<i64: 1, 128>}, {transform_indices = @transform_3, window_bounds = array<i64: 512, 128>}, {transform_indices = @transform_4, window_bounds = array<i64: 1, 1, 128>}, {transform_indices = @transform_5, window_bounds = array<i64: 1, 1, 128>}]} {
    %c512_i32 = arith.constant 512 : i32
    %0 = arith.muli %arg0, %c512_i32 : i32
    %c0_i32 = arith.constant 0 : i32
    %1 = arith.cmpi eq, %arg1, %c0_i32 : i32
    %2 = arith.extui %1 : i1 to i32
    %c0_i32_0 = arith.constant 0 : i32
    %3 = arith.cmpi ne, %2, %c0_i32_0 : i32
    scf.if %3 {
      %cst_10 = arith.constant 0.000000e+00 : f32
      %13 = vector.broadcast %cst_10 : f32 to vector<512x128xf32>
      %c0_11 = arith.constant 0 : index
      %c0_12 = arith.constant 0 : index
      %14 = vector.load %arg8[%c0_11, %c0_12] : memref<512x128xf32, #tpu.memory_space<vmem>>, vector<512x128xf32>
      tpu.vector_store %arg8[%c0_11, %c0_12], %13 {strides = array<i32>} : memref<512x128xf32, #tpu.memory_space<vmem>>, vector<512x128xf32>,
    } else {
    }
    %c0 = arith.constant 0 : index
    %c0_1 = arith.constant 0 : index
    %4 = vector.load %arg8[%c0, %c0_1] : memref<512x128xf32, #tpu.memory_space<vmem>>, vector<512x128xf32>
    %c0_2 = arith.constant 0 : index
    %c0_3 = arith.constant 0 : index
    %5 = vector.load %arg2[%c0_2, %c0_3] : memref<512x128xbf16, #tpu.memory_space<vmem>>, vector<512x128xbf16>
    %c0_4 = arith.constant 0 : index
    %c0_5 = arith.constant 0 : index
    %6 = vector.load %arg3[%c0_4, %c0_5] : memref<128x128xbf16, #tpu.memory_space<vmem>>, vector<128x128xbf16>
    %cst = arith.constant dense<0.000000e+00> : vector<512x128xf32>
    %7 = tpu.matmul %5, %6, %cst {dimension_numbers = #tpu.dot_dimension_numbers<[1], [0], [0], [1], [0, 0, 1, 1], [], []>} : vector<512x128xbf16>, vector<128x128xbf16>, vector<512x128xf32> -> vector<512x128xf32>
    %8 = arith.addf %4, %7 : vector<512x128xf32>
    %c0_6 = arith.constant 0 : index
    %c0_7 = arith.constant 0 : index
    %9 = vector.load %arg8[%c0_6, %c0_7] : memref<512x128xf32, #tpu.memory_space<vmem>>, vector<512x128xf32>
    tpu.vector_store %arg8[%c0_6, %c0_7], %8 {strides = array<i32>} : memref<512x128xf32, #tpu.memory_space<vmem>>, vector<512x128xf32>,
    %c0_i32_8 = arith.constant 0 : i32
    %10 = arith.cmpi eq, %arg1, %c0_i32_8 : i32
    %11 = arith.extui %10 : i1 to i32
    %c0_i32_9 = arith.constant 0 : i32
    %12 = arith.cmpi ne, %11, %c0_i32_9 : i32
    scf.if %12 {
      %c0_10 = arith.constant 0 : index
      %c0_11 = arith.constant 0 : index
      %13 = vector.load %arg8[%c0_10, %c0_11] : memref<512x128xf32, #tpu.memory_space<vmem>>, vector<512x128xf32>
      %c0_12 = arith.constant 0 : index
      %c0_13 = arith.constant 0 : index
      %14 = vector.load %arg4[%c0_12, %c0_13] : memref<1x128xf32, #tpu.memory_space<vmem>>, vector<1x128xf32>
      %15 = vector.broadcast %14 : vector<1x128xf32> to vector<512x128xf32>
      %16 = arith.addf %13, %15 : vector<512x128xf32>
      %c0_14 = arith.constant 0 : index
      %c0_15 = arith.constant 0 : index
      %17 = vector.load %arg5[%c0_14, %c0_15] : memref<512x128xf32, #tpu.memory_space<vmem>>, vector<512x128xf32>
      tpu.vector_store %arg5[%c0_14, %c0_15], %16 {strides = array<i32>} : memref<512x128xf32, #tpu.memory_space<vmem>>, vector<512x128xf32>,
      %18 = tpu.iota {dimensions = array<i32: 0>} : vector<512x128xi32>
      %19 = vector.broadcast %0 : i32 to vector<512x128xi32>
      %20 = arith.addi %19, %18 : vector<512x128xi32>
      %c512_i32_16 = arith.constant 512 : i32
      %21 = vector.broadcast %c512_i32_16 : i32 to vector<512x128xi32>
      %22 = arith.cmpi slt, %20, %21 : vector<512x128xi32>
      %cst_17 = arith.constant 0.000000e+00 : f32
      %23 = vector.broadcast %cst_17 : f32 to vector<512x128xf32>
      %24 = arith.select %22, %16, %23 : vector<512x128xi1>, vector<512x128xf32>
      %cst_18 = arith.constant dense<0.000000e+00> : vector<128xf32>
      %25 = vector.multi_reduction <add>, %24, %cst_18 [0] : vector<512x128xf32> to vector<128xf32>
      %26 = vector.shape_cast %25 : vector<128xf32> to vector<1x128xf32>
      %27 = vector.shape_cast %26 : vector<1x128xf32> to vector<1x1x128xf32>
      %c0_19 = arith.constant 0 : index
      %c0_20 = arith.constant 0 : index
      %c0_21 = arith.constant 0 : index
      %28 = vector.load %arg6[%c0_19, %c0_20, %c0_21] : memref<1x1x128xf32, #tpu.memory_space<vmem>>, vector<1x1x128xf32>
      tpu.vector_store %arg6[%c0_19, %c0_20, %c0_21], %27 {strides = array<i32>} : memref<1x1x128xf32, #tpu.memory_space<vmem>>, vector<1x1x128xf32>,
      %29 = arith.mulf %24, %24 : vector<512x128xf32>
      %cst_22 = arith.constant dense<0.000000e+00> : vector<128xf32>
      %30 = vector.multi_reduction <add>, %29, %cst_22 [0] : vector<512x128xf32> to vector<128xf32>
      %31 = vector.shape_cast %30 : vector<128xf32> to vector<1x128xf32>
      %32 = vector.shape_cast %31 : vector<1x128xf32> to vector<1x1x128xf32>
      %c0_23 = arith.constant 0 : index
      %c0_24 = arith.constant 0 : index
      %c0_25 = arith.constant 0 : index
      %33 = vector.load %arg7[%c0_23, %c0_24, %c0_25] : memref<1x1x128xf32, #tpu.memory_space<vmem>>, vector<1x1x128xf32>
      tpu.vector_store %arg7[%c0_23, %c0_24, %c0_25], %32 {strides = array<i32>} : memref<1x1x128xf32, #tpu.memory_space<vmem>>, vector<1x1x128xf32>,
    } else {
    }
    return
  }
  func.func @transform_0(%arg0: i32, %arg1: i32) -> (i32, i32) {
    %c0_i32 = arith.constant 0 : i32
    return %arg0, %arg1 : i32, i32
  }
  func.func @transform_1(%arg0: i32, %arg1: i32) -> (i32, i32) {
    %c0_i32 = arith.constant 0 : i32
    %c0_i32_0 = arith.constant 0 : i32
    return %arg1, %c0_i32 : i32, i32
  }
  func.func @transform_2(%arg0: i32, %arg1: i32) -> (i32, i32) {
    %c0_i32 = arith.constant 0 : i32
    %c0_i32_0 = arith.constant 0 : i32
    %c0_i32_1 = arith.constant 0 : i32
    return %c0_i32, %c0_i32_0 : i32, i32
  }
  func.func @transform_3(%arg0: i32, %arg1: i32) -> (i32, i32) {
    %c0_i32 = arith.constant 0 : i32
    %c0_i32_0 = arith.constant 0 : i32
    return %arg0, %c0_i32 : i32, i32
  }
  func.func @transform_4(%arg0: i32, %arg1: i32) -> (i32, i32, i32) {
    %c0_i32 = arith.constant 0 : i32
    %c0_i32_0 = arith.constant 0 : i32
    %c0_i32_1 = arith.constant 0 : i32
    return %arg0, %c0_i32, %c0_i32_0 : i32, i32, i32
  }
  func.func @transform_5(%arg0: i32, %arg1: i32) -> (i32, i32, i32) {
    %c0_i32 = arith.constant 0 : i32
    %c0_i32_0 = arith.constant 0 : i32
    %c0_i32_1 = arith.constant 0 : i32
    return %arg0, %c0_i32, %c0_i32_0 : i32, i32, i32
  }
}

module attributes {stable_mosaic.version = 11 : i64} {
  func.func @_bn_lrelu_kernel(%arg0: i32, %arg1: memref<512x128xf32, #tpu.memory_space<vmem>>, %arg2: memref<1x128xf32, #tpu.memory_space<vmem>>, %arg3: memref<1x128xf32, #tpu.memory_space<vmem>>, %arg4: memref<512x128xf32, #tpu.memory_space<vmem>>) attributes {dimension_semantics = [#tpu.dimension_semantics<parallel>], iteration_bounds = array<i64: 1>, scalar_prefetch = 0 : i64, scratch_operands = 0 : i64, tpu.core_type = #tpu.core_type<tc>, window_params = [{transform_indices = @transform_0, window_bounds = array<i64: 512, 128>}, {pipeline_mode = #tpu.pipeline_mode<synchronous>, transform_indices = @transform_1, window_bounds = array<i64: 1, 128>}, {pipeline_mode = #tpu.pipeline_mode<synchronous>, transform_indices = @transform_2, window_bounds = array<i64: 1, 128>}, {transform_indices = @transform_3, window_bounds = array<i64: 512, 128>}]} {
    %c0 = arith.constant 0 : index
    %c0_0 = arith.constant 0 : index
    %0 = vector.load %arg1[%c0, %c0_0] : memref<512x128xf32, #tpu.memory_space<vmem>>, vector<512x128xf32>
    %c0_1 = arith.constant 0 : index
    %c0_2 = arith.constant 0 : index
    %1 = vector.load %arg2[%c0_1, %c0_2] : memref<1x128xf32, #tpu.memory_space<vmem>>, vector<1x128xf32>
    %2 = vector.broadcast %1 : vector<1x128xf32> to vector<512x128xf32>
    %3 = arith.mulf %0, %2 : vector<512x128xf32>
    %c0_3 = arith.constant 0 : index
    %c0_4 = arith.constant 0 : index
    %4 = vector.load %arg3[%c0_3, %c0_4] : memref<1x128xf32, #tpu.memory_space<vmem>>, vector<1x128xf32>
    %5 = vector.broadcast %4 : vector<1x128xf32> to vector<512x128xf32>
    %6 = arith.addf %3, %5 : vector<512x128xf32>
    %cst = arith.constant 0.000000e+00 : f32
    %7 = vector.broadcast %cst : f32 to vector<512x128xf32>
    %8 = arith.cmpf oge, %6, %7 : vector<512x128xf32>
    %cst_5 = arith.constant 2.000000e-01 : f32
    %9 = vector.broadcast %cst_5 : f32 to vector<512x128xf32>
    %10 = arith.mulf %9, %6 : vector<512x128xf32>
    %11 = arith.select %8, %6, %10 : vector<512x128xi1>, vector<512x128xf32>
    %c0_6 = arith.constant 0 : index
    %c0_7 = arith.constant 0 : index
    %12 = vector.load %arg4[%c0_6, %c0_7] : memref<512x128xf32, #tpu.memory_space<vmem>>, vector<512x128xf32>
    tpu.vector_store %arg4[%c0_6, %c0_7], %11 {strides = array<i32>} : memref<512x128xf32, #tpu.memory_space<vmem>>, vector<512x128xf32>,
    return
  }
  func.func @transform_0(%arg0: i32) -> (i32, i32) {
    %c0_i32 = arith.constant 0 : i32
    %c0_i32_0 = arith.constant 0 : i32
    return %arg0, %c0_i32 : i32, i32
  }
  func.func @transform_1(%arg0: i32) -> (i32, i32) {
    %c0_i32 = arith.constant 0 : i32
    %c0_i32_0 = arith.constant 0 : i32
    %c0_i32_1 = arith.constant 0 : i32
    return %c0_i32, %c0_i32_0 : i32, i32
  }
  func.func @transform_2(%arg0: i32) -> (i32, i32) {
    %c0_i32 = arith.constant 0 : i32
    %c0_i32_0 = arith.constant 0 : i32
    %c0_i32_1 = arith.constant 0 : i32
    return %c0_i32, %c0_i32_0 : i32, i32
  }
  func.func @transform_3(%arg0: i32) -> (i32, i32) {
    %c0_i32 = arith.constant 0 : i32
    %c0_i32_0 = arith.constant 0 : i32
    return %arg0, %c0_i32 : i32, i32
  }
}

module attributes {stable_mosaic.version = 11 : i64} {
  func.func @kernel(%arg0: i32, %arg1: i32, %arg2: memref<128x256xbf16, #tpu.memory_space<vmem>>, %arg3: memref<256x128xbf16, #tpu.memory_space<vmem>>, %arg4: memref<1x128xf32, #tpu.memory_space<vmem>>, %arg5: memref<128x128xf32, #tpu.memory_space<vmem>>, %arg6: memref<1x1x128xf32, #tpu.memory_space<vmem>>, %arg7: memref<1x1x128xf32, #tpu.memory_space<vmem>>, %arg8: memref<128x128xf32, #tpu.memory_space<vmem>>) attributes {dimension_semantics = [#tpu.dimension_semantics<parallel>, #tpu.dimension_semantics<arbitrary>], iteration_bounds = array<i64: 1, 1>, scalar_prefetch = 0 : i64, scratch_operands = 1 : i64, tpu.core_type = #tpu.core_type<tc>, window_params = [{transform_indices = @transform_0, window_bounds = array<i64: 128, 256>}, {transform_indices = @transform_1, window_bounds = array<i64: 256, 128>}, {pipeline_mode = #tpu.pipeline_mode<synchronous>, transform_indices = @transform_2, window_bounds = array<i64: 1, 128>}, {transform_indices = @transform_3, window_bounds = array<i64: 128, 128>}, {transform_indices = @transform_4, window_bounds = array<i64: 1, 1, 128>}, {transform_indices = @transform_5, window_bounds = array<i64: 1, 1, 128>}]} {
    %c128_i32 = arith.constant 128 : i32
    %0 = arith.muli %arg0, %c128_i32 : i32
    %c0_i32 = arith.constant 0 : i32
    %1 = arith.cmpi eq, %arg1, %c0_i32 : i32
    %2 = arith.extui %1 : i1 to i32
    %c0_i32_0 = arith.constant 0 : i32
    %3 = arith.cmpi ne, %2, %c0_i32_0 : i32
    scf.if %3 {
      %cst_10 = arith.constant 0.000000e+00 : f32
      %13 = vector.broadcast %cst_10 : f32 to vector<128x128xf32>
      %c0_11 = arith.constant 0 : index
      %c0_12 = arith.constant 0 : index
      %14 = vector.load %arg8[%c0_11, %c0_12] : memref<128x128xf32, #tpu.memory_space<vmem>>, vector<128x128xf32>
      tpu.vector_store %arg8[%c0_11, %c0_12], %13 {strides = array<i32>} : memref<128x128xf32, #tpu.memory_space<vmem>>, vector<128x128xf32>,
    } else {
    }
    %c0 = arith.constant 0 : index
    %c0_1 = arith.constant 0 : index
    %4 = vector.load %arg8[%c0, %c0_1] : memref<128x128xf32, #tpu.memory_space<vmem>>, vector<128x128xf32>
    %c0_2 = arith.constant 0 : index
    %c0_3 = arith.constant 0 : index
    %5 = vector.load %arg2[%c0_2, %c0_3] : memref<128x256xbf16, #tpu.memory_space<vmem>>, vector<128x256xbf16>
    %c0_4 = arith.constant 0 : index
    %c0_5 = arith.constant 0 : index
    %6 = vector.load %arg3[%c0_4, %c0_5] : memref<256x128xbf16, #tpu.memory_space<vmem>>, vector<256x128xbf16>
    %cst = arith.constant dense<0.000000e+00> : vector<128x128xf32>
    %7 = tpu.matmul %5, %6, %cst {dimension_numbers = #tpu.dot_dimension_numbers<[1], [0], [0], [1], [0, 0, 1, 1], [], []>} : vector<128x256xbf16>, vector<256x128xbf16>, vector<128x128xf32> -> vector<128x128xf32>
    %8 = arith.addf %4, %7 : vector<128x128xf32>
    %c0_6 = arith.constant 0 : index
    %c0_7 = arith.constant 0 : index
    %9 = vector.load %arg8[%c0_6, %c0_7] : memref<128x128xf32, #tpu.memory_space<vmem>>, vector<128x128xf32>
    tpu.vector_store %arg8[%c0_6, %c0_7], %8 {strides = array<i32>} : memref<128x128xf32, #tpu.memory_space<vmem>>, vector<128x128xf32>,
    %c0_i32_8 = arith.constant 0 : i32
    %10 = arith.cmpi eq, %arg1, %c0_i32_8 : i32
    %11 = arith.extui %10 : i1 to i32
    %c0_i32_9 = arith.constant 0 : i32
    %12 = arith.cmpi ne, %11, %c0_i32_9 : i32
    scf.if %12 {
      %c0_10 = arith.constant 0 : index
      %c0_11 = arith.constant 0 : index
      %13 = vector.load %arg8[%c0_10, %c0_11] : memref<128x128xf32, #tpu.memory_space<vmem>>, vector<128x128xf32>
      %c0_12 = arith.constant 0 : index
      %c0_13 = arith.constant 0 : index
      %14 = vector.load %arg4[%c0_12, %c0_13] : memref<1x128xf32, #tpu.memory_space<vmem>>, vector<1x128xf32>
      %15 = vector.broadcast %14 : vector<1x128xf32> to vector<128x128xf32>
      %16 = arith.addf %13, %15 : vector<128x128xf32>
      %c0_14 = arith.constant 0 : index
      %c0_15 = arith.constant 0 : index
      %17 = vector.load %arg5[%c0_14, %c0_15] : memref<128x128xf32, #tpu.memory_space<vmem>>, vector<128x128xf32>
      tpu.vector_store %arg5[%c0_14, %c0_15], %16 {strides = array<i32>} : memref<128x128xf32, #tpu.memory_space<vmem>>, vector<128x128xf32>,
      %18 = tpu.iota {dimensions = array<i32: 0>} : vector<128x128xi32>
      %19 = vector.broadcast %0 : i32 to vector<128x128xi32>
      %20 = arith.addi %19, %18 : vector<128x128xi32>
      %c128_i32_16 = arith.constant 128 : i32
      %21 = vector.broadcast %c128_i32_16 : i32 to vector<128x128xi32>
      %22 = arith.cmpi slt, %20, %21 : vector<128x128xi32>
      %cst_17 = arith.constant 0.000000e+00 : f32
      %23 = vector.broadcast %cst_17 : f32 to vector<128x128xf32>
      %24 = arith.select %22, %16, %23 : vector<128x128xi1>, vector<128x128xf32>
      %cst_18 = arith.constant dense<0.000000e+00> : vector<128xf32>
      %25 = vector.multi_reduction <add>, %24, %cst_18 [0] : vector<128x128xf32> to vector<128xf32>
      %26 = vector.shape_cast %25 : vector<128xf32> to vector<1x128xf32>
      %27 = vector.shape_cast %26 : vector<1x128xf32> to vector<1x1x128xf32>
      %c0_19 = arith.constant 0 : index
      %c0_20 = arith.constant 0 : index
      %c0_21 = arith.constant 0 : index
      %28 = vector.load %arg6[%c0_19, %c0_20, %c0_21] : memref<1x1x128xf32, #tpu.memory_space<vmem>>, vector<1x1x128xf32>
      tpu.vector_store %arg6[%c0_19, %c0_20, %c0_21], %27 {strides = array<i32>} : memref<1x1x128xf32, #tpu.memory_space<vmem>>, vector<1x1x128xf32>,
      %29 = arith.mulf %24, %24 : vector<128x128xf32>
      %cst_22 = arith.constant dense<0.000000e+00> : vector<128xf32>
      %30 = vector.multi_reduction <add>, %29, %cst_22 [0] : vector<128x128xf32> to vector<128xf32>
      %31 = vector.shape_cast %30 : vector<128xf32> to vector<1x128xf32>
      %32 = vector.shape_cast %31 : vector<1x128xf32> to vector<1x1x128xf32>
      %c0_23 = arith.constant 0 : index
      %c0_24 = arith.constant 0 : index
      %c0_25 = arith.constant 0 : index
      %33 = vector.load %arg7[%c0_23, %c0_24, %c0_25] : memref<1x1x128xf32, #tpu.memory_space<vmem>>, vector<1x1x128xf32>
      tpu.vector_store %arg7[%c0_23, %c0_24, %c0_25], %32 {strides = array<i32>} : memref<1x1x128xf32, #tpu.memory_space<vmem>>, vector<1x1x128xf32>,
    } else {
    }
    return
  }
  func.func @transform_0(%arg0: i32, %arg1: i32) -> (i32, i32) {
    %c0_i32 = arith.constant 0 : i32
    return %arg0, %arg1 : i32, i32
  }
  func.func @transform_1(%arg0: i32, %arg1: i32) -> (i32, i32) {
    %c0_i32 = arith.constant 0 : i32
    %c0_i32_0 = arith.constant 0 : i32
    return %arg1, %c0_i32 : i32, i32
  }
  func.func @transform_2(%arg0: i32, %arg1: i32) -> (i32, i32) {
    %c0_i32 = arith.constant 0 : i32
    %c0_i32_0 = arith.constant 0 : i32
    %c0_i32_1 = arith.constant 0 : i32
    return %c0_i32, %c0_i32_0 : i32, i32
  }
  func.func @transform_3(%arg0: i32, %arg1: i32) -> (i32, i32) {
    %c0_i32 = arith.constant 0 : i32
    %c0_i32_0 = arith.constant 0 : i32
    return %arg0, %c0_i32 : i32, i32
  }
  func.func @transform_4(%arg0: i32, %arg1: i32) -> (i32, i32, i32) {
    %c0_i32 = arith.constant 0 : i32
    %c0_i32_0 = arith.constant 0 : i32
    %c0_i32_1 = arith.constant 0 : i32
    return %arg0, %c0_i32, %c0_i32_0 : i32, i32, i32
  }
  func.func @transform_5(%arg0: i32, %arg1: i32) -> (i32, i32, i32) {
    %c0_i32 = arith.constant 0 : i32
    %c0_i32_0 = arith.constant 0 : i32
    %c0_i32_1 = arith.constant 0 : i32
    return %arg0, %c0_i32, %c0_i32_0 : i32, i32, i32
  }
}

module attributes {stable_mosaic.version = 11 : i64} {
  func.func @_bn_lrelu_kernel(%arg0: i32, %arg1: memref<128x128xf32, #tpu.memory_space<vmem>>, %arg2: memref<1x128xf32, #tpu.memory_space<vmem>>, %arg3: memref<1x128xf32, #tpu.memory_space<vmem>>, %arg4: memref<128x128xf32, #tpu.memory_space<vmem>>) attributes {dimension_semantics = [#tpu.dimension_semantics<parallel>], iteration_bounds = array<i64: 1>, scalar_prefetch = 0 : i64, scratch_operands = 0 : i64, tpu.core_type = #tpu.core_type<tc>, window_params = [{transform_indices = @transform_0, window_bounds = array<i64: 128, 128>}, {pipeline_mode = #tpu.pipeline_mode<synchronous>, transform_indices = @transform_1, window_bounds = array<i64: 1, 128>}, {pipeline_mode = #tpu.pipeline_mode<synchronous>, transform_indices = @transform_2, window_bounds = array<i64: 1, 128>}, {transform_indices = @transform_3, window_bounds = array<i64: 128, 128>}]} {
    %c0 = arith.constant 0 : index
    %c0_0 = arith.constant 0 : index
    %0 = vector.load %arg1[%c0, %c0_0] : memref<128x128xf32, #tpu.memory_space<vmem>>, vector<128x128xf32>
    %c0_1 = arith.constant 0 : index
    %c0_2 = arith.constant 0 : index
    %1 = vector.load %arg2[%c0_1, %c0_2] : memref<1x128xf32, #tpu.memory_space<vmem>>, vector<1x128xf32>
    %2 = vector.broadcast %1 : vector<1x128xf32> to vector<128x128xf32>
    %3 = arith.mulf %0, %2 : vector<128x128xf32>
    %c0_3 = arith.constant 0 : index
    %c0_4 = arith.constant 0 : index
    %4 = vector.load %arg3[%c0_3, %c0_4] : memref<1x128xf32, #tpu.memory_space<vmem>>, vector<1x128xf32>
    %5 = vector.broadcast %4 : vector<1x128xf32> to vector<128x128xf32>
    %6 = arith.addf %3, %5 : vector<128x128xf32>
    %cst = arith.constant 0.000000e+00 : f32
    %7 = vector.broadcast %cst : f32 to vector<128x128xf32>
    %8 = arith.cmpf oge, %6, %7 : vector<128x128xf32>
    %cst_5 = arith.constant 2.000000e-01 : f32
    %9 = vector.broadcast %cst_5 : f32 to vector<128x128xf32>
    %10 = arith.mulf %9, %6 : vector<128x128xf32>
    %11 = arith.select %8, %6, %10 : vector<128x128xi1>, vector<128x128xf32>
    %c0_6 = arith.constant 0 : index
    %c0_7 = arith.constant 0 : index
    %12 = vector.load %arg4[%c0_6, %c0_7] : memref<128x128xf32, #tpu.memory_space<vmem>>, vector<128x128xf32>
    tpu.vector_store %arg4[%c0_6, %c0_7], %11 {strides = array<i32>} : memref<128x128xf32, #tpu.memory_space<vmem>>, vector<128x128xf32>,
    return
  }
  func.func @transform_0(%arg0: i32) -> (i32, i32) {
    %c0_i32 = arith.constant 0 : i32
    %c0_i32_0 = arith.constant 0 : i32
    return %arg0, %c0_i32 : i32, i32
  }
  func.func @transform_1(%arg0: i32) -> (i32, i32) {
    %c0_i32 = arith.constant 0 : i32
    %c0_i32_0 = arith.constant 0 : i32
    %c0_i32_1 = arith.constant 0 : i32
    return %c0_i32, %c0_i32_0 : i32, i32
  }
  func.func @transform_2(%arg0: i32) -> (i32, i32) {
    %c0_i32 = arith.constant 0 : i32
    %c0_i32_0 = arith.constant 0 : i32
    %c0_i32_1 = arith.constant 0 : i32
    return %c0_i32, %c0_i32_0 : i32, i32
  }
  func.func @transform_3(%arg0: i32) -> (i32, i32) {
    %c0_i32 = arith.constant 0 : i32
    %c0_i32_0 = arith.constant 0 : i32
    return %arg0, %c0_i32 : i32, i32
  }
}

module attributes {stable_mosaic.version = 11 : i64} {
  func.func @kernel(%arg0: i32, %arg1: i32, %arg2: memref<32x256xbf16, #tpu.memory_space<vmem>>, %arg3: memref<256x128xbf16, #tpu.memory_space<vmem>>, %arg4: memref<1x128xf32, #tpu.memory_space<vmem>>, %arg5: memref<32x128xf32, #tpu.memory_space<vmem>>, %arg6: memref<1x1x128xf32, #tpu.memory_space<vmem>>, %arg7: memref<1x1x128xf32, #tpu.memory_space<vmem>>, %arg8: memref<32x128xf32, #tpu.memory_space<vmem>>) attributes {dimension_semantics = [#tpu.dimension_semantics<parallel>, #tpu.dimension_semantics<arbitrary>], iteration_bounds = array<i64: 1, 1>, scalar_prefetch = 0 : i64, scratch_operands = 1 : i64, tpu.core_type = #tpu.core_type<tc>, window_params = [{transform_indices = @transform_0, window_bounds = array<i64: 32, 256>}, {transform_indices = @transform_1, window_bounds = array<i64: 256, 128>}, {pipeline_mode = #tpu.pipeline_mode<synchronous>, transform_indices = @transform_2, window_bounds = array<i64: 1, 128>}, {transform_indices = @transform_3, window_bounds = array<i64: 32, 128>}, {transform_indices = @transform_4, window_bounds = array<i64: 1, 1, 128>}, {transform_indices = @transform_5, window_bounds = array<i64: 1, 1, 128>}]} {
    %c32_i32 = arith.constant 32 : i32
    %0 = arith.muli %arg0, %c32_i32 : i32
    %c0_i32 = arith.constant 0 : i32
    %1 = arith.cmpi eq, %arg1, %c0_i32 : i32
    %2 = arith.extui %1 : i1 to i32
    %c0_i32_0 = arith.constant 0 : i32
    %3 = arith.cmpi ne, %2, %c0_i32_0 : i32
    scf.if %3 {
      %cst_10 = arith.constant 0.000000e+00 : f32
      %13 = vector.broadcast %cst_10 : f32 to vector<32x128xf32>
      %c0_11 = arith.constant 0 : index
      %c0_12 = arith.constant 0 : index
      %14 = vector.load %arg8[%c0_11, %c0_12] : memref<32x128xf32, #tpu.memory_space<vmem>>, vector<32x128xf32>
      tpu.vector_store %arg8[%c0_11, %c0_12], %13 {strides = array<i32>} : memref<32x128xf32, #tpu.memory_space<vmem>>, vector<32x128xf32>,
    } else {
    }
    %c0 = arith.constant 0 : index
    %c0_1 = arith.constant 0 : index
    %4 = vector.load %arg8[%c0, %c0_1] : memref<32x128xf32, #tpu.memory_space<vmem>>, vector<32x128xf32>
    %c0_2 = arith.constant 0 : index
    %c0_3 = arith.constant 0 : index
    %5 = vector.load %arg2[%c0_2, %c0_3] : memref<32x256xbf16, #tpu.memory_space<vmem>>, vector<32x256xbf16>
    %c0_4 = arith.constant 0 : index
    %c0_5 = arith.constant 0 : index
    %6 = vector.load %arg3[%c0_4, %c0_5] : memref<256x128xbf16, #tpu.memory_space<vmem>>, vector<256x128xbf16>
    %cst = arith.constant dense<0.000000e+00> : vector<32x128xf32>
    %7 = tpu.matmul %5, %6, %cst {dimension_numbers = #tpu.dot_dimension_numbers<[1], [0], [0], [1], [0, 0, 1, 1], [], []>} : vector<32x256xbf16>, vector<256x128xbf16>, vector<32x128xf32> -> vector<32x128xf32>
    %8 = arith.addf %4, %7 : vector<32x128xf32>
    %c0_6 = arith.constant 0 : index
    %c0_7 = arith.constant 0 : index
    %9 = vector.load %arg8[%c0_6, %c0_7] : memref<32x128xf32, #tpu.memory_space<vmem>>, vector<32x128xf32>
    tpu.vector_store %arg8[%c0_6, %c0_7], %8 {strides = array<i32>} : memref<32x128xf32, #tpu.memory_space<vmem>>, vector<32x128xf32>,
    %c0_i32_8 = arith.constant 0 : i32
    %10 = arith.cmpi eq, %arg1, %c0_i32_8 : i32
    %11 = arith.extui %10 : i1 to i32
    %c0_i32_9 = arith.constant 0 : i32
    %12 = arith.cmpi ne, %11, %c0_i32_9 : i32
    scf.if %12 {
      %c0_10 = arith.constant 0 : index
      %c0_11 = arith.constant 0 : index
      %13 = vector.load %arg8[%c0_10, %c0_11] : memref<32x128xf32, #tpu.memory_space<vmem>>, vector<32x128xf32>
      %c0_12 = arith.constant 0 : index
      %c0_13 = arith.constant 0 : index
      %14 = vector.load %arg4[%c0_12, %c0_13] : memref<1x128xf32, #tpu.memory_space<vmem>>, vector<1x128xf32>
      %15 = vector.broadcast %14 : vector<1x128xf32> to vector<32x128xf32>
      %16 = arith.addf %13, %15 : vector<32x128xf32>
      %c0_14 = arith.constant 0 : index
      %c0_15 = arith.constant 0 : index
      %17 = vector.load %arg5[%c0_14, %c0_15] : memref<32x128xf32, #tpu.memory_space<vmem>>, vector<32x128xf32>
      tpu.vector_store %arg5[%c0_14, %c0_15], %16 {strides = array<i32>} : memref<32x128xf32, #tpu.memory_space<vmem>>, vector<32x128xf32>,
      %18 = tpu.iota {dimensions = array<i32: 0>} : vector<32x128xi32>
      %19 = vector.broadcast %0 : i32 to vector<32x128xi32>
      %20 = arith.addi %19, %18 : vector<32x128xi32>
      %c32_i32_16 = arith.constant 32 : i32
      %21 = vector.broadcast %c32_i32_16 : i32 to vector<32x128xi32>
      %22 = arith.cmpi slt, %20, %21 : vector<32x128xi32>
      %cst_17 = arith.constant 0.000000e+00 : f32
      %23 = vector.broadcast %cst_17 : f32 to vector<32x128xf32>
      %24 = arith.select %22, %16, %23 : vector<32x128xi1>, vector<32x128xf32>
      %cst_18 = arith.constant dense<0.000000e+00> : vector<128xf32>
      %25 = vector.multi_reduction <add>, %24, %cst_18 [0] : vector<32x128xf32> to vector<128xf32>
      %26 = vector.shape_cast %25 : vector<128xf32> to vector<1x128xf32>
      %27 = vector.shape_cast %26 : vector<1x128xf32> to vector<1x1x128xf32>
      %c0_19 = arith.constant 0 : index
      %c0_20 = arith.constant 0 : index
      %c0_21 = arith.constant 0 : index
      %28 = vector.load %arg6[%c0_19, %c0_20, %c0_21] : memref<1x1x128xf32, #tpu.memory_space<vmem>>, vector<1x1x128xf32>
      tpu.vector_store %arg6[%c0_19, %c0_20, %c0_21], %27 {strides = array<i32>} : memref<1x1x128xf32, #tpu.memory_space<vmem>>, vector<1x1x128xf32>,
      %29 = arith.mulf %24, %24 : vector<32x128xf32>
      %cst_22 = arith.constant dense<0.000000e+00> : vector<128xf32>
      %30 = vector.multi_reduction <add>, %29, %cst_22 [0] : vector<32x128xf32> to vector<128xf32>
      %31 = vector.shape_cast %30 : vector<128xf32> to vector<1x128xf32>
      %32 = vector.shape_cast %31 : vector<1x128xf32> to vector<1x1x128xf32>
      %c0_23 = arith.constant 0 : index
      %c0_24 = arith.constant 0 : index
      %c0_25 = arith.constant 0 : index
      %33 = vector.load %arg7[%c0_23, %c0_24, %c0_25] : memref<1x1x128xf32, #tpu.memory_space<vmem>>, vector<1x1x128xf32>
      tpu.vector_store %arg7[%c0_23, %c0_24, %c0_25], %32 {strides = array<i32>} : memref<1x1x128xf32, #tpu.memory_space<vmem>>, vector<1x1x128xf32>,
    } else {
    }
    return
  }
  func.func @transform_0(%arg0: i32, %arg1: i32) -> (i32, i32) {
    %c0_i32 = arith.constant 0 : i32
    return %arg0, %arg1 : i32, i32
  }
  func.func @transform_1(%arg0: i32, %arg1: i32) -> (i32, i32) {
    %c0_i32 = arith.constant 0 : i32
    %c0_i32_0 = arith.constant 0 : i32
    return %arg1, %c0_i32 : i32, i32
  }
  func.func @transform_2(%arg0: i32, %arg1: i32) -> (i32, i32) {
    %c0_i32 = arith.constant 0 : i32
    %c0_i32_0 = arith.constant 0 : i32
    %c0_i32_1 = arith.constant 0 : i32
    return %c0_i32, %c0_i32_0 : i32, i32
  }
  func.func @transform_3(%arg0: i32, %arg1: i32) -> (i32, i32) {
    %c0_i32 = arith.constant 0 : i32
    %c0_i32_0 = arith.constant 0 : i32
    return %arg0, %c0_i32 : i32, i32
  }
  func.func @transform_4(%arg0: i32, %arg1: i32) -> (i32, i32, i32) {
    %c0_i32 = arith.constant 0 : i32
    %c0_i32_0 = arith.constant 0 : i32
    %c0_i32_1 = arith.constant 0 : i32
    return %arg0, %c0_i32, %c0_i32_0 : i32, i32, i32
  }
  func.func @transform_5(%arg0: i32, %arg1: i32) -> (i32, i32, i32) {
    %c0_i32 = arith.constant 0 : i32
    %c0_i32_0 = arith.constant 0 : i32
    %c0_i32_1 = arith.constant 0 : i32
    return %arg0, %c0_i32, %c0_i32_0 : i32, i32, i32
  }
}

module attributes {stable_mosaic.version = 11 : i64} {
  func.func @_bn_lrelu_kernel(%arg0: i32, %arg1: memref<32x128xf32, #tpu.memory_space<vmem>>, %arg2: memref<1x128xf32, #tpu.memory_space<vmem>>, %arg3: memref<1x128xf32, #tpu.memory_space<vmem>>, %arg4: memref<32x128xf32, #tpu.memory_space<vmem>>) attributes {dimension_semantics = [#tpu.dimension_semantics<parallel>], iteration_bounds = array<i64: 1>, scalar_prefetch = 0 : i64, scratch_operands = 0 : i64, tpu.core_type = #tpu.core_type<tc>, window_params = [{transform_indices = @transform_0, window_bounds = array<i64: 32, 128>}, {pipeline_mode = #tpu.pipeline_mode<synchronous>, transform_indices = @transform_1, window_bounds = array<i64: 1, 128>}, {pipeline_mode = #tpu.pipeline_mode<synchronous>, transform_indices = @transform_2, window_bounds = array<i64: 1, 128>}, {transform_indices = @transform_3, window_bounds = array<i64: 32, 128>}]} {
    %c0 = arith.constant 0 : index
    %c0_0 = arith.constant 0 : index
    %0 = vector.load %arg1[%c0, %c0_0] : memref<32x128xf32, #tpu.memory_space<vmem>>, vector<32x128xf32>
    %c0_1 = arith.constant 0 : index
    %c0_2 = arith.constant 0 : index
    %1 = vector.load %arg2[%c0_1, %c0_2] : memref<1x128xf32, #tpu.memory_space<vmem>>, vector<1x128xf32>
    %2 = vector.broadcast %1 : vector<1x128xf32> to vector<32x128xf32>
    %3 = arith.mulf %0, %2 : vector<32x128xf32>
    %c0_3 = arith.constant 0 : index
    %c0_4 = arith.constant 0 : index
    %4 = vector.load %arg3[%c0_3, %c0_4] : memref<1x128xf32, #tpu.memory_space<vmem>>, vector<1x128xf32>
    %5 = vector.broadcast %4 : vector<1x128xf32> to vector<32x128xf32>
    %6 = arith.addf %3, %5 : vector<32x128xf32>
    %cst = arith.constant 0.000000e+00 : f32
    %7 = vector.broadcast %cst : f32 to vector<32x128xf32>
    %8 = arith.cmpf oge, %6, %7 : vector<32x128xf32>
    %cst_5 = arith.constant 2.000000e-01 : f32
    %9 = vector.broadcast %cst_5 : f32 to vector<32x128xf32>
    %10 = arith.mulf %9, %6 : vector<32x128xf32>
    %11 = arith.select %8, %6, %10 : vector<32x128xi1>, vector<32x128xf32>
    %c0_6 = arith.constant 0 : index
    %c0_7 = arith.constant 0 : index
    %12 = vector.load %arg4[%c0_6, %c0_7] : memref<32x128xf32, #tpu.memory_space<vmem>>, vector<32x128xf32>
    tpu.vector_store %arg4[%c0_6, %c0_7], %11 {strides = array<i32>} : memref<32x128xf32, #tpu.memory_space<vmem>>, vector<32x128xf32>,
    return
  }
  func.func @transform_0(%arg0: i32) -> (i32, i32) {
    %c0_i32 = arith.constant 0 : i32
    %c0_i32_0 = arith.constant 0 : i32
    return %arg0, %c0_i32 : i32, i32
  }
  func.func @transform_1(%arg0: i32) -> (i32, i32) {
    %c0_i32 = arith.constant 0 : i32
    %c0_i32_0 = arith.constant 0 : i32
    %c0_i32_1 = arith.constant 0 : i32
    return %c0_i32, %c0_i32_0 : i32, i32
  }
  func.func @transform_2(%arg0: i32) -> (i32, i32) {
    %c0_i32 = arith.constant 0 : i32
    %c0_i32_0 = arith.constant 0 : i32
    %c0_i32_1 = arith.constant 0 : i32
    return %c0_i32, %c0_i32_0 : i32, i32
  }
  func.func @transform_3(%arg0: i32) -> (i32, i32) {
    %c0_i32 = arith.constant 0 : i32
    %c0_i32_0 = arith.constant 0 : i32
    return %arg0, %c0_i32 : i32, i32
  }
}

module attributes {stable_mosaic.version = 11 : i64} {
  func.func @_mbstd_kernel(%arg0: memref<2x256xf32, #tpu.memory_space<vmem>>, %arg1: memref<1x1xf32, #tpu.memory_space<vmem>>) attributes {dimension_semantics = [], scalar_prefetch = 0 : i64, scratch_operands = 0 : i64, tpu.core_type = #tpu.core_type<tc>} {
    %c0 = arith.constant 0 : index
    %c0_0 = arith.constant 0 : index
    %0 = vector.load %arg0[%c0, %c0_0] : memref<2x256xf32, #tpu.memory_space<vmem>>, vector<2x256xf32>
    %cst = arith.constant dense<0.000000e+00> : vector<256xf32>
    %1 = vector.multi_reduction <add>, %0, %cst [0] : vector<2x256xf32> to vector<256xf32>
    %2 = vector.shape_cast %1 : vector<256xf32> to vector<1x256xf32>
    %cst_1 = arith.constant 2.000000e+00 : f32
    %3 = vector.broadcast %cst_1 : f32 to vector<1x256xf32>
    %4 = arith.divf %2, %3 : vector<1x256xf32>
    %5 = vector.broadcast %4 : vector<1x256xf32> to vector<2x256xf32>
    %6 = arith.subf %0, %5 : vector<2x256xf32>
    %7 = vector.broadcast %4 : vector<1x256xf32> to vector<2x256xf32>
    %8 = arith.subf %0, %7 : vector<2x256xf32>
    %9 = arith.mulf %6, %8 : vector<2x256xf32>
    %cst_2 = arith.constant dense<0.000000e+00> : vector<256xf32>
    %10 = vector.multi_reduction <add>, %9, %cst_2 [0] : vector<2x256xf32> to vector<256xf32>
    %11 = vector.shape_cast %10 : vector<256xf32> to vector<1x256xf32>
    %cst_3 = arith.constant 1.000000e+00 : f32
    %12 = vector.broadcast %cst_3 : f32 to vector<1x256xf32>
    %13 = arith.divf %11, %12 : vector<1x256xf32>
    %14 = math.sqrt %13 : vector<1x256xf32>
    %cst_4 = arith.constant dense<0.000000e+00> : vector<1xf32>
    %15 = vector.multi_reduction <add>, %14, %cst_4 [1] : vector<1x256xf32> to vector<1xf32>
    %16 = vector.shape_cast %15 : vector<1xf32> to vector<1x1xf32>
    %cst_5 = arith.constant 2.560000e+02 : f32
    %17 = vector.broadcast %cst_5 : f32 to vector<1x1xf32>
    %18 = arith.divf %16, %17 : vector<1x1xf32>
    %c0_6 = arith.constant 0 : index
    %c0_7 = arith.constant 0 : index
    %19 = vector.load %arg1[%c0_6, %c0_7] : memref<1x1xf32, #tpu.memory_space<vmem>>, vector<1x1xf32>
    tpu.vector_store %arg1[%c0_6, %c0_7], %18 {strides = array<i32>} : memref<1x1xf32, #tpu.memory_space<vmem>>, vector<1x1xf32>,
    return
  }
}

module attributes {stable_mosaic.version = 11 : i64} {
  func.func @_matmul_bias_kernel(%arg0: i32, %arg1: i32, %arg2: memref<8x256xbf16, #tpu.memory_space<vmem>>, %arg3: memref<256x128xbf16, #tpu.memory_space<vmem>>, %arg4: memref<1x128xf32, #tpu.memory_space<vmem>>, %arg5: memref<8x128xf32, #tpu.memory_space<vmem>>, %arg6: memref<8x128xf32, #tpu.memory_space<vmem>>) attributes {dimension_semantics = [#tpu.dimension_semantics<parallel>, #tpu.dimension_semantics<arbitrary>], iteration_bounds = array<i64: 1, 1>, scalar_prefetch = 0 : i64, scratch_operands = 1 : i64, tpu.core_type = #tpu.core_type<tc>, window_params = [{transform_indices = @transform_0, window_bounds = array<i64: 8, 256>}, {transform_indices = @transform_1, window_bounds = array<i64: 256, 128>}, {pipeline_mode = #tpu.pipeline_mode<synchronous>, transform_indices = @transform_2, window_bounds = array<i64: 1, 128>}, {transform_indices = @transform_3, window_bounds = array<i64: 8, 128>}]} {
    %c0_i32 = arith.constant 0 : i32
    %0 = arith.cmpi eq, %arg1, %c0_i32 : i32
    %1 = arith.extui %0 : i1 to i32
    %c0_i32_0 = arith.constant 0 : i32
    %2 = arith.cmpi ne, %1, %c0_i32_0 : i32
    scf.if %2 {
      %cst_10 = arith.constant 0.000000e+00 : f32
      %12 = vector.broadcast %cst_10 : f32 to vector<8x128xf32>
      %c0_11 = arith.constant 0 : index
      %c0_12 = arith.constant 0 : index
      %13 = vector.load %arg6[%c0_11, %c0_12] : memref<8x128xf32, #tpu.memory_space<vmem>>, vector<8x128xf32>
      tpu.vector_store %arg6[%c0_11, %c0_12], %12 {strides = array<i32>} : memref<8x128xf32, #tpu.memory_space<vmem>>, vector<8x128xf32>,
    } else {
    }
    %c0 = arith.constant 0 : index
    %c0_1 = arith.constant 0 : index
    %3 = vector.load %arg6[%c0, %c0_1] : memref<8x128xf32, #tpu.memory_space<vmem>>, vector<8x128xf32>
    %c0_2 = arith.constant 0 : index
    %c0_3 = arith.constant 0 : index
    %4 = vector.load %arg2[%c0_2, %c0_3] : memref<8x256xbf16, #tpu.memory_space<vmem>>, vector<8x256xbf16>
    %c0_4 = arith.constant 0 : index
    %c0_5 = arith.constant 0 : index
    %5 = vector.load %arg3[%c0_4, %c0_5] : memref<256x128xbf16, #tpu.memory_space<vmem>>, vector<256x128xbf16>
    %cst = arith.constant dense<0.000000e+00> : vector<8x128xf32>
    %6 = tpu.matmul %4, %5, %cst {dimension_numbers = #tpu.dot_dimension_numbers<[1], [0], [0], [1], [0, 0, 1, 1], [], []>} : vector<8x256xbf16>, vector<256x128xbf16>, vector<8x128xf32> -> vector<8x128xf32>
    %7 = arith.addf %3, %6 : vector<8x128xf32>
    %c0_6 = arith.constant 0 : index
    %c0_7 = arith.constant 0 : index
    %8 = vector.load %arg6[%c0_6, %c0_7] : memref<8x128xf32, #tpu.memory_space<vmem>>, vector<8x128xf32>
    tpu.vector_store %arg6[%c0_6, %c0_7], %7 {strides = array<i32>} : memref<8x128xf32, #tpu.memory_space<vmem>>, vector<8x128xf32>,
    %c0_i32_8 = arith.constant 0 : i32
    %9 = arith.cmpi eq, %arg1, %c0_i32_8 : i32
    %10 = arith.extui %9 : i1 to i32
    %c0_i32_9 = arith.constant 0 : i32
    %11 = arith.cmpi ne, %10, %c0_i32_9 : i32
    scf.if %11 {
      %c0_10 = arith.constant 0 : index
      %c0_11 = arith.constant 0 : index
      %12 = vector.load %arg6[%c0_10, %c0_11] : memref<8x128xf32, #tpu.memory_space<vmem>>, vector<8x128xf32>
      %c0_12 = arith.constant 0 : index
      %c0_13 = arith.constant 0 : index
      %13 = vector.load %arg4[%c0_12, %c0_13] : memref<1x128xf32, #tpu.memory_space<vmem>>, vector<1x128xf32>
      %14 = vector.broadcast %13 : vector<1x128xf32> to vector<8x128xf32>
      %15 = arith.addf %12, %14 : vector<8x128xf32>
      %c0_14 = arith.constant 0 : index
      %c0_15 = arith.constant 0 : index
      %16 = vector.load %arg5[%c0_14, %c0_15] : memref<8x128xf32, #tpu.memory_space<vmem>>, vector<8x128xf32>
      tpu.vector_store %arg5[%c0_14, %c0_15], %15 {strides = array<i32>} : memref<8x128xf32, #tpu.memory_space<vmem>>, vector<8x128xf32>,
    } else {
    }
    return
  }
  func.func @transform_0(%arg0: i32, %arg1: i32) -> (i32, i32) {
    %c0_i32 = arith.constant 0 : i32
    return %arg0, %arg1 : i32, i32
  }
  func.func @transform_1(%arg0: i32, %arg1: i32) -> (i32, i32) {
    %c0_i32 = arith.constant 0 : i32
    %c0_i32_0 = arith.constant 0 : i32
    return %arg1, %c0_i32 : i32, i32
  }
  func.func @transform_2(%arg0: i32, %arg1: i32) -> (i32, i32) {
    %c0_i32 = arith.constant 0 : i32
    %c0_i32_0 = arith.constant 0 : i32
    %c0_i32_1 = arith.constant 0 : i32
    return %c0_i32, %c0_i32_0 : i32, i32
  }
  func.func @transform_3(%arg0: i32, %arg1: i32) -> (i32, i32) {
    %c0_i32 = arith.constant 0 : i32
    %c0_i32_0 = arith.constant 0 : i32
    return %arg0, %c0_i32 : i32, i32
  }
}

</mosaic_0001>

<bundles_post_ra>
// kernel: discriminator_forward.10
= control target key start
LH: loop header
LB: loop body
LE: loop exit
PB: predicated region body
PF: predicated region fallthrough
CT: control target
= control target key end

     0   :  { %s2266_s18 = smov 0   ;;  %s2268_s19 = smov 0   ;;  %s2906_s0 = inlined_call_operand.vmem [shape: bf16[2048,128], index: 0, kind: input, shape index: {}]   ;;  %s2907_s1 = inlined_call_operand.vmem [shape: bf16[128,128], index: 1, kind: input, shape index: {}]   ;;  %s2908_s2 = inlined_call_operand.vmem [shape: f32[1,128], index: 2, kind: input, shape index: {}]   ;;  %s2909_s3 = inlined_call_operand.vmem [shape: f32[2048,128], index: 3, kind: output, shape index: {0}]   ;;  %s2910_s4 = inlined_call_operand.vmem [shape: f32[4,1,128], index: 4, kind: output, shape index: {1}]   ;;  %s2911_s5 = inlined_call_operand.vmem [shape: f32[4,1,128], index: 5, kind: output, shape index: {2}]  }
   0x1   :  { %s2270_s20 = smov 0  }
   0x2 LB: > { %s28_s21 = sadd.s32 1, %s2230_s19  ;;  %p1963_p0 = scmp.ge.s32.totalorder %s2234_s20, 1  ;;  %s2234_s20 = sphi %s2270_s20, %s16_s20   ;;  %s2230_s19 = sphi %s2268_s19, %s2913_s19   ;;  %s2226_s18 = sphi %s2266_s18, %s2912_s18  }
   0x3   : > { %p30_p1 = scmp.ge.s32.totalorder %s28_s21, 4  ;;  %p221_p2 = scmp.lt.s32.totalorder %s2234_s20, 5 }
   0x5   : > { %s2915_s21 = smov (%p30_p1, %s28_s21), 0  ;;  %p222_p3 = pnand %p1963_p0, %p221_p2 }
   0x6   : > { %v2172_v0 = vld [vmem:[%s2907_s1] sm:$0xff] (!%p222_p3)   ;;  %s1964_s24 = sshll.u32 (!%p222_p3), %s2226_s18, 6  ;;  %v2173_v1 = vld [vmem:[%s2907_s1 + $0x8] sm:$0xff] (!%p222_p3)   ;;  %v2174_v2 = vld [vmem:[%s2907_s1 + $0x10] sm:$0xff] (!%p222_p3)   ;;  %v1363_v40 = vlaneseq (!%p222_p3)  ;;  %s1968_s22 = sshll.u32 (!%p222_p3), %s2226_s18, 9 }
   0x7   : > { %225 = sbr.rel (%p222_p3) target bundleno = 398 (0x18e), region = 32  ;;  %p264_p4 = scmp.lt.s32.totalorder (!%p222_p3), %s1964_s24, 255  ;;  %2052 = vmatprep.subr.bf16.mxu0 (!%p222_p3), %v2172_v0  ;;  %2132 = vmatprep.subr.bf16.mxu1 (!%p222_p3), %v2172_v0  ;;  %v2175_v3 = vld [vmem:[%s2907_s1 + $0x18] sm:$0xff] (!%p222_p3)   ;;  %v2176_v5 = vld [vmem:[%s2907_s1 + $0x20] sm:$0xff] (!%p222_p3)   ;;  %v2177_v6 = vld [vmem:[%s2907_s1 + $0x28] sm:$0xff] (!%p222_p3)   ;;  %v2355_v43 = vstv (!%p222_p3), %s1968_s22 }
   0x8   : > { %2053 = vmatpush3.bf16.msra.mxu0 (!%p222_p3), %v2172_v0  ;;  %2140 = vmatpush3.bf16.msra.mxu1 (!%p222_p3), %v2172_v0  ;;  %v2178_v7 = vld [vmem:[%s2907_s1 + $0x30] sm:$0xff] (!%p222_p3)   ;;  %v2179_v8 = vld [vmem:[%s2907_s1 + $0x38] sm:$0xff] (!%p222_p3)   ;;  %v2351_v41 = vshrl.u32 (!%p222_p3), %v1363_v40, 7  ;;  %v2371_v53 = vld [vmem:[%s2908_s2] ss:$0 sm:$0xff] (!%p222_p3)  ;;  %p284_p5 = scmp.lt.s32.totalorder (!%p222_p3), %s2226_s18, 3 }
   0x9   : > { %2054 = vmatprep.subr.bf16.mxu0 (!%p222_p3), %v2173_v1  ;;  %2133 = vmatprep.subr.bf16.mxu1 (!%p222_p3), %v2173_v1 }
   0xa   : > { %v1366_v42 = vadd.s32 (!%p222_p3), 16, %v2351_v41  ;;  %v1367_v44 = vadd.s32 (!%p222_p3), 24, %v2351_v41  ;;  %v1429_v46 = vadd.s32 (!%p222_p3), %v2355_v43, %v2351_v41  ;;  %v1365_v47 = vadd.s32 (!%p222_p3), 8, %v2351_v41 }
   0xb   : > { %v1370_v48 = vadd.s32 (!%p222_p3), 48, %v2351_v41  ;;  %v1368_v50 = vadd.s32 (!%p222_p3), 32, %v2351_v41  ;;  %v1371_v51 = vadd.s32 (!%p222_p3), 56, %v2351_v41  ;;  %v1369_v52 = vadd.s32 (!%p222_p3), 40, %v2351_v41 }
   0xc   : > { %2055 = vmatpush3.bf16.msra.mxu0 (!%p222_p3), %v2173_v1  ;;  %2141 = vmatpush3.bf16.msra.mxu1 (!%p222_p3), %v2173_v1  ;;  %v1431_v45 = vadd.s32 (!%p222_p3), %v2355_v43, %v1366_v42  ;;  %v1432_v49 = vadd.s32 (!%p222_p3), %v2355_v43, %v1367_v44  ;;  %vm1493_vm1 = vcmp.lt.s32.totalorder (!%p222_p3), %v1429_v46, 2048  ;;  %v1430_v54 = vadd.s32 (!%p222_p3), %v2355_v43, %v1365_v47 }
   0xd   : > { %2056 = vmatprep.subr.bf16.mxu0 (!%p222_p3), %v2174_v2  ;;  %2134 = vmatprep.subr.bf16.mxu1 (!%p222_p3), %v2174_v2  ;;  %v2375_v55 = vadd.s32 (!%p222_p3), %v2355_v43, %v1370_v48  ;;  %v2383_v57 = vadd.s32 (!%p222_p3), %v2355_v43, %v1368_v50  ;;  %v2386_v58 = vadd.s32 (!%p222_p3), %v2355_v43, %v1371_v51  ;;  %v1374_v63 = vadd.s32 (!%p222_p3), 80, %v2351_v41 }
   0xe   : > { %s2917_s24 = smov (!%p264_p4, %s1964_s24), 255  ;;  %vm1495_vm0 = vcmp.lt.s32.totalorder %v1431_v45, 2048  ;;  %vm1496_vm2 = vcmp.lt.s32.totalorder %v1432_v49, 2048  ;;  %v2389_v59 = vadd.s32 %v2355_v43, %v1369_v52  ;;  %v1372_v0 = vadd.s32 64, %v2351_v41  ;;  %s2919_s18 = smov (!%p284_p5, %s2226_s18), 3 }
   0xf   : > { %s1965_s29 = sshll.u32 %s2917_s24, 2  ;;  %s1967_s23 = sshll.u32 %s2917_s24, 3  ;;  %vm1494_vm3 = vcmp.lt.s32.totalorder %v1430_v54, 2048  ;;  %vm1499_vm4 = vcmp.lt.s32.totalorder %v2375_v55, 2048  ;;  %vm1497_vm5 = vcmp.lt.s32.totalorder %v2383_v57, 2048  ;;  %vm1500_vm6 = vcmp.lt.s32.totalorder %v2386_v58, 2048 }
  0x10   : > { %s2302_s7 = scalar_lea.vmem %s2906_s0, %s1965_s29  ;;  %2057 = vmatpush3.bf16.msra.mxu0 %v2174_v2  ;;  %2142 = vmatpush3.bf16.msra.mxu1 %v2174_v2  ;;  %s2380_s29 = scalar_lea.vmem %s2909_s3, %s1967_s23  ;;  %vm1498_vm7 = vcmp.lt.s32.totalorder %v2389_v59, 2048  ;;  %v1377_v40 = vadd.s32 104, %v2351_v41 }
  0x11   : > { %v2180_v4 = vld [vmem:[%s2302_s7] sm:$0xff]   ;;  %2058 = vmatprep.subr.bf16.mxu0 %v2175_v3  ;;  %2135 = vmatprep.subr.bf16.mxu1 %v2175_v3  ;;  %v2181_v10 = vld [vmem:[%s2302_s7 + $0x8] sm:$0xff]   ;;  %v2182_v11 = vld [vmem:[%s2302_s7 + $0x10] sm:$0xff]   ;;  %s286_s6 = scalar_lea.vmem %s2910_s4, %s2919_s18  ;;  %s289_s9 = scalar_lea.vmem %s2911_s5, %s2919_s18 }
  0x12   : > { %2068 = vmatprep.mubr.bf16.mxu0 %v2180_v4  ;;  %v2196_v9 = vld [vmem:[%s2302_s7 + $0x80] sm:$0xff]   ;;  %v2197_v12 = vld [vmem:[%s2302_s7 + $0x88] sm:$0xff]   ;;  %v2198_v13 = vld [vmem:[%s2302_s7 + $0x90] sm:$0xff]  }
  0x13   : > { %2100 = vmatprep.mubr.bf16.mxu1 %v2196_v9  ;;  %v2183_v14 = vld [vmem:[%s2302_s7 + $0x18] sm:$0xff]   ;;  %v2184_v15 = vld [vmem:[%s2302_s7 + $0x20] sm:$0xff]   ;;  %v2185_v18 = vld [vmem:[%s2302_s7 + $0x28] sm:$0xff]  }
  0x14   : > { %2059 = vmatpush3.bf16.msra.mxu0 %v2175_v3  ;;  %2143 = vmatpush3.bf16.msra.mxu1 %v2175_v3  ;;  %v2199_v16 = vld [vmem:[%s2302_s7 + $0x98] sm:$0xff]   ;;  %v2200_v17 = vld [vmem:[%s2302_s7 + $0xa0] sm:$0xff]   ;;  %v2201_v19 = vld [vmem:[%s2302_s7 + $0xa8] sm:$0xff]  }
  0x15   : > { %2060 = vmatprep.subr.bf16.mxu0 %v2176_v5  ;;  %2136 = vmatprep.subr.bf16.mxu1 %v2176_v5  ;;  %v2186_v20 = vld [vmem:[%s2302_s7 + $0x30] sm:$0xff]   ;;  %v2187_v22 = vld [vmem:[%s2302_s7 + $0x38] sm:$0xff]   ;;  %v2188_v24 = vld [vmem:[%s2302_s7 + $0x40] sm:$0xff]  }
  0x16   : > { %v2202_v21 = vld [vmem:[%s2302_s7 + $0xb0] sm:$0xff]   ;;  %v2203_v23 = vld [vmem:[%s2302_s7 + $0xb8] sm:$0xff]   ;;  %v2204_v25 = vld [vmem:[%s2302_s7 + $0xc0] sm:$0xff]  }
  0x17   : > { %v2189_v26 = vld [vmem:[%s2302_s7 + $0x48] sm:$0xff]   ;;  %v2190_v28 = vld [vmem:[%s2302_s7 + $0x50] sm:$0xff]   ;;  %v2191_v30 = vld [vmem:[%s2302_s7 + $0x58] sm:$0xff]  }
  0x18   : > { %2061 = vmatpush3.bf16.msra.mxu0 %v2176_v5  ;;  %2144 = vmatpush3.bf16.msra.mxu1 %v2176_v5  ;;  %v2205_v27 = vld [vmem:[%s2302_s7 + $0xc8] sm:$0xff]   ;;  %v2206_v29 = vld [vmem:[%s2302_s7 + $0xd0] sm:$0xff]   ;;  %v2207_v31 = vld [vmem:[%s2302_s7 + $0xd8] sm:$0xff]   ;;  %v1375_v5 = vadd.s32 88, %v2351_v41 }
  0x19   : > { %2062 = vmatprep.subr.bf16.mxu0 %v2177_v6  ;;  %2137 = vmatprep.subr.bf16.mxu1 %v2177_v6  ;;  %v2192_v32 = vld [vmem:[%s2302_s7 + $0x60] sm:$0xff]   ;;  %v2193_v34 = vld [vmem:[%s2302_s7 + $0x68] sm:$0xff]   ;;  %v2194_v36 = vld [vmem:[%s2302_s7 + $0x70] sm:$0xff]  }
  0x1a   : > { %v2208_v33 = vld [vmem:[%s2302_s7 + $0xe0] sm:$0xff]   ;;  %v2209_v35 = vld [vmem:[%s2302_s7 + $0xe8] sm:$0xff]   ;;  %v2210_v37 = vld [vmem:[%s2302_s7 + $0xf0] sm:$0xff]  }
  0x1b   : > { %v2195_v38 = vld [vmem:[%s2302_s7 + $0x78] sm:$0xff]  }
  0x1c   : > { %2063 = vmatpush3.bf16.msra.mxu0 %v2177_v6  ;;  %2145 = vmatpush3.bf16.msra.mxu1 %v2177_v6  ;;  %v2211_v39 = vld [vmem:[%s2302_s7 + $0xf8] sm:$0xff]   ;;  %v1373_v6 = vadd.s32 72, %v2351_v41 }
  0x1d   : > { %2064 = vmatprep.subr.bf16.mxu0 %v2178_v7  ;;  %2138 = vmatprep.subr.bf16.mxu1 %v2178_v7 }
  0x20   : > { %2065 = vmatpush3.bf16.msra.mxu0 %v2178_v7  ;;  %2146 = vmatpush3.bf16.msra.mxu1 %v2178_v7 }
  0x21   : > { %2066 = vmatprep.subr.bf16.mxu0 %v2179_v8  ;;  %2139 = vmatprep.subr.bf16.mxu1 %v2179_v8 }
  0x24   : > { %2067 = vmatpush3.bf16.msra.mxu0 %v2179_v8  ;;  %2147 = vmatpush3.bf16.msra.mxu1 %v2179_v8 }
  0x27   : > { %2069 = vmatmul.mubr.bf16.vlgmr.msra.gmra.mrb[0].mxu0 %v2181_v10  ;;  %2101 = vmatmul.mubr.bf16.vlgmr.msra.gmra.mrb[0].mxu1 %v2197_v12 }
  0x28   : > { %2072 = vmatprep.mubr.bf16.mxu0 %v2182_v11  ;;  %2104 = vmatprep.mubr.bf16.mxu1 %v2198_v13 }
  0x2f   : > { %2073 = vmatmul.mubr.bf16.gmra.mrb[4].mxu0 %v2183_v14  ;;  %2105 = vmatmul.mubr.bf16.gmra.mrb[4].mxu1 %v2199_v16  ;;  %v2422_v16 = vadd.s32 %v2355_v43, %v1374_v63 }
  0x30   : > { %2076 = vmatprep.mubr.bf16.mxu0 %v2184_v15  ;;  %2108 = vmatprep.mubr.bf16.mxu1 %v2200_v17  ;;  %v1378_v15 = vadd.s32 112, %v2351_v41  ;;  %v2425_v17 = vadd.s32 %v2355_v43, %v1372_v0 }
  0x31   : > { %vm1503_vm9 = vcmp.lt.s32.totalorder %v2422_v16, 2048  ;;  %v1387_v16 = vadd.s32 184, %v2351_v41 }
  0x32   : > { %vm1501_vm8 = vcmp.lt.s32.totalorder %v2425_v17, 2048 }
  0x37   : > { %2077 = vmatmul.mubr.bf16.gmra.mrb[8].mxu0 %v2185_v18  ;;  %2109 = vmatmul.mubr.bf16.gmra.mrb[8].mxu1 %v2201_v19 }
  0x38   : > { %2080 = vmatprep.mubr.bf16.mxu0 %v2186_v20  ;;  %2112 = vmatprep.mubr.bf16.mxu1 %v2202_v21  ;;  %v2433_v20 = vadd.s32 %v2355_v43, %v1375_v5  ;;  %v2436_v21 = vadd.s32 %v2355_v43, %v1373_v6 }
  0x3a   : > { %vm1502_vm10 = vcmp.lt.s32.totalorder %v2436_v21, 2048  ;;  %vm1504_vm11 = vcmp.lt.s32.totalorder %v2433_v20, 2048 }
  0x3f   : > { %2081 = vmatmul.mubr.bf16.gmra.mrb[12].mxu0 %v2187_v22  ;;  %2113 = vmatmul.mubr.bf16.gmra.mrb[12].mxu1 %v2203_v23 }
  0x40   : > { %2084 = vmatprep.mubr.bf16.mxu0 %v2188_v24  ;;  %2116 = vmatprep.mubr.bf16.mxu1 %v2204_v25 }
  0x47   : > { %2085 = vmatmul.mubr.bf16.gmra.mrb[16].mxu0 %v2189_v26  ;;  %2117 = vmatmul.mubr.bf16.gmra.mrb[16].mxu1 %v2205_v27 }
  0x48   : > { %2088 = vmatprep.mubr.bf16.mxu0 %v2190_v28  ;;  %2120 = vmatprep.mubr.bf16.mxu1 %v2206_v29  ;;  %v2443_v28 = vadd.s32 %v2355_v43, %v1378_v15  ;;  %v1376_v29 = vadd.s32 96, %v2351_v41 }
  0x4a   : > { %vm1507_vm12 = vcmp.lt.s32.totalorder %v2443_v28, 2048  ;;  %v2586_v28 = vadd.s32 %v2355_v43, %v1387_v16 }
  0x4f   : > { %2089 = vmatmul.mubr.bf16.gmra.mrb[20].mxu0 %v2191_v30  ;;  %2121 = vmatmul.mubr.bf16.gmra.mrb[20].mxu1 %v2207_v31  ;;  %v1379_v30 = vadd.s32 120, %v2351_v41 }
  0x50   : > { %2092 = vmatprep.mubr.bf16.mxu0 %v2192_v32  ;;  %2124 = vmatprep.mubr.bf16.mxu1 %v2208_v33 }
  0x57   : > { %2093 = vmatmul.mubr.bf16.gmra.mrb[24].mxu0 %v2193_v34  ;;  %2125 = vmatmul.mubr.bf16.gmra.mrb[24].mxu1 %v2209_v35 }
  0x58   : > { %2096 = vmatprep.mubr.bf16.mxu0 %v2194_v36  ;;  %2128 = vmatprep.mubr.bf16.mxu1 %v2210_v37 }
  0x5f   : > { %2097 = vmatmul.mubr.bf16.gmra.mrb[28].mxu0 %v2195_v38  ;;  %2129 = vmatmul.mubr.bf16.gmra.mrb[28].mxu1 %v2211_v39 }
  0xfa   : > { %v2070_v56 = vpop.f32.mrb[0].mxu0  ;;  %v2102_v60 = vpop.f32.mrb[0].mxu1 }
  0xfb   : > { %v1237_v61 = vadd.f32 %v2070_v56, %v2371_v53  ;;  %v778_v62 = vpop.f32.mrb[1].mxu0  ;;  %v2395_v1 = vadd.f32 %v2102_v60, %v2371_v53  ;;  %v906_v2 = vpop.f32.mrb[1].mxu1  ;;  %v2468_v56 = vadd.s32 %v2355_v43, %v1376_v29  ;;  %v2471_v60 = vadd.s32 %v2355_v43, %v1379_v30 }
  0xfc   : > { %v1235_v3 = vadd.f32 %v2371_v53, %v778_v62  ;;  %v2071_v4 = vpop.f32.mrb[2].mxu0  ;;  %v2401_v7 = vadd.f32 %v2371_v53, %v906_v2  ;;  %v2103_v8 = vpop.f32.mrb[2].mxu1  ;;  %v2485_v2 = vadd.s32 %v2355_v43, %v1377_v40 }
  0xfd   : > { %1301 = vst [vmem:[%s2380_s29 + $0x10] sm:$0xff] %v1237_v61  ;;  %v1238_v9 = vadd.f32 %v2071_v4, %v2371_v53  ;;  %v781_v10 = vpop.f32.mrb[3].mxu0  ;;  %1333 = vst [vmem:[%s2380_s29 + $0x110] sm:$0xff] %v2395_v1  ;;  %v2409_v11 = vadd.f32 %v2103_v8, %v2371_v53  ;;  %v909_v12 = vpop.f32.mrb[3].mxu1  ;;  %v1559_v18 = vsel %vm1495_vm0, %v1237_v61, 0.0  ;;  %v1380_v4 = vadd.s32 128, %v2351_v41 }
  0xfe   : > { %1299 = vst [vmem:[%s2380_s29] sm:$0xff] %v1235_v3  ;;  %v1557_v13 = vsel %vm1493_vm1, %v1235_v3, 0.0  ;;  %v1236_v14 = vadd.f32 %v2371_v53, %v781_v10  ;;  %1331 = vst [vmem:[%s2380_s29 + $0x100] sm:$0xff] %v2401_v7  ;;  %v2439_v25 = vadd.f32 %v2371_v53, %v909_v12  ;;  %v1693_v32 = vmul.f32 %v1559_v18, %v1559_v18 }
  0xff   : > { %1302 = vst [vmem:[%s2380_s29 + $0x18] sm:$0xff] %v1238_v9  ;;  %1334 = vst [vmem:[%s2380_s29 + $0x118] sm:$0xff] %v2409_v11  ;;  %v1691_v22 = vmul.f32 %v1557_v13, %v1557_v13  ;;  %v1560_v26 = vsel %vm1496_vm2, %v1238_v9, 0.0  ;;  %v1382_v3 = vadd.s32 144, %v2351_v41  ;;  %v1383_v8 = vadd.s32 152, %v2351_v41 }
 0x100   : > { %1300 = vst [vmem:[%s2380_s29 + $0x8] sm:$0xff] %v1236_v14  ;;  %v1558_v19 = vsel %vm1494_vm3, %v1236_v14, 0.0  ;;  %1332 = vst [vmem:[%s2380_s29 + $0x108] sm:$0xff] %v2439_v25  ;;  %v1694_v46 = vmul.f32 %v1560_v26, %v1560_v26  ;;  %vm1505_vm13 = vcmp.lt.s32.totalorder %v2468_v56, 2048  ;;  %vm1506_vm14 = vcmp.lt.s32.totalorder %v2485_v2, 2048 }
 0x101   : > { %v1621_v23 = vadd.f32 %v1558_v19, %v1557_v13  ;;  %v1692_v24 = vmul.f32 %v1558_v19, %v1558_v19  ;;  %v2526_v40 = vadd.s32 %v2355_v43, %v1380_v4  ;;  %vm1508_vm15 = vcmp.lt.s32.totalorder %v2471_v60, 2048 }
 0x102   : > { %v2074_v27 = vpop.f32.mrb[4].mxu0  ;;  %v2106_v31 = vpop.f32.mrb[4].mxu1 }
 0x103   : > { %v1622_v33 = vadd.f32 %v1621_v23, %v1559_v18  ;;  %v1755_v34 = vadd.f32 %v1692_v24, %v1691_v22  ;;  %v1241_v35 = vadd.f32 %v2074_v27, %v2371_v53  ;;  %v794_v36 = vpop.f32.mrb[5].mxu0  ;;  %v922_v37 = vpop.f32.mrb[5].mxu1  ;;  %v2454_v42 = vadd.f32 %v2106_v31, %v2371_v53 }
 0x104   : > { %v1239_v38 = vadd.f32 %v2371_v53, %v794_v36  ;;  %v2075_v39 = vpop.f32.mrb[6].mxu0  ;;  %v2457_v44 = vadd.f32 %v2371_v53, %v922_v37  ;;  %v2107_v45 = vpop.f32.mrb[6].mxu1  ;;  %v1381_v27 = vadd.s32 136, %v2351_v41  ;;  %vm1509_vm1 = vcmp.lt.s32.totalorder %v2526_v40, 2048 }
 0x105   : > { %v1756_v47 = vadd.f32 %v1755_v34, %v1693_v32  ;;  %1305 = vst [vmem:[%s2380_s29 + $0x30] sm:$0xff] %v1241_v35  ;;  %v1623_v48 = vadd.f32 %v1622_v33, %v1560_v26  ;;  %v1242_v49 = vadd.f32 %v2075_v39, %v2371_v53  ;;  %v797_v50 = vpop.f32.mrb[7].mxu0  ;;  %v925_v51 = vpop.f32.mrb[7].mxu1  ;;  %1337 = vst [vmem:[%s2380_s29 + $0x130] sm:$0xff] %v2454_v42  ;;  %v1563_v61 = vsel %vm1499_vm4, %v1241_v35, 0.0 }
 0x106   : > { %1303 = vst [vmem:[%s2380_s29 + $0x20] sm:$0xff] %v1239_v38  ;;  %v1561_v52 = vsel %vm1497_vm5, %v1239_v38, 0.0  ;;  %v1240_v54 = vadd.f32 %v2371_v53, %v797_v50  ;;  %1335 = vst [vmem:[%s2380_s29 + $0x120] sm:$0xff] %v2457_v44  ;;  %v1697_v9 = vmul.f32 %v1563_v61, %v1563_v61  ;;  %v2493_v59 = vadd.f32 %v2107_v45, %v2371_v53 }
 0x107   : > { %v1624_v62 = vadd.f32 %v1623_v48, %v1561_v52  ;;  %v1695_v63 = vmul.f32 %v1561_v52, %v1561_v52  ;;  %v1757_v0 = vadd.f32 %v1756_v47, %v1694_v46  ;;  %1306 = vst [vmem:[%s2380_s29 + $0x38] sm:$0xff] %v1242_v49  ;;  %v1564_v10 = vsel %vm1500_vm6, %v1242_v49, 0.0 }
 0x108   : > { %1304 = vst [vmem:[%s2380_s29 + $0x28] sm:$0xff] %v1240_v54  ;;  %v1562_v57 = vsel %vm1498_vm7, %v1240_v54, 0.0  ;;  %v2496_v13 = vadd.f32 %v2371_v53, %v925_v51  ;;  %1338 = vst [vmem:[%s2380_s29 + $0x138] sm:$0xff] %v2493_v59  ;;  %v1698_v31 = vmul.f32 %v1564_v10, %v1564_v10  ;;  %v2523_v39 = vadd.s32 %v2355_v43, %v1382_v3 }
 0x109   : > { %v1758_v5 = vadd.f32 %v1757_v0, %v1695_v63  ;;  %v1625_v55 = vadd.f32 %v1624_v62, %v1562_v57  ;;  %v1696_v6 = vmul.f32 %v1562_v57, %v1562_v57  ;;  %v2533_v48 = vadd.s32 %v2355_v43, %v1383_v8 }
 0x10a   : > { %v2078_v12 = vpop.f32.mrb[8].mxu0  ;;  %v2110_v14 = vpop.f32.mrb[8].mxu1  ;;  %1336 = vst [vmem:[%s2380_s29 + $0x128] sm:$0xff] %v2496_v13  ;;  %v2541_v50 = vadd.s32 %v2355_v43, %v1381_v27  ;;  %v1386_v51 = vadd.s32 176, %v2351_v41  ;;  %v1384_v62 = vadd.s32 160, %v2351_v41  ;;  %vm1511_vm0 = vcmp.lt.s32.totalorder %v2523_v39, 2048 }
 0x10b   : > { %v1626_v15 = vadd.f32 %v1625_v55, %v1563_v61  ;;  %v1759_v18 = vadd.f32 %v1758_v5, %v1696_v6  ;;  %v1245_v19 = vadd.f32 %v2078_v12, %v2371_v53  ;;  %v810_v22 = vpop.f32.mrb[9].mxu0  ;;  %v2501_v58 = vadd.f32 %v2110_v14, %v2371_v53  ;;  %v938_v23 = vpop.f32.mrb[9].mxu1 }
 0x10c   : > { %v1243_v24 = vadd.f32 %v2371_v53, %v810_v22  ;;  %v2079_v26 = vpop.f32.mrb[10].mxu0  ;;  %v2511_v29 = vadd.f32 %v2371_v53, %v938_v23  ;;  %v2111_v30 = vpop.f32.mrb[10].mxu1  ;;  %v2559_v12 = vadd.s32 %v2355_v43, %v1386_v51  ;;  %v1385_v14 = vadd.s32 168, %v2351_v41 }
 0x10d   : > { %v1760_v32 = vadd.f32 %v1759_v18, %v1697_v9  ;;  %1309 = vst [vmem:[%s2380_s29 + $0x50] sm:$0xff] %v1245_v19  ;;  %v1627_v33 = vadd.f32 %v1626_v15, %v1564_v10  ;;  %v1246_v34 = vadd.f32 %v2079_v26, %v2371_v53  ;;  %v813_v35 = vpop.f32.mrb[11].mxu0  ;;  %1341 = vst [vmem:[%s2380_s29 + $0x150] sm:$0xff] %v2501_v58  ;;  %v941_v36 = vpop.f32.mrb[11].mxu1  ;;  %v1567_v17 = vsel %vm1503_vm9, %v1245_v19, 0.0 }
 0x10e   : > { %1307 = vst [vmem:[%s2380_s29 + $0x40] sm:$0xff] %v1243_v24  ;;  %v1565_v37 = vsel %vm1501_vm8, %v1243_v24, 0.0  ;;  %v1244_v38 = vadd.f32 %v2371_v53, %v813_v35  ;;  %1339 = vst [vmem:[%s2380_s29 + $0x140] sm:$0xff] %v2511_v29  ;;  %v2549_v21 = vadd.f32 %v2111_v30, %v2371_v53  ;;  %v2552_v57 = vadd.f32 %v2371_v53, %v941_v36 }
 0x10f   : > { %v1628_v45 = vadd.f32 %v1627_v33, %v1565_v37  ;;  %v1699_v46 = vmul.f32 %v1565_v37, %v1565_v37  ;;  %v1761_v47 = vadd.f32 %v1760_v32, %v1698_v31  ;;  %1310 = vst [vmem:[%s2380_s29 + $0x58] sm:$0xff] %v1246_v34  ;;  %v1568_v63 = vsel %vm1504_vm11, %v1246_v34, 0.0 }
 0x110   : > { %1308 = vst [vmem:[%s2380_s29 + $0x48] sm:$0xff] %v1244_v38  ;;  %v1566_v49 = vsel %vm1502_vm10, %v1244_v38, 0.0  ;;  %v1701_v4 = vmul.f32 %v1567_v17, %v1567_v17  ;;  %1342 = vst [vmem:[%s2380_s29 + $0x158] sm:$0xff] %v2549_v21  ;;  %v1702_v19 = vmul.f32 %v1568_v63, %v1568_v63  ;;  %vm1510_vm2 = vcmp.lt.s32.totalorder %v2541_v50, 2048 }
 0x111   : > { %v1762_v52 = vadd.f32 %v1761_v47, %v1699_v46  ;;  %v1629_v54 = vadd.f32 %v1628_v45, %v1566_v49  ;;  %v1700_v61 = vmul.f32 %v1566_v49, %v1566_v49  ;;  %1340 = vst [vmem:[%s2380_s29 + $0x148] sm:$0xff] %v2552_v57  ;;  %v2579_v33 = vadd.s32 %v2355_v43, %v1384_v62 }
 0x112   : > { %v2082_v0 = vpop.f32.mrb[12].mxu0  ;;  %v2114_v3 = vpop.f32.mrb[12].mxu1  ;;  %vm1512_vm3 = vcmp.lt.s32.totalorder %v2533_v48, 2048  ;;  %v2592_v37 = vadd.s32 %v2355_v43, %v1385_v14  ;;  %v1390_v38 = vadd.s32 208, %v2351_v41  ;;  %v1388_v45 = vadd.s32 192, %v2351_v41 }
 0x113   : > { %v1630_v5 = vadd.f32 %v1629_v54, %v1567_v17  ;;  %v1763_v55 = vadd.f32 %v1762_v52, %v1700_v61  ;;  %v1249_v6 = vadd.f32 %v2082_v0, %v2371_v53  ;;  %v826_v20 = vpop.f32.mrb[13].mxu0  ;;  %v954_v8 = vpop.f32.mrb[13].mxu1  ;;  %v2567_v15 = vadd.f32 %v2114_v3, %v2371_v53 }
 0x114   : > { %v1247_v9 = vadd.f32 %v2371_v53, %v826_v20  ;;  %v2083_v10 = vpop.f32.mrb[14].mxu0  ;;  %v2115_v18 = vpop.f32.mrb[14].mxu1  ;;  %v2599_v54 = vadd.f32 %v2371_v53, %v954_v8  ;;  %vm1515_vm4 = vcmp.lt.s32.totalorder %v2559_v12, 2048  ;;  %vm1513_vm5 = vcmp.lt.s32.totalorder %v2579_v33, 2048 }
 0x115   : > { %v1764_v22 = vadd.f32 %v1763_v55, %v1701_v4  ;;  %1313 = vst [vmem:[%s2380_s29 + $0x70] sm:$0xff] %v1249_v6  ;;  %v1631_v23 = vadd.f32 %v1630_v5, %v1568_v63  ;;  %v1250_v24 = vadd.f32 %v2083_v10, %v2371_v53  ;;  %v829_v26 = vpop.f32.mrb[15].mxu0  ;;  %v957_v27 = vpop.f32.mrb[15].mxu1  ;;  %v1571_v30 = vsel %vm1507_vm12, %v1249_v6, 0.0  ;;  %1345 = vst [vmem:[%s2380_s29 + $0x170] sm:$0xff] %v2567_v15 }
 0x116   : > { %1311 = vst [vmem:[%s2380_s29 + $0x60] sm:$0xff] %v1247_v9  ;;  %v1569_v31 = vsel %vm1505_vm13, %v1247_v9, 0.0  ;;  %v1248_v32 = vadd.f32 %v2371_v53, %v829_v26  ;;  %v1705_v46 = vmul.f32 %v1571_v30, %v1571_v30  ;;  %v2602_v2 = vadd.f32 %v2115_v18, %v2371_v53  ;;  %1343 = vst [vmem:[%s2380_s29 + $0x160] sm:$0xff] %v2599_v54 }
 0x117   : > { %v1632_v34 = vadd.f32 %v1631_v23, %v1569_v31  ;;  %v1703_v35 = vmul.f32 %v1569_v31, %v1569_v31  ;;  %v1765_v36 = vadd.f32 %v1764_v22, %v1702_v19  ;;  %1314 = vst [vmem:[%s2380_s29 + $0x78] sm:$0xff] %v1250_v24  ;;  %v1572_v51 = vsel %vm1508_vm15, %v1250_v24, 0.0 }
 0x118   : > { %1312 = vst [vmem:[%s2380_s29 + $0x68] sm:$0xff] %v1248_v32  ;;  %v1570_v56 = vsel %vm1506_vm14, %v1248_v32, 0.0  ;;  %v2605_v61 = vadd.f32 %v2371_v53, %v957_v27  ;;  %v1391_v6 = vadd.s32 216, %v2351_v41  ;;  %1346 = vst [vmem:[%s2380_s29 + $0x178] sm:$0xff] %v2602_v2  ;;  %v1706_v8 = vmul.f32 %v1572_v51, %v1572_v51 }
 0x119   : > { %v1766_v47 = vadd.f32 %v1765_v36, %v1703_v35  ;;  %v1633_v17 = vadd.f32 %v1632_v34, %v1570_v56  ;;  %v1704_v49 = vmul.f32 %v1570_v56, %v1570_v56  ;;  %vm1514_vm6 = vcmp.lt.s32.totalorder %v2592_v37, 2048 }
 0x11a   : > { %v2086_v52 = vpop.f32.mrb[16].mxu0  ;;  %v2118_v62 = vpop.f32.mrb[16].mxu1  ;;  %1344 = vst [vmem:[%s2380_s29 + $0x168] sm:$0xff] %v2605_v61  ;;  %v2633_v26 = vadd.s32 %v2355_v43, %v1390_v38  ;;  %vm1516_vm7 = vcmp.lt.s32.totalorder %v2586_v28, 2048  ;;  %v2638_v32 = vadd.s32 %v2355_v43, %v1388_v45  ;;  %v2644_v40 = vadd.s32 %v2355_v43, %v1391_v6 }
 0x11b   : > { %v1634_v63 = vadd.f32 %v1633_v17, %v1571_v30  ;;  %v1767_v0 = vadd.f32 %v1766_v47, %v1704_v49  ;;  %v1253_v60 = vadd.f32 %v2086_v52, %v2371_v53  ;;  %v842_v16 = vpop.f32.mrb[17].mxu0  ;;  %v2609_v3 = vadd.f32 %v2118_v62, %v2371_v53  ;;  %v970_v4 = vpop.f32.mrb[17].mxu1 }
 0x11c   : > { %v1251_v5 = vadd.f32 %v2371_v53, %v842_v16  ;;  %v2087_v55 = vpop.f32.mrb[18].mxu0  ;;  %v2119_v20 = vpop.f32.mrb[18].mxu1  ;;  %v1389_v34 = vadd.s32 200, %v2351_v41  ;;  %v1394_v35 = vadd.s32 240, %v2351_v41  ;;  %v2651_v17 = vadd.f32 %v2371_v53, %v970_v4 }
 0x11d   : > { %v1768_v9 = vadd.f32 %v1767_v0, %v1705_v46  ;;  %1317 = vst [vmem:[%s2380_s29 + $0x90] sm:$0xff] %v1253_v60  ;;  %v1635_v10 = vadd.f32 %v1634_v63, %v1572_v51  ;;  %v1254_v14 = vadd.f32 %v2087_v55, %v2371_v53  ;;  %v845_v18 = vpop.f32.mrb[19].mxu0  ;;  %1349 = vst [vmem:[%s2380_s29 + $0x190] sm:$0xff] %v2609_v3  ;;  %v973_v19 = vpop.f32.mrb[19].mxu1  ;;  %v1575_v22 = vsel %vm1511_vm0, %v1253_v60, 0.0 }
 0x11e   : > { %1315 = vst [vmem:[%s2380_s29 + $0x80] sm:$0xff] %v1251_v5  ;;  %v1573_v23 = vsel %vm1509_vm1, %v1251_v5, 0.0  ;;  %v1252_v24 = vadd.f32 %v2371_v53, %v845_v18  ;;  %v1709_v36 = vmul.f32 %v1575_v22, %v1575_v22  ;;  %v2654_v50 = vadd.f32 %v2119_v20, %v2371_v53  ;;  %1347 = vst [vmem:[%s2380_s29 + $0x180] sm:$0xff] %v2651_v17 }
 0x11f   : > { %v1636_v27 = vadd.f32 %v1635_v10, %v1573_v23  ;;  %v1707_v30 = vmul.f32 %v1573_v23, %v1573_v23  ;;  %v1769_v31 = vadd.f32 %v1768_v9, %v1706_v8  ;;  %1318 = vst [vmem:[%s2380_s29 + $0x98] sm:$0xff] %v1254_v14  ;;  %v1576_v47 = vsel %vm1512_vm3, %v1254_v14, 0.0 }
 0x120   : > { %1316 = vst [vmem:[%s2380_s29 + $0x88] sm:$0xff] %v1252_v24  ;;  %v1574_v39 = vsel %vm1510_vm2, %v1252_v24, 0.0  ;;  %v2657_v49 = vadd.f32 %v2371_v53, %v973_v19  ;;  %vm1519_vm8 = vcmp.lt.s32.totalorder %v2633_v26, 2048  ;;  %vm1517_vm9 = vcmp.lt.s32.totalorder %v2638_v32, 2048  ;;  %1350 = vst [vmem:[%s2380_s29 + $0x198] sm:$0xff] %v2654_v50 }
 0x121   : > { %v1770_v56 = vadd.f32 %v1769_v31, %v1707_v30  ;;  %v1637_v38 = vadd.f32 %v1636_v27, %v1574_v39  ;;  %v1708_v46 = vmul.f32 %v1574_v39, %v1574_v39  ;;  %v1392_v5 = vadd.s32 224, %v2351_v41 }
 0x122   : > { %v2090_v45 = vpop.f32.mrb[20].mxu0  ;;  %v2122_v51 = vpop.f32.mrb[20].mxu1  ;;  %v1395_v55 = vadd.s32 248, %v2351_v41  ;;  %1348 = vst [vmem:[%s2380_s29 + $0x188] sm:$0xff] %v2657_v49  ;;  %v1710_v20 = vmul.f32 %v1576_v47, %v1576_v47  ;;  %v1454_v24 = vadd.s32 %v2355_v43, %v1389_v34  ;;  %vm1520_vm10 = vcmp.lt.s32.totalorder %v2644_v40, 2048 }
 0x123   : > { %v1638_v52 = vadd.f32 %v1637_v38, %v1575_v22  ;;  %v1771_v62 = vadd.f32 %v1770_v56, %v1708_v46  ;;  %v1257_v63 = vadd.f32 %v2090_v45, %v2371_v53  ;;  %v858_v48 = vpop.f32.mrb[21].mxu0  ;;  %v2662_v0 = vadd.f32 %v2122_v51, %v2371_v53  ;;  %v986_v60 = vpop.f32.mrb[21].mxu1 }
 0x124   : > { %v1255_v16 = vadd.f32 %v2371_v53, %v858_v48  ;;  %v2091_v4 = vpop.f32.mrb[22].mxu0  ;;  %v2123_v6 = vpop.f32.mrb[22].mxu1  ;;  %v2688_v39 = vadd.s32 %v2355_v43, %v1394_v35  ;;  %v2694_v33 = vadd.s32 %v2355_v43, %v1392_v5  ;;  %v1393_v34 = vadd.s32 232, %v2351_v41 }
 0x125   : > { %v1772_v8 = vadd.f32 %v1771_v62, %v1709_v36  ;;  %1321 = vst [vmem:[%s2380_s29 + $0xb0] sm:$0xff] %v1257_v63  ;;  %v1639_v9 = vadd.f32 %v1638_v52, %v1576_v47  ;;  %v1258_v10 = vadd.f32 %v2091_v4, %v2371_v53  ;;  %v861_v14 = vpop.f32.mrb[23].mxu0  ;;  %1353 = vst [vmem:[%s2380_s29 + $0x1b0] sm:$0xff] %v2662_v0  ;;  %v989_v18 = vpop.f32.mrb[23].mxu1  ;;  %v1579_v19 = vsel %vm1515_vm4, %v1257_v63, 0.0 }
 0x126   : > { %1319 = vst [vmem:[%s2380_s29 + $0xa0] sm:$0xff] %v1255_v16  ;;  %v1577_v22 = vsel %vm1513_vm5, %v1255_v16, 0.0  ;;  %v1256_v23 = vadd.f32 %v2371_v53, %v861_v14  ;;  %v2697_v36 = vadd.s32 %v2355_v43, %v1395_v55  ;;  %v1713_v56 = vmul.f32 %v1579_v19, %v1579_v19 }
 0x127   : > { %v1640_v27 = vadd.f32 %v1639_v9, %v1577_v22  ;;  %v1711_v30 = vmul.f32 %v1577_v22, %v1577_v22  ;;  %v1773_v31 = vadd.f32 %v1772_v8, %v1710_v20  ;;  %1322 = vst [vmem:[%s2380_s29 + $0xb8] sm:$0xff] %v1258_v10  ;;  %v1580_v35 = vsel %vm1516_vm7, %v1258_v10, 0.0 }
 0x128   : > { %1320 = vst [vmem:[%s2380_s29 + $0xa8] sm:$0xff] %v1256_v23  ;;  %v1578_v12 = vsel %vm1514_vm6, %v1256_v23, 0.0  ;;  %v2703_v37 = vadd.f32 %v2371_v53, %v986_v60  ;;  %v2706_v51 = vadd.f32 %v2123_v6, %v2371_v53  ;;  %v2709_v52 = vadd.f32 %v2371_v53, %v989_v18 }
 0x129   : > { %v1774_v38 = vadd.f32 %v1773_v31, %v1711_v30  ;;  %v1641_v46 = vadd.f32 %v1640_v27, %v1578_v12  ;;  %v1712_v47 = vmul.f32 %v1578_v12, %v1578_v12  ;;  %vm1518_vm11 = vcmp.lt.s32.totalorder %v1454_v24, 2048 }
 0x12a   : > { %v2094_v45 = vpop.f32.mrb[24].mxu0  ;;  %v2126_v62 = vpop.f32.mrb[24].mxu1  ;;  %vm1521_vm12 = vcmp.lt.s32.totalorder %v2694_v33, 2048  ;;  %v1396_v6 = vadd.s32 256, %v2351_v41  ;;  %1351 = vst [vmem:[%s2380_s29 + $0x1a0] sm:$0xff] %v2703_v37  ;;  %1354 = vst [vmem:[%s2380_s29 + $0x1b8] sm:$0xff] %v2706_v51  ;;  %v1714_v8 = vmul.f32 %v1580_v35, %v1580_v35  ;;  %v1458_v30 = vadd.s32 %v2355_v43, %v1393_v34 }
 0x12b   : > { %v1642_v63 = vadd.f32 %v1641_v46, %v1579_v19  ;;  %v1775_v48 = vadd.f32 %v1774_v38, %v1712_v47  ;;  %v1261_v28 = vadd.f32 %v2094_v45, %v2371_v53  ;;  %v874_v16 = vpop.f32.mrb[25].mxu0  ;;  %v2713_v4 = vadd.f32 %v2126_v62, %v2371_v53  ;;  %v1002_v60 = vpop.f32.mrb[25].mxu1  ;;  %1352 = vst [vmem:[%s2380_s29 + $0x1a8] sm:$0xff] %v2709_v52 }
 0x12c   : > { %v1259_v5 = vadd.f32 %v2371_v53, %v874_v16  ;;  %v2095_v55 = vpop.f32.mrb[26].mxu0  ;;  %v2127_v20 = vpop.f32.mrb[26].mxu1  ;;  %vm1523_vm13 = vcmp.lt.s32.totalorder %v2688_v39, 2048  ;;  %vm1524_vm14 = vcmp.lt.s32.totalorder %v2697_v36, 2048  ;;  %v1398_v38 = vadd.s32 272, %v2351_v41 }
 0x12d   : > { %v1776_v9 = vadd.f32 %v1775_v48, %v1713_v56  ;;  %1325 = vst [vmem:[%s2380_s29 + $0xd0] sm:$0xff] %v1261_v28  ;;  %v1643_v10 = vadd.f32 %v1642_v63, %v1580_v35  ;;  %v1262_v14 = vadd.f32 %v2095_v55, %v2371_v53  ;;  %v877_v18 = vpop.f32.mrb[27].mxu0  ;;  %1357 = vst [vmem:[%s2380_s29 + $0x1d0] sm:$0xff] %v2713_v4  ;;  %v1005_v19 = vpop.f32.mrb[27].mxu1  ;;  %v1583_v22 = vsel %vm1519_vm8, %v1261_v28, 0.0 }
 0x12e   : > { %1323 = vst [vmem:[%s2380_s29 + $0xc0] sm:$0xff] %v1259_v5  ;;  %v1581_v23 = vsel %vm1517_vm9, %v1259_v5, 0.0  ;;  %v1260_v27 = vadd.f32 %v2371_v53, %v877_v18  ;;  %v1461_v46 = vadd.s32 %v2355_v43, %v1396_v6  ;;  %v1399_v32 = vadd.s32 280, %v2351_v41 }
 0x12f   : > { %v1644_v31 = vadd.f32 %v1643_v10, %v1581_v23  ;;  %v1715_v12 = vmul.f32 %v1581_v23, %v1581_v23  ;;  %v1777_v56 = vadd.f32 %v1776_v9, %v1714_v8  ;;  %1326 = vst [vmem:[%s2380_s29 + $0xd8] sm:$0xff] %v1262_v14  ;;  %v1397_v47 = vadd.s32 264, %v2351_v41 }
 0x130   : > { %1324 = vst [vmem:[%s2380_s29 + $0xc8] sm:$0xff] %v1260_v27  ;;  %v1582_v26 = vsel %vm1518_vm11, %v1260_v27, 0.0  ;;  %v1717_v35 = vmul.f32 %v1583_v22, %v1583_v22  ;;  %v1584_v63 = vsel %vm1520_vm10, %v1262_v14, 0.0  ;;  %v2747_v28 = vadd.f32 %v2371_v53, %v1002_v60 }
 0x131   : > { %v1778_v45 = vadd.f32 %v1777_v56, %v1715_v12  ;;  %v1645_v34 = vadd.f32 %v1644_v31, %v1582_v26  ;;  %v1716_v62 = vmul.f32 %v1582_v26, %v1582_v26  ;;  %v2750_v24 = vadd.f32 %v2127_v20, %v2371_v53 }
 0x132   : > { %v2098_v48 = vpop.f32.mrb[28].mxu0  ;;  %v2753_v16 = vadd.f32 %v2371_v53, %v1005_v19  ;;  %v2130_v5 = vpop.f32.mrb[28].mxu1  ;;  %vm1522_vm15 = vcmp.lt.s32.totalorder %v1458_v30, 2048  ;;  %v1463_v14 = vadd.s32 %v2355_v43, %v1398_v38  ;;  %v1462_v18 = vadd.s32 %v2355_v43, %v1397_v47  ;;  %1355 = vst [vmem:[%s2380_s29 + $0x1c0] sm:$0xff] %v2747_v28 }
 0x133   : > { %v1646_v55 = vadd.f32 %v1645_v34, %v1583_v22  ;;  %v1779_v6 = vadd.f32 %v1778_v45, %v1716_v62  ;;  %v1265_v40 = vadd.f32 %v2098_v48, %v2371_v53  ;;  %v890_v8 = vpop.f32.mrb[29].mxu0  ;;  %v2757_v9 = vadd.f32 %v2130_v5, %v2371_v53  ;;  %v1018_v60 = vpop.f32.mrb[29].mxu1  ;;  %1358 = vst [vmem:[%s2380_s29 + $0x1d8] sm:$0xff] %v2750_v24 }
 0x134   : > { %v1263_v10 = vadd.f32 %v2371_v53, %v890_v8  ;;  %v2099_v20 = vpop.f32.mrb[30].mxu0  ;;  %1356 = vst [vmem:[%s2380_s29 + $0x1c8] sm:$0xff] %v2753_v16  ;;  %v2131_v19 = vpop.f32.mrb[30].mxu1  ;;  %v1718_v22 = vmul.f32 %v1584_v63, %v1584_v63  ;;  %vm1525_vm0 = vcmp.lt.s32.totalorder %v1461_v46, 2048  ;;  %v1464_v47 = vadd.s32 %v2355_v43, %v1399_v32 }
 0x135   : > { %v1780_v23 = vadd.f32 %v1779_v6, %v1717_v35  ;;  %1329 = vst [vmem:[%s2380_s29 + $0xf0] sm:$0xff] %v1265_v40  ;;  %v1647_v27 = vadd.f32 %v1646_v55, %v1584_v63  ;;  %v1266_v31 = vadd.f32 %v2099_v20, %v2371_v53  ;;  %v893_v12 = vpop.f32.mrb[31].mxu0  ;;  %1361 = vst [vmem:[%s2380_s29 + $0x1f0] sm:$0xff] %v2757_v9  ;;  %v1021_v56 = vpop.f32.mrb[31].mxu1  ;;  %v1400_v62 = vadd.s32 288, %v2351_v41 }
 0x136   : > { %1327 = vst [vmem:[%s2380_s29 + $0xe0] sm:$0xff] %v1263_v10  ;;  %v1585_v38 = vsel %vm1521_vm12, %v1263_v10, 0.0  ;;  %v1264_v26 = vadd.f32 %v2371_v53, %v893_v12  ;;  %v1587_v63 = vsel %vm1523_vm13, %v1265_v40, 0.0  ;;  %vm1526_vm1 = vcmp.lt.s32.totalorder %v1462_v18, 2048 }
 0x137   : > { %v1648_v45 = vadd.f32 %v1647_v27, %v1585_v38  ;;  %v1719_v35 = vmul.f32 %v1585_v38, %v1585_v38  ;;  %v1781_v34 = vadd.f32 %v1780_v23, %v1718_v22  ;;  %1330 = vst [vmem:[%s2380_s29 + $0xf8] sm:$0xff] %v1266_v31  ;;  %v1401_v33 = vadd.s32 296, %v2351_v41 }
 0x138   : > { %1328 = vst [vmem:[%s2380_s29 + $0xe8] sm:$0xff] %v1264_v26  ;;  %v1586_v48 = vsel %vm1522_vm15, %v1264_v26, 0.0  ;;  %v1589_v55 = vsel %vm1525_vm0, %v2401_v7, 0.0  ;;  %v1588_v6 = vsel %vm1524_vm14, %v1266_v31, 0.0  ;;  %v2788_v39 = vadd.f32 %v2371_v53, %v1018_v60 }
 0x139   : > { %v1782_v5 = vadd.f32 %v1781_v34, %v1719_v35  ;;  %v1649_v46 = vadd.f32 %v1648_v45, %v1586_v48  ;;  %v1720_v32 = vmul.f32 %v1586_v48, %v1586_v48  ;;  %v2791_v30 = vadd.f32 %v2131_v19, %v2371_v53 }
 0x13a   : > { %v2794_v40 = vadd.f32 %v2371_v53, %v1021_v56  ;;  %v1721_v8 = vmul.f32 %v1587_v63, %v1587_v63  ;;  %v1465_v22 = vadd.s32 %v2355_v43, %v1400_v62  ;;  %vm1527_vm2 = vcmp.lt.s32.totalorder %v1463_v14, 2048  ;;  %1359 = vst [vmem:[%s2380_s29 + $0x1e0] sm:$0xff] %v2788_v39 }
 0x13b   : > { %v1650_v10 = vadd.f32 %v1649_v46, %v1587_v63  ;;  %v1783_v20 = vadd.f32 %v1782_v5, %v1720_v32  ;;  %v1402_v7 = vadd.s32 304, %v2351_v41  ;;  %v1403_v36 = vadd.s32 312, %v2351_v41  ;;  %1362 = vst [vmem:[%s2380_s29 + $0x1f8] sm:$0xff] %v2791_v30 }
 0x13c   : > { %1360 = vst [vmem:[%s2380_s29 + $0x1e8] sm:$0xff] %v2794_v40  ;;  %v1722_v60 = vmul.f32 %v1588_v6, %v1588_v6  ;;  %v1723_v23 = vmul.f32 %v1589_v55, %v1589_v55  ;;  %vm1528_vm3 = vcmp.lt.s32.totalorder %v1464_v47, 2048  ;;  %v1590_v27 = vsel %vm1526_vm1, %v2439_v25, 0.0 }
 0x13d   : > { %v1784_v19 = vadd.f32 %v1783_v20, %v1721_v8  ;;  %v1651_v53 = vadd.f32 %v1650_v10, %v1588_v6  ;;  %v1466_v31 = vadd.s32 %v2355_v43, %v1401_v33  ;;  %vm1529_vm4 = vcmp.lt.s32.totalorder %v1465_v22, 2048 }
 0x13e   : > { %v1404_v38 = vadd.s32 320, %v2351_v41  ;;  %v1591_v26 = vsel %vm1527_vm2, %v2395_v1, 0.0  ;;  %v1467_v45 = vadd.s32 %v2355_v43, %v1402_v7  ;;  %v1724_v62 = vmul.f32 %v1590_v27, %v1590_v27 }
 0x13f   : > { %v1652_v12 = vadd.f32 %v1651_v53, %v1589_v55  ;;  %v1785_v56 = vadd.f32 %v1784_v19, %v1722_v60  ;;  %v1468_v47 = vadd.s32 %v2355_v43, %v1403_v36  ;;  %v1592_v18 = vsel %vm1528_vm3, %v2409_v11, 0.0 }
 0x140   : > { %v1593_v25 = vsel %vm1529_vm4, %v2457_v44, 0.0  ;;  %vm1530_vm5 = vcmp.lt.s32.totalorder %v1466_v31, 2048  ;;  %v1405_v63 = vadd.s32 328, %v2351_v41  ;;  %v1725_v48 = vmul.f32 %v1591_v26, %v1591_v26 }
 0x141   : > { %v1786_v35 = vadd.f32 %v1785_v56, %v1723_v23  ;;  %v1653_v34 = vadd.f32 %v1652_v12, %v1590_v27  ;;  %v1469_v14 = vadd.s32 %v2355_v43, %v1404_v38  ;;  %vm1531_vm6 = vcmp.lt.s32.totalorder %v1467_v45, 2048 }
 0x142   : > { %v1406_v1 = vadd.s32 336, %v2351_v41  ;;  %v1407_v46 = vadd.s32 344, %v2351_v41  ;;  %v1726_v32 = vmul.f32 %v1592_v18, %v1592_v18  ;;  %v1727_v8 = vmul.f32 %v1593_v25, %v1593_v25 }
 0x143   : > { %v1654_v33 = vadd.f32 %v1653_v34, %v1591_v26  ;;  %v1787_v5 = vadd.f32 %v1786_v35, %v1724_v62  ;;  %vm1532_vm7 = vcmp.lt.s32.totalorder %v1468_v47, 2048  ;;  %v1594_v11 = vsel %vm1530_vm5, %v2496_v13, 0.0 }
 0x144   : > { %v1470_v44 = vadd.s32 %v2355_v43, %v1405_v63  ;;  %vm1533_vm8 = vcmp.lt.s32.totalorder %v1469_v14, 2048  ;;  %v1408_v22 = vadd.s32 352, %v2351_v41  ;;  %v1595_v7 = vsel %vm1531_vm6, %v2454_v42, 0.0 }
 0x145   : > { %v1788_v55 = vadd.f32 %v1787_v5, %v1725_v48  ;;  %v1655_v6 = vadd.f32 %v1654_v33, %v1592_v18  ;;  %v1471_v36 = vadd.s32 %v2355_v43, %v1406_v1  ;;  %v1728_v53 = vmul.f32 %v1594_v11, %v1594_v11 }
 0x146   : > { %v1472_v23 = vadd.s32 %v2355_v43, %v1407_v46  ;;  %v1596_v27 = vsel %vm1532_vm7, %v2493_v59, 0.0  ;;  %v1597_v13 = vsel %vm1533_vm8, %v2511_v29, 0.0  ;;  %vm1534_vm9 = vcmp.lt.s32.totalorder %v1470_v44, 2048 }
 0x147   : > { %v1656_v10 = vadd.f32 %v1655_v6, %v1593_v25  ;;  %v1789_v20 = vadd.f32 %v1788_v55, %v1726_v32  ;;  %v1409_v31 = vadd.s32 360, %v2351_v41  ;;  %v1729_v12 = vmul.f32 %v1595_v7, %v1595_v7 }
 0x148   : > { %v1473_v26 = vadd.s32 %v2355_v43, %v1408_v22  ;;  %vm1535_vm10 = vcmp.lt.s32.totalorder %v1471_v36, 2048  ;;  %v1410_v42 = vadd.s32 368, %v2351_v41  ;;  %v1411_v45 = vadd.s32 376, %v2351_v41 }
 0x149   : > { %v1790_v60 = vadd.f32 %v1789_v20, %v1727_v8  ;;  %v1657_v19 = vadd.f32 %v1656_v10, %v1594_v11  ;;  %v1730_v35 = vmul.f32 %v1596_v27, %v1596_v27  ;;  %v1731_v47 = vmul.f32 %v1597_v13, %v1597_v13 }
 0x14a   : > { %vm1536_vm11 = vcmp.lt.s32.totalorder %v1472_v23, 2048  ;;  %v1598_v59 = vsel %vm1534_vm9, %v2552_v57, 0.0  ;;  %v1474_v29 = vadd.s32 %v2355_v43, %v1409_v31  ;;  %vm1537_vm12 = vcmp.lt.s32.totalorder %v1473_v26, 2048 }
 0x14b   : > { %v1658_v56 = vadd.f32 %v1657_v19, %v1595_v7  ;;  %v1791_v38 = vadd.f32 %v1790_v60, %v1728_v53  ;;  %v1412_v63 = vadd.s32 384, %v2351_v41  ;;  %v1599_v48 = vsel %vm1535_vm10, %v2501_v58, 0.0 }
 0x14c   : > { %v1475_v33 = vadd.s32 %v2355_v43, %v1410_v42  ;;  %v1732_v1 = vmul.f32 %v1598_v59, %v1598_v59  ;;  %v1476_v46 = vadd.s32 %v2355_v43, %v1411_v45  ;;  %v1600_v32 = vsel %vm1536_vm11, %v2549_v21, 0.0 }
 0x14d   : > { %v1792_v34 = vadd.f32 %v1791_v38, %v1729_v12  ;;  %v1659_v62 = vadd.f32 %v1658_v56, %v1596_v27  ;;  %v1601_v57 = vsel %vm1537_vm12, %v2599_v54, 0.0  ;;  %vm1538_vm13 = vcmp.lt.s32.totalorder %v1474_v29, 2048 }
 0x14e   : > { %v1413_v55 = vadd.s32 392, %v2351_v41  ;;  %v1733_v6 = vmul.f32 %v1599_v48, %v1599_v48  ;;  %v1477_v44 = vadd.s32 %v2355_v43, %v1412_v63  ;;  %vm1539_vm14 = vcmp.lt.s32.totalorder %v1475_v33, 2048 }
 0x14f   : > { %v1660_v18 = vadd.f32 %v1659_v62, %v1597_v13  ;;  %v1793_v25 = vadd.f32 %v1792_v34, %v1730_v35  ;;  %v1414_v58 = vadd.s32 400, %v2351_v41  ;;  %v1415_v10 = vadd.s32 408, %v2351_v41 }
 0x150   : > { %v1734_v20 = vmul.f32 %v1600_v32, %v1600_v32  ;;  %v1735_v36 = vmul.f32 %v1601_v57, %v1601_v57  ;;  %vm1540_vm15 = vcmp.lt.s32.totalorder %v1476_v46, 2048  ;;  %v1602_v21 = vsel %vm1538_vm13, %v2605_v61, 0.0 }
 0x151   : > { %v1794_v5 = vadd.f32 %v1793_v25, %v1731_v47  ;;  %v1661_v14 = vadd.f32 %v1660_v18, %v1598_v59  ;;  %v1478_v54 = vadd.s32 %v2355_v43, %v1413_v55  ;;  %vm1541_vm0 = vcmp.lt.s32.totalorder %v1477_v44, 2048 }
 0x152   : > { %v1416_v53 = vadd.s32 416, %v2351_v41  ;;  %v1603_v23 = vsel %vm1539_vm14, %v2567_v15, 0.0  ;;  %v1479_v27 = vadd.s32 %v2355_v43, %v1414_v58  ;;  %v1736_v12 = vmul.f32 %v1602_v21, %v1602_v21 }
 0x153   : > { %v1662_v8 = vadd.f32 %v1661_v14, %v1599_v48  ;;  %v1795_v11 = vadd.f32 %v1794_v5, %v1732_v1  ;;  %v1480_v56 = vadd.s32 %v2355_v43, %v1415_v10  ;;  %v1604_v38 = vsel %vm1540_vm15, %v2602_v2, 0.0 }
 0x154   : > { %v1605_v61 = vsel %vm1541_vm0, %v2651_v17, 0.0  ;;  %vm1542_vm1 = vcmp.lt.s32.totalorder %v1478_v54, 2048  ;;  %v1417_v26 = vadd.s32 424, %v2351_v41  ;;  %v1737_v42 = vmul.f32 %v1603_v23, %v1603_v23 }
 0x155   : > { %v1796_v22 = vadd.f32 %v1795_v11, %v1733_v6  ;;  %v1663_v7 = vadd.f32 %v1662_v8, %v1600_v32  ;;  %v1481_v34 = vadd.s32 %v2355_v43, %v1416_v53  ;;  %vm1543_vm2 = vcmp.lt.s32.totalorder %v1479_v27, 2048 }
 0x156   : > { %v1418_v15 = vadd.s32 432, %v2351_v41  ;;  %v1419_v62 = vadd.s32 440, %v2351_v41  ;;  %v1738_v47 = vmul.f32 %v1604_v38, %v1604_v38  ;;  %v1739_v18 = vmul.f32 %v1605_v61, %v1605_v61 }
 0x157   : > { %v1664_v60 = vadd.f32 %v1663_v7, %v1601_v57  ;;  %v1797_v19 = vadd.f32 %v1796_v22, %v1734_v20  ;;  %vm1544_vm3 = vcmp.lt.s32.totalorder %v1480_v56, 2048  ;;  %v1606_v2 = vsel %vm1542_vm1, %v2657_v49, 0.0 }
 0x158   : > { %v1482_v17 = vadd.s32 %v2355_v43, %v1417_v26  ;;  %vm1545_vm4 = vcmp.lt.s32.totalorder %v1481_v34, 2048  ;;  %v1420_v48 = vadd.s32 448, %v2351_v41  ;;  %v1607_v33 = vsel %vm1543_vm2, %v2609_v3, 0.0 }
 0x159   : > { %v1798_v13 = vadd.f32 %v1797_v19, %v1735_v36  ;;  %v1665_v31 = vadd.f32 %v1664_v60, %v1602_v21  ;;  %v1483_v5 = vadd.s32 %v2355_v43, %v1418_v15  ;;  %v1740_v46 = vmul.f32 %v1606_v2, %v1606_v2 }
 0x15a   : > { %v1484_v32 = vadd.s32 %v2355_v43, %v1419_v62  ;;  %v1608_v57 = vsel %vm1544_vm3, %v2654_v50, 0.0  ;;  %v1609_v49 = vsel %vm1545_vm4, %v2703_v37, 0.0  ;;  %vm1546_vm5 = vcmp.lt.s32.totalorder %v1482_v17, 2048 }
 0x15b   : > { %v1666_v45 = vadd.f32 %v1665_v31, %v1603_v23  ;;  %v1799_v35 = vadd.f32 %v1798_v13, %v1736_v12  ;;  %v1421_v55 = vadd.s32 456, %v2351_v41  ;;  %v1741_v6 = vmul.f32 %v1607_v33, %v1607_v33 }
 0x15c   : > { %v1485_v44 = vadd.s32 %v2355_v43, %v1420_v48  ;;  %vm1547_vm6 = vcmp.lt.s32.totalorder %v1483_v5, 2048  ;;  %v1422_v3 = vadd.s32 464, %v2351_v41  ;;  %v1423_v58 = vadd.s32 472, %v2351_v41 }
 0x15d   : > { %v1800_v59 = vadd.f32 %v1799_v35, %v1737_v42  ;;  %v1667_v29 = vadd.f32 %v1666_v45, %v1604_v38  ;;  %v1742_v10 = vmul.f32 %v1608_v57, %v1608_v57  ;;  %v1743_v7 = vmul.f32 %v1609_v49, %v1609_v49 }
 0x15e   : > { %vm1548_vm7 = vcmp.lt.s32.totalorder %v1484_v32, 2048  ;;  %v1610_v50 = vsel %vm1546_vm5, %v2709_v52, 0.0  ;;  %v1486_v37 = vadd.s32 %v2355_v43, %v1421_v55  ;;  %vm1549_vm8 = vcmp.lt.s32.totalorder %v1485_v44, 2048 }
 0x15f   : > { %v1668_v25 = vadd.f32 %v1667_v29, %v1605_v61  ;;  %v1801_v63 = vadd.f32 %v1800_v59, %v1738_v47  ;;  %v1424_v54 = vadd.s32 480, %v2351_v41  ;;  %v1611_v60 = vsel %vm1547_vm6, %v2662_v0, 0.0 }
 0x160   : > { %v1487_v19 = vadd.s32 %v2355_v43, %v1422_v3  ;;  %v1744_v27 = vmul.f32 %v1610_v50, %v1610_v50  ;;  %v1488_v13 = vadd.s32 %v2355_v43, %v1423_v58  ;;  %v1612_v31 = vsel %vm1548_vm7, %v2706_v51, 0.0 }
 0x161   : > { %v1802_v14 = vadd.f32 %v1801_v63, %v1739_v18  ;;  %v1669_v1 = vadd.f32 %v1668_v25, %v1606_v2  ;;  %v1613_v52 = vsel %vm1549_vm8, %v2747_v28, 0.0  ;;  %vm1550_vm9 = vcmp.lt.s32.totalorder %v1486_v37, 2048 }
 0x162   : > { %v1425_v12 = vadd.s32 488, %v2351_v41  ;;  %v1745_v56 = vmul.f32 %v1611_v60, %v1611_v60  ;;  %v1489_v26 = vadd.s32 %v2355_v43, %v1424_v54  ;;  %vm1551_vm10 = vcmp.lt.s32.totalorder %v1487_v19, 2048 }
 0x163   : > { %v1670_v8 = vadd.f32 %v1669_v1, %v1607_v33  ;;  %v1803_v11 = vadd.f32 %v1802_v14, %v1740_v46  ;;  %v1426_v0 = vadd.s32 496, %v2351_v41  ;;  %v1746_v42 = vmul.f32 %v1612_v31, %v1612_v31 }
 0x164   : > { %v1747_v34 = vmul.f32 %v1613_v52, %v1613_v52  ;;  %vm1552_vm11 = vcmp.lt.s32.totalorder %v1488_v13, 2048  ;;  %v1614_v51 = vsel %vm1550_vm9, %v2753_v16, 0.0  ;;  %v1427_v28 = vadd.s32 504, %v2351_v41 }
 0x165   : > { %v1804_v20 = vadd.f32 %v1803_v11, %v1741_v6  ;;  %v1671_v22 = vadd.f32 %v1670_v8, %v1608_v57  ;;  %vm1553_vm12 = vcmp.lt.s32.totalorder %v1489_v26, 2048  ;;  %v1490_v47 = vadd.s32 %v2355_v43, %v1425_v12 }
 0x166   : > { %v1615_v59 = vsel %vm1551_vm10, %v2713_v4, 0.0  ;;  %v1491_v29 = vadd.s32 %v2355_v43, %v1426_v0  ;;  %v1748_v17 = vmul.f32 %v1614_v51, %v1614_v51  ;;  %v1616_v25 = vsel %vm1552_vm11, %v2750_v24, 0.0 }
 0x167   : > { %v1672_v36 = vadd.f32 %v1671_v22, %v1609_v49  ;;  %v1805_v21 = vadd.f32 %v1804_v20, %v1742_v10  ;;  %v1617_v63 = vsel %vm1553_vm12, %v2788_v39, 0.0  ;;  %v1492_v16 = vadd.s32 %v2355_v43, %v1427_v28 }
 0x168   : > { %v1749_v48 = vmul.f32 %v1615_v59, %v1615_v59  ;;  %vm1554_vm13 = vcmp.lt.s32.totalorder %v1490_v47, 2048  ;;  %vm1555_vm14 = vcmp.lt.s32.totalorder %v1491_v29, 2048  ;;  %v1750_v5 = vmul.f32 %v1616_v25, %v1616_v25 }
 0x169   : > { %v1806_v53 = vadd.f32 %v1805_v21, %v1743_v7  ;;  %v1673_v23 = vadd.f32 %v1672_v36, %v1610_v50  ;;  %v1751_v4 = vmul.f32 %v1617_v63, %v1617_v63  ;;  %v1618_v46 = vsel %vm1554_vm13, %v2794_v40, 0.0 }
 0x16a   : > { %vm1556_vm15 = vcmp.lt.s32.totalorder %v1492_v16, 2048  ;;  %v1619_v24 = vsel %vm1555_vm14, %v2757_v9, 0.0  ;;  %v1752_v43 = vmul.f32 %v1618_v46, %v1618_v46 }
 0x16b   : > { %v1674_v38 = vadd.f32 %v1673_v23, %v1611_v60  ;;  %v1807_v61 = vadd.f32 %v1806_v53, %v1744_v27  ;;  %v1620_v55 = vsel %vm1556_vm15, %v2791_v30, 0.0  ;;  %v1753_v6 = vmul.f32 %v1619_v24, %v1619_v24 }
 0x16c   : > { %v1754_v44 = vmul.f32 %v1620_v55, %v1620_v55 }
 0x16d   : > { %v1808_v45 = vadd.f32 %v1807_v61, %v1745_v56  ;;  %v1675_v35 = vadd.f32 %v1674_v38, %v1612_v31 }
 0x16f   : > { %v1676_v15 = vadd.f32 %v1675_v35, %v1613_v52  ;;  %v1809_v62 = vadd.f32 %v1808_v45, %v1746_v42 }
 0x171   : > { %v1810_v18 = vadd.f32 %v1809_v62, %v1747_v34  ;;  %v1677_v2 = vadd.f32 %v1676_v15, %v1614_v51 }
 0x173   : > { %v1678_v41 = vadd.f32 %v1677_v2, %v1615_v59  ;;  %v1811_v33 = vadd.f32 %v1810_v18, %v1748_v17 }
 0x175   : > { %v1812_v14 = vadd.f32 %v1811_v33, %v1749_v48  ;;  %v1679_v1 = vadd.f32 %v1678_v41, %v1616_v25 }
 0x177   : > { %v1680_v32 = vadd.f32 %v1679_v1, %v1617_v63  ;;  %v1813_v57 = vadd.f32 %v1812_v14, %v1750_v5 }
 0x179   : > { %v1814_v39 = vadd.f32 %v1813_v57, %v1751_v4  ;;  %v1681_v49 = vadd.f32 %v1680_v32, %v1618_v46 }
 0x17b   : > { %v1682_v8 = vadd.f32 %v1681_v49, %v1619_v24  ;;  %v1815_v11 = vadd.f32 %v1814_v39, %v1752_v43 }
 0x17d   : > { %v1683_v3 = vadd.f32 %v1682_v8, %v1620_v55  ;;  %v1816_v58 = vadd.f32 %v1815_v11, %v1753_v6 }
 0x17f   : > { %v1684_v10 = vrot.slane %v1683_v3, 4  ;;  %v1817_v40 = vadd.f32 %v1816_v58, %v1754_v44 }
 0x181   : > { %v1685_v20 = vadd.f32 %v1684_v10, %v1683_v3  ;;  %v1818_v22 = vrot.slane %v1817_v40, 4 }
 0x183   : > { %v1686_v7 = vrot.slane %v1685_v20, 2  ;;  %v1819_v50 = vadd.f32 %v1818_v22, %v1817_v40 }
 0x185   : > { %v1687_v9 = vadd.f32 %v1686_v7, %v1685_v20  ;;  %v1820_v37 = vrot.slane %v1819_v50, 2 }
 0x187   : > { %v1688_v36 = vrot.slane %v1687_v9, 1  ;;  %v1821_v21 = vadd.f32 %v1820_v37, %v1819_v50 }
 0x189   : > { %v1689_v30 = vadd.f32 %v1688_v36, %v1687_v9  ;;  %v1822_v54 = vrot.slane %v1821_v21, 1 }
 0x18b   : > { %1690 = vst [vmem:[%s286_s6] sm:$0x1] %v1689_v30  ;;  %v1823_v60 = vadd.f32 %v1822_v54, %v1821_v21 }
 0x18d   : > { %1824 = vst [vmem:[%s289_s9] sm:$0x1] %v1823_v60 }
 0x18e PF: > { %s16_s20 = sadd.s32 1, %s2234_s20   ;;  %s2912_s18 = smov %s2230_s19 }
 0x18f   : > { %p13_p6 = scmp.ge.s32.totalorder %s16_s20, 6   ;;  %s2913_s19 = smov %s2915_s21 }
 0x191   :  { %15 = sbr.rel (!%p13_p6) target bundleno = 2 (0x2), region = 97 }

// kernel: discriminator_forward.11
= control target key start
LH: loop header
LB: loop body
LE: loop exit
PB: predicated region body
PF: predicated region fallthrough
CT: control target
= control target key end

     0   :  { %s741_s12 = smov 0   ;;  %s1031_s0 = inlined_call_operand.vmem [shape: f32[2048,128], index: 0, kind: input, shape index: {}]   ;;  %s1032_s1 = inlined_call_operand.vmem [shape: f32[1,128], index: 1, kind: input, shape index: {}]   ;;  %s1033_s2 = inlined_call_operand.vmem [shape: f32[1,128], index: 2, kind: input, shape index: {}]   ;;  %s1034_s3 = inlined_call_operand.vmem [shape: f32[2048,128], index: 3, kind: output, shape index: {}]  }
   0x1 LB: > { %s692_s13 = sadd.s32 4294967295, %s719_s12   ;;  %p696_p0 = scmp.ge.s32.totalorder %s719_s12, 1  ;;  %s719_s12 = sphi %s741_s12, %s13_s12  }
   0x2   : > { %p138_p1 = scmp.lt.s32.totalorder %s719_s12, 5 }
   0x4   : > { %p139_p2 = pnand %p696_p0, %p138_p1 }
   0x5   : > { %s697_s14 = sshll.u32 (!%p139_p2), %s692_s13, 6  ;;  %v755_v0 = vld [vmem:[%s1032_s1] ss:$0 sm:$0xff] (!%p139_p2) }
   0x6   : > { %142 = sbr.rel (%p139_p2) target bundleno = 102 (0x66), region = 32  ;;  %p163_p3 = scmp.lt.s32.totalorder (!%p139_p2), %s697_s14, 255  ;;  %v765_v1 = vld [vmem:[%s1033_s2] ss:$0 sm:$0xff] (!%p139_p2) }
   0xd   : > { %s1036_s14 = smov (!%p163_p3, %s697_s14), 255 }
   0xe   : > { %s698_s15 = sshll.u32 %s1036_s14, 3 }
   0xf   : > { %s760_s20 = scalar_lea.vmem %s1031_s0, %s698_s15  ;;  %s793_s25 = scalar_lea.vmem %s1034_s3, %s698_s15 }
  0x10   : > { %v174_v2 = vld [vmem:[%s760_s20] sm:$0xff]  ;;  %v175_v3 = vld [vmem:[%s760_s20 + $0x8] sm:$0xff]  ;;  %v176_v4 = vld [vmem:[%s760_s20 + $0x10] sm:$0xff] }
  0x11   : > { %v245_v5 = vmul.f32 %v755_v0, %v174_v2  ;;  %v246_v6 = vmul.f32 %v755_v0, %v175_v3  ;;  %v247_v7 = vmul.f32 %v755_v0, %v176_v4  ;;  %v177_v8 = vld [vmem:[%s760_s20 + $0x18] sm:$0xff]  ;;  %v178_v9 = vld [vmem:[%s760_s20 + $0x20] sm:$0xff]  ;;  %v179_v10 = vld [vmem:[%s760_s20 + $0x28] sm:$0xff] }
  0x12   : > { %v248_v11 = vmul.f32 %v755_v0, %v177_v8  ;;  %v249_v12 = vmul.f32 %v755_v0, %v178_v9  ;;  %v250_v13 = vmul.f32 %v755_v0, %v179_v10  ;;  %v180_v14 = vld [vmem:[%s760_s20 + $0x30] sm:$0xff]  ;;  %v181_v15 = vld [vmem:[%s760_s20 + $0x38] sm:$0xff]  ;;  %v182_v24 = vld [vmem:[%s760_s20 + $0x40] sm:$0xff] }
  0x13   : > { %v316_v16 = vadd.f32 %v765_v1, %v245_v5  ;;  %v317_v17 = vadd.f32 %v765_v1, %v246_v6  ;;  %v318_v18 = vadd.f32 %v765_v1, %v247_v7  ;;  %v251_v19 = vmul.f32 %v755_v0, %v180_v14  ;;  %v183_v32 = vld [vmem:[%s760_s20 + $0x48] sm:$0xff]  ;;  %v184_v33 = vld [vmem:[%s760_s20 + $0x50] sm:$0xff]  ;;  %v185_v34 = vld [vmem:[%s760_s20 + $0x58] sm:$0xff] }
  0x14   : > { %v319_v20 = vadd.f32 %v765_v1, %v248_v11  ;;  %v320_v21 = vadd.f32 %v765_v1, %v249_v12  ;;  %v321_v22 = vadd.f32 %v765_v1, %v250_v13  ;;  %v252_v23 = vmul.f32 %v755_v0, %v181_v15  ;;  %v186_v46 = vld [vmem:[%s760_s20 + $0x60] sm:$0xff]  ;;  %v187_v47 = vld [vmem:[%s760_s20 + $0x68] sm:$0xff]  ;;  %v188_v58 = vld [vmem:[%s760_s20 + $0x70] sm:$0xff] }
  0x15   : > { %vm380_vm0 = vcmp.ge.f32.partialorder %v316_v16, 0.0  ;;  %v444_v25 = vmul.f32 0.2, %v316_v16  ;;  %vm381_vm1 = vcmp.ge.f32.partialorder %v317_v17, 0.0  ;;  %v445_v26 = vmul.f32 0.2, %v317_v17 }
  0x16   : > { %vm382_vm2 = vcmp.ge.f32.partialorder %v318_v18, 0.0  ;;  %v446_v27 = vmul.f32 0.2, %v318_v18  ;;  %vm383_vm3 = vcmp.ge.f32.partialorder %v319_v20, 0.0  ;;  %v447_v28 = vmul.f32 0.2, %v319_v20 }
  0x17   : > { %v508_v29 = vsel %vm380_vm0, %v316_v16, %v444_v25  ;;  %v509_v30 = vsel %vm381_vm1, %v317_v17, %v445_v26  ;;  %vm384_vm4 = vcmp.ge.f32.partialorder %v320_v21, 0.0  ;;  %v448_v31 = vmul.f32 0.2, %v320_v21  ;;  %v189_v59 = vld [vmem:[%s760_s20 + $0x78] sm:$0xff]  ;;  %v190_v6 = vld [vmem:[%s760_s20 + $0x80] sm:$0xff]  ;;  %v191_v7 = vld [vmem:[%s760_s20 + $0x88] sm:$0xff] }
  0x18   : > { %572 = vst [vmem:[%s793_s25] sm:$0xff] %v508_v29  ;;  %573 = vst [vmem:[%s793_s25 + $0x8] sm:$0xff] %v509_v30  ;;  %v510_v35 = vsel %vm382_vm2, %v318_v18, %v446_v27  ;;  %v511_v36 = vsel %vm383_vm3, %v319_v20, %v447_v28  ;;  %vm385_vm5 = vcmp.ge.f32.partialorder %v321_v22, 0.0  ;;  %v449_v37 = vmul.f32 0.2, %v321_v22  ;;  %v192_v12 = vld [vmem:[%s760_s20 + $0x90] sm:$0xff]  ;;  %v193_v13 = vld [vmem:[%s760_s20 + $0x98] sm:$0xff] }
  0x19   : > { %574 = vst [vmem:[%s793_s25 + $0x10] sm:$0xff] %v510_v35  ;;  %575 = vst [vmem:[%s793_s25 + $0x18] sm:$0xff] %v511_v36  ;;  %v512_v38 = vsel %vm384_vm4, %v320_v21, %v448_v31  ;;  %v322_v39 = vadd.f32 %v765_v1, %v251_v19  ;;  %v323_v40 = vadd.f32 %v765_v1, %v252_v23  ;;  %v195_v25 = vld [vmem:[%s760_s20 + $0xa8] sm:$0xff]  ;;  %v196_v36 = vld [vmem:[%s760_s20 + $0xb0] sm:$0xff] }
  0x1a   : > { %v253_v41 = vmul.f32 %v755_v0, %v182_v24  ;;  %576 = vst [vmem:[%s793_s25 + $0x20] sm:$0xff] %v512_v38  ;;  %v513_v42 = vsel %vm385_vm5, %v321_v22, %v449_v37  ;;  %v254_v43 = vmul.f32 %v755_v0, %v183_v32  ;;  %v255_v44 = vmul.f32 %v755_v0, %v184_v33  ;;  %v194_v24 = vld [vmem:[%s760_s20 + $0xa0] sm:$0xff]  ;;  %v197_v37 = vld [vmem:[%s760_s20 + $0xb8] sm:$0xff] }
  0x1b   : > { %v256_v45 = vmul.f32 %v755_v0, %v185_v34  ;;  %577 = vst [vmem:[%s793_s25 + $0x28] sm:$0xff] %v513_v42  ;;  %vm386_vm6 = vcmp.ge.f32.partialorder %v322_v39, 0.0  ;;  %v450_v48 = vmul.f32 0.2, %v322_v39  ;;  %vm387_vm7 = vcmp.ge.f32.partialorder %v323_v40, 0.0 }
  0x1c   : > { %v451_v49 = vmul.f32 0.2, %v323_v40  ;;  %v324_v50 = vadd.f32 %v765_v1, %v253_v41  ;;  %v325_v51 = vadd.f32 %v765_v1, %v254_v43  ;;  %v326_v52 = vadd.f32 %v765_v1, %v255_v44 }
  0x1d   : > { %v327_v53 = vadd.f32 %v765_v1, %v256_v45  ;;  %v514_v54 = vsel %vm386_vm6, %v322_v39, %v450_v48  ;;  %v257_v56 = vmul.f32 %v755_v0, %v186_v46  ;;  %v258_v57 = vmul.f32 %v755_v0, %v187_v47  ;;  %v198_v46 = vld [vmem:[%s760_s20 + $0xc0] sm:$0xff]  ;;  %v199_v47 = vld [vmem:[%s760_s20 + $0xc8] sm:$0xff] }
  0x1e   : > { %v515_v55 = vsel %vm387_vm7, %v323_v40, %v451_v49  ;;  %578 = vst [vmem:[%s793_s25 + $0x30] sm:$0xff] %v514_v54  ;;  %vm388_vm8 = vcmp.ge.f32.partialorder %v324_v50, 0.0  ;;  %v452_v60 = vmul.f32 0.2, %v324_v50  ;;  %vm389_vm9 = vcmp.ge.f32.partialorder %v325_v51, 0.0 }
  0x1f   : > { %579 = vst [vmem:[%s793_s25 + $0x38] sm:$0xff] %v515_v55  ;;  %v453_v61 = vmul.f32 0.2, %v325_v51  ;;  %vm390_vm10 = vcmp.ge.f32.partialorder %v326_v52, 0.0  ;;  %v454_v62 = vmul.f32 0.2, %v326_v52  ;;  %v328_v4 = vadd.f32 %v765_v1, %v257_v56 }
  0x20   : > { %vm391_vm11 = vcmp.ge.f32.partialorder %v327_v53, 0.0  ;;  %v455_v63 = vmul.f32 0.2, %v327_v53  ;;  %v516_v2 = vsel %vm388_vm8, %v324_v50, %v452_v60  ;;  %v329_v5 = vadd.f32 %v765_v1, %v258_v57 }
  0x21   : > { %v517_v3 = vsel %vm389_vm9, %v325_v51, %v453_v61  ;;  %580 = vst [vmem:[%s793_s25 + $0x40] sm:$0xff] %v516_v2  ;;  %v518_v8 = vsel %vm390_vm10, %v326_v52, %v454_v62  ;;  %v259_v10 = vmul.f32 %v755_v0, %v188_v58  ;;  %v260_v11 = vmul.f32 %v755_v0, %v189_v59  ;;  %v200_v52 = vld [vmem:[%s760_s20 + $0xd0] sm:$0xff]  ;;  %v202_v2 = vld [vmem:[%s760_s20 + $0xe0] sm:$0xff] }
  0x22   : > { %581 = vst [vmem:[%s793_s25 + $0x48] sm:$0xff] %v517_v3  ;;  %v519_v9 = vsel %vm391_vm11, %v327_v53, %v455_v63  ;;  %582 = vst [vmem:[%s793_s25 + $0x50] sm:$0xff] %v518_v8  ;;  %vm392_vm12 = vcmp.ge.f32.partialorder %v328_v4, 0.0  ;;  %v456_v14 = vmul.f32 0.2, %v328_v4  ;;  %vm393_vm13 = vcmp.ge.f32.partialorder %v329_v5, 0.0 }
  0x23   : > { %583 = vst [vmem:[%s793_s25 + $0x58] sm:$0xff] %v519_v9  ;;  %v457_v15 = vmul.f32 0.2, %v329_v5  ;;  %v330_v16 = vadd.f32 %v765_v1, %v259_v10  ;;  %v331_v17 = vadd.f32 %v765_v1, %v260_v11  ;;  %v261_v18 = vmul.f32 %v755_v0, %v190_v6  ;;  %v201_v53 = vld [vmem:[%s760_s20 + $0xd8] sm:$0xff]  ;;  %v203_v3 = vld [vmem:[%s760_s20 + $0xe8] sm:$0xff] }
  0x24   : > { %v262_v19 = vmul.f32 %v755_v0, %v191_v7  ;;  %v520_v20 = vsel %vm392_vm12, %v328_v4, %v456_v14  ;;  %v263_v22 = vmul.f32 %v755_v0, %v192_v12  ;;  %v264_v23 = vmul.f32 %v755_v0, %v193_v13  ;;  %v204_v14 = vld [vmem:[%s760_s20 + $0xf0] sm:$0xff] }
  0x25   : > { %v521_v21 = vsel %vm393_vm13, %v329_v5, %v457_v15  ;;  %584 = vst [vmem:[%s793_s25 + $0x60] sm:$0xff] %v520_v20  ;;  %vm394_vm14 = vcmp.ge.f32.partialorder %v330_v16, 0.0  ;;  %v458_v26 = vmul.f32 0.2, %v330_v16  ;;  %vm395_vm15 = vcmp.ge.f32.partialorder %v331_v17, 0.0  ;;  %v205_v15 = vld [vmem:[%s760_s20 + $0xf8] sm:$0xff] }
  0x26   : > { %585 = vst [vmem:[%s793_s25 + $0x68] sm:$0xff] %v521_v21  ;;  %v459_v27 = vmul.f32 0.2, %v331_v17  ;;  %v332_v28 = vadd.f32 %v765_v1, %v261_v18  ;;  %v333_v29 = vadd.f32 %v765_v1, %v262_v19  ;;  %v334_v30 = vadd.f32 %v765_v1, %v263_v22 }
  0x27   : > { %v335_v31 = vadd.f32 %v765_v1, %v264_v23  ;;  %v522_v32 = vsel %vm394_vm14, %v330_v16, %v458_v26  ;;  %v265_v34 = vmul.f32 %v755_v0, %v194_v24  ;;  %v266_v35 = vmul.f32 %v755_v0, %v195_v25  ;;  %v206_v24 = vld [vmem:[%s760_s20 + $0x100] sm:$0xff]  ;;  %v207_v25 = vld [vmem:[%s760_s20 + $0x108] sm:$0xff] }
  0x28   : > { %v523_v33 = vsel %vm395_vm15, %v331_v17, %v459_v27  ;;  %586 = vst [vmem:[%s793_s25 + $0x70] sm:$0xff] %v522_v32  ;;  %vm396_vm0 = vcmp.ge.f32.partialorder %v332_v28, 0.0  ;;  %v460_v38 = vmul.f32 0.2, %v332_v28  ;;  %vm397_vm1 = vcmp.ge.f32.partialorder %v333_v29, 0.0 }
  0x29   : > { %587 = vst [vmem:[%s793_s25 + $0x78] sm:$0xff] %v523_v33  ;;  %v461_v39 = vmul.f32 0.2, %v333_v29  ;;  %vm398_vm2 = vcmp.ge.f32.partialorder %v334_v30, 0.0  ;;  %v462_v40 = vmul.f32 0.2, %v334_v30  ;;  %v336_v44 = vadd.f32 %v765_v1, %v265_v34 }
  0x2a   : > { %vm399_vm3 = vcmp.ge.f32.partialorder %v335_v31, 0.0  ;;  %v463_v41 = vmul.f32 0.2, %v335_v31  ;;  %v524_v42 = vsel %vm396_vm0, %v332_v28, %v460_v38  ;;  %v337_v45 = vadd.f32 %v765_v1, %v266_v35 }
  0x2b   : > { %v525_v43 = vsel %vm397_vm1, %v333_v29, %v461_v39  ;;  %588 = vst [vmem:[%s793_s25 + $0x80] sm:$0xff] %v524_v42  ;;  %v526_v48 = vsel %vm398_vm2, %v334_v30, %v462_v40  ;;  %v267_v50 = vmul.f32 %v755_v0, %v196_v36  ;;  %v268_v51 = vmul.f32 %v755_v0, %v197_v37  ;;  %v208_v30 = vld [vmem:[%s760_s20 + $0x110] sm:$0xff]  ;;  %v210_v42 = vld [vmem:[%s760_s20 + $0x120] sm:$0xff] }
  0x2c   : > { %589 = vst [vmem:[%s793_s25 + $0x88] sm:$0xff] %v525_v43  ;;  %v527_v49 = vsel %vm399_vm3, %v335_v31, %v463_v41  ;;  %590 = vst [vmem:[%s793_s25 + $0x90] sm:$0xff] %v526_v48  ;;  %vm400_vm4 = vcmp.ge.f32.partialorder %v336_v44, 0.0  ;;  %v464_v54 = vmul.f32 0.2, %v336_v44  ;;  %vm401_vm5 = vcmp.ge.f32.partialorder %v337_v45, 0.0 }
  0x2d   : > { %591 = vst [vmem:[%s793_s25 + $0x98] sm:$0xff] %v527_v49  ;;  %v465_v55 = vmul.f32 0.2, %v337_v45  ;;  %v338_v56 = vadd.f32 %v765_v1, %v267_v50  ;;  %v339_v57 = vadd.f32 %v765_v1, %v268_v51  ;;  %v269_v58 = vmul.f32 %v755_v0, %v198_v46  ;;  %v209_v31 = vld [vmem:[%s760_s20 + $0x118] sm:$0xff]  ;;  %v211_v43 = vld [vmem:[%s760_s20 + $0x128] sm:$0xff] }
  0x2e   : > { %v270_v59 = vmul.f32 %v755_v0, %v199_v47  ;;  %v528_v60 = vsel %vm400_vm4, %v336_v44, %v464_v54  ;;  %v271_v62 = vmul.f32 %v755_v0, %v200_v52  ;;  %v272_v63 = vmul.f32 %v755_v0, %v201_v53  ;;  %v212_v54 = vld [vmem:[%s760_s20 + $0x130] sm:$0xff] }
  0x2f   : > { %v529_v61 = vsel %vm401_vm5, %v337_v45, %v465_v55  ;;  %592 = vst [vmem:[%s793_s25 + $0xa0] sm:$0xff] %v528_v60  ;;  %vm402_vm6 = vcmp.ge.f32.partialorder %v338_v56, 0.0  ;;  %v466_v4 = vmul.f32 0.2, %v338_v56  ;;  %vm403_vm7 = vcmp.ge.f32.partialorder %v339_v57, 0.0  ;;  %v213_v55 = vld [vmem:[%s760_s20 + $0x138] sm:$0xff] }
  0x30   : > { %593 = vst [vmem:[%s793_s25 + $0xa8] sm:$0xff] %v529_v61  ;;  %v467_v5 = vmul.f32 0.2, %v339_v57  ;;  %v340_v6 = vadd.f32 %v765_v1, %v269_v58  ;;  %v341_v7 = vadd.f32 %v765_v1, %v270_v59  ;;  %v342_v8 = vadd.f32 %v765_v1, %v271_v62 }
  0x31   : > { %v343_v9 = vadd.f32 %v765_v1, %v272_v63  ;;  %v530_v10 = vsel %vm402_vm6, %v338_v56, %v466_v4  ;;  %v273_v12 = vmul.f32 %v755_v0, %v202_v2  ;;  %v274_v13 = vmul.f32 %v755_v0, %v203_v3  ;;  %v214_v2 = vld [vmem:[%s760_s20 + $0x140] sm:$0xff]  ;;  %v215_v3 = vld [vmem:[%s760_s20 + $0x148] sm:$0xff] }
  0x32   : > { %v531_v11 = vsel %vm403_vm7, %v339_v57, %v467_v5  ;;  %594 = vst [vmem:[%s793_s25 + $0xb0] sm:$0xff] %v530_v10  ;;  %vm404_vm8 = vcmp.ge.f32.partialorder %v340_v6, 0.0  ;;  %v468_v16 = vmul.f32 0.2, %v340_v6  ;;  %vm405_vm9 = vcmp.ge.f32.partialorder %v341_v7, 0.0 }
  0x33   : > { %595 = vst [vmem:[%s793_s25 + $0xb8] sm:$0xff] %v531_v11  ;;  %v469_v17 = vmul.f32 0.2, %v341_v7  ;;  %vm406_vm10 = vcmp.ge.f32.partialorder %v342_v8, 0.0  ;;  %v470_v18 = vmul.f32 0.2, %v342_v8  ;;  %v344_v22 = vadd.f32 %v765_v1, %v273_v12 }
  0x34   : > { %vm407_vm11 = vcmp.ge.f32.partialorder %v343_v9, 0.0  ;;  %v471_v19 = vmul.f32 0.2, %v343_v9  ;;  %v532_v20 = vsel %vm404_vm8, %v340_v6, %v468_v16  ;;  %v345_v23 = vadd.f32 %v765_v1, %v274_v13 }
  0x35   : > { %v533_v21 = vsel %vm405_vm9, %v341_v7, %v469_v17  ;;  %596 = vst [vmem:[%s793_s25 + $0xc0] sm:$0xff] %v532_v20  ;;  %v534_v26 = vsel %vm406_vm10, %v342_v8, %v470_v18  ;;  %v275_v28 = vmul.f32 %v755_v0, %v204_v14  ;;  %v276_v29 = vmul.f32 %v755_v0, %v205_v15  ;;  %v216_v8 = vld [vmem:[%s760_s20 + $0x150] sm:$0xff]  ;;  %v218_v20 = vld [vmem:[%s760_s20 + $0x160] sm:$0xff] }
  0x36   : > { %597 = vst [vmem:[%s793_s25 + $0xc8] sm:$0xff] %v533_v21  ;;  %v535_v27 = vsel %vm407_vm11, %v343_v9, %v471_v19  ;;  %598 = vst [vmem:[%s793_s25 + $0xd0] sm:$0xff] %v534_v26  ;;  %vm408_vm12 = vcmp.ge.f32.partialorder %v344_v22, 0.0  ;;  %v472_v32 = vmul.f32 0.2, %v344_v22  ;;  %vm409_vm13 = vcmp.ge.f32.partialorder %v345_v23, 0.0 }
  0x37   : > { %599 = vst [vmem:[%s793_s25 + $0xd8] sm:$0xff] %v535_v27  ;;  %v473_v33 = vmul.f32 0.2, %v345_v23  ;;  %v346_v34 = vadd.f32 %v765_v1, %v275_v28  ;;  %v347_v35 = vadd.f32 %v765_v1, %v276_v29  ;;  %v277_v36 = vmul.f32 %v755_v0, %v206_v24  ;;  %v217_v9 = vld [vmem:[%s760_s20 + $0x158] sm:$0xff]  ;;  %v219_v21 = vld [vmem:[%s760_s20 + $0x168] sm:$0xff] }
  0x38   : > { %v278_v37 = vmul.f32 %v755_v0, %v207_v25  ;;  %v536_v38 = vsel %vm408_vm12, %v344_v22, %v472_v32  ;;  %v279_v40 = vmul.f32 %v755_v0, %v208_v30  ;;  %v280_v41 = vmul.f32 %v755_v0, %v209_v31  ;;  %v220_v32 = vld [vmem:[%s760_s20 + $0x170] sm:$0xff] }
  0x39   : > { %v537_v39 = vsel %vm409_vm13, %v345_v23, %v473_v33  ;;  %600 = vst [vmem:[%s793_s25 + $0xe0] sm:$0xff] %v536_v38  ;;  %vm410_vm14 = vcmp.ge.f32.partialorder %v346_v34, 0.0  ;;  %v474_v44 = vmul.f32 0.2, %v346_v34  ;;  %vm411_vm15 = vcmp.ge.f32.partialorder %v347_v35, 0.0  ;;  %v221_v33 = vld [vmem:[%s760_s20 + $0x178] sm:$0xff] }
  0x3a   : > { %601 = vst [vmem:[%s793_s25 + $0xe8] sm:$0xff] %v537_v39  ;;  %v475_v45 = vmul.f32 0.2, %v347_v35  ;;  %v348_v46 = vadd.f32 %v765_v1, %v277_v36  ;;  %v349_v47 = vadd.f32 %v765_v1, %v278_v37  ;;  %v350_v48 = vadd.f32 %v765_v1, %v279_v40 }
  0x3b   : > { %v351_v49 = vadd.f32 %v765_v1, %v280_v41  ;;  %v538_v50 = vsel %vm410_vm14, %v346_v34, %v474_v44  ;;  %v281_v52 = vmul.f32 %v755_v0, %v210_v42  ;;  %v282_v53 = vmul.f32 %v755_v0, %v211_v43  ;;  %v222_v42 = vld [vmem:[%s760_s20 + $0x180] sm:$0xff]  ;;  %v223_v43 = vld [vmem:[%s760_s20 + $0x188] sm:$0xff] }
  0x3c   : > { %v539_v51 = vsel %vm411_vm15, %v347_v35, %v475_v45  ;;  %602 = vst [vmem:[%s793_s25 + $0xf0] sm:$0xff] %v538_v50  ;;  %vm412_vm0 = vcmp.ge.f32.partialorder %v348_v46, 0.0  ;;  %v476_v56 = vmul.f32 0.2, %v348_v46  ;;  %vm413_vm1 = vcmp.ge.f32.partialorder %v349_v47, 0.0 }
  0x3d   : > { %603 = vst [vmem:[%s793_s25 + $0xf8] sm:$0xff] %v539_v51  ;;  %v477_v57 = vmul.f32 0.2, %v349_v47  ;;  %vm414_vm2 = vcmp.ge.f32.partialorder %v350_v48, 0.0  ;;  %v478_v58 = vmul.f32 0.2, %v350_v48  ;;  %v352_v62 = vadd.f32 %v765_v1, %v281_v52 }
  0x3e   : > { %vm415_vm3 = vcmp.ge.f32.partialorder %v351_v49, 0.0  ;;  %v479_v59 = vmul.f32 0.2, %v351_v49  ;;  %v540_v60 = vsel %vm412_vm0, %v348_v46, %v476_v56  ;;  %v353_v63 = vadd.f32 %v765_v1, %v282_v53 }
  0x3f   : > { %v541_v61 = vsel %vm413_vm1, %v349_v47, %v477_v57  ;;  %604 = vst [vmem:[%s793_s25 + $0x100] sm:$0xff] %v540_v60  ;;  %v542_v4 = vsel %vm414_vm2, %v350_v48, %v478_v58  ;;  %v283_v6 = vmul.f32 %v755_v0, %v212_v54  ;;  %v284_v7 = vmul.f32 %v755_v0, %v213_v55  ;;  %v224_v48 = vld [vmem:[%s760_s20 + $0x190] sm:$0xff]  ;;  %v226_v60 = vld [vmem:[%s760_s20 + $0x1a0] sm:$0xff] }
  0x40   : > { %605 = vst [vmem:[%s793_s25 + $0x108] sm:$0xff] %v541_v61  ;;  %v543_v5 = vsel %vm415_vm3, %v351_v49, %v479_v59  ;;  %606 = vst [vmem:[%s793_s25 + $0x110] sm:$0xff] %v542_v4  ;;  %vm416_vm4 = vcmp.ge.f32.partialorder %v352_v62, 0.0  ;;  %v480_v10 = vmul.f32 0.2, %v352_v62  ;;  %vm417_vm5 = vcmp.ge.f32.partialorder %v353_v63, 0.0 }
  0x41   : > { %607 = vst [vmem:[%s793_s25 + $0x118] sm:$0xff] %v543_v5  ;;  %v481_v11 = vmul.f32 0.2, %v353_v63  ;;  %v354_v12 = vadd.f32 %v765_v1, %v283_v6  ;;  %v355_v13 = vadd.f32 %v765_v1, %v284_v7  ;;  %v285_v14 = vmul.f32 %v755_v0, %v214_v2  ;;  %v225_v49 = vld [vmem:[%s760_s20 + $0x198] sm:$0xff]  ;;  %v227_v61 = vld [vmem:[%s760_s20 + $0x1a8] sm:$0xff] }
  0x42   : > { %v286_v15 = vmul.f32 %v755_v0, %v215_v3  ;;  %v544_v16 = vsel %vm416_vm4, %v352_v62, %v480_v10  ;;  %v287_v18 = vmul.f32 %v755_v0, %v216_v8  ;;  %v288_v19 = vmul.f32 %v755_v0, %v217_v9  ;;  %v228_v10 = vld [vmem:[%s760_s20 + $0x1b0] sm:$0xff] }
  0x43   : > { %v545_v17 = vsel %vm417_vm5, %v353_v63, %v481_v11  ;;  %608 = vst [vmem:[%s793_s25 + $0x120] sm:$0xff] %v544_v16  ;;  %vm418_vm6 = vcmp.ge.f32.partialorder %v354_v12, 0.0  ;;  %v482_v22 = vmul.f32 0.2, %v354_v12  ;;  %vm419_vm7 = vcmp.ge.f32.partialorder %v355_v13, 0.0  ;;  %v229_v11 = vld [vmem:[%s760_s20 + $0x1b8] sm:$0xff] }
  0x44   : > { %609 = vst [vmem:[%s793_s25 + $0x128] sm:$0xff] %v545_v17  ;;  %v483_v23 = vmul.f32 0.2, %v355_v13  ;;  %v356_v24 = vadd.f32 %v765_v1, %v285_v14  ;;  %v357_v25 = vadd.f32 %v765_v1, %v286_v15  ;;  %v358_v26 = vadd.f32 %v765_v1, %v287_v18 }
  0x45   : > { %v359_v27 = vadd.f32 %v765_v1, %v288_v19  ;;  %v546_v28 = vsel %vm418_vm6, %v354_v12, %v482_v22  ;;  %v289_v30 = vmul.f32 %v755_v0, %v218_v20  ;;  %v290_v31 = vmul.f32 %v755_v0, %v219_v21  ;;  %v230_v20 = vld [vmem:[%s760_s20 + $0x1c0] sm:$0xff]  ;;  %v231_v21 = vld [vmem:[%s760_s20 + $0x1c8] sm:$0xff] }
  0x46   : > { %v547_v29 = vsel %vm419_vm7, %v355_v13, %v483_v23  ;;  %610 = vst [vmem:[%s793_s25 + $0x130] sm:$0xff] %v546_v28  ;;  %vm420_vm8 = vcmp.ge.f32.partialorder %v356_v24, 0.0  ;;  %v484_v34 = vmul.f32 0.2, %v356_v24  ;;  %vm421_vm9 = vcmp.ge.f32.partialorder %v357_v25, 0.0 }
  0x47   : > { %611 = vst [vmem:[%s793_s25 + $0x138] sm:$0xff] %v547_v29  ;;  %v485_v35 = vmul.f32 0.2, %v357_v25  ;;  %vm422_vm10 = vcmp.ge.f32.partialorder %v358_v26, 0.0  ;;  %v486_v36 = vmul.f32 0.2, %v358_v26  ;;  %v360_v40 = vadd.f32 %v765_v1, %v289_v30 }
  0x48   : > { %vm423_vm11 = vcmp.ge.f32.partialorder %v359_v27, 0.0  ;;  %v487_v37 = vmul.f32 0.2, %v359_v27  ;;  %v548_v38 = vsel %vm420_vm8, %v356_v24, %v484_v34  ;;  %v361_v41 = vadd.f32 %v765_v1, %v290_v31 }
  0x49   : > { %v549_v39 = vsel %vm421_vm9, %v357_v25, %v485_v35  ;;  %612 = vst [vmem:[%s793_s25 + $0x140] sm:$0xff] %v548_v38  ;;  %v550_v44 = vsel %vm422_vm10, %v358_v26, %v486_v36  ;;  %v291_v46 = vmul.f32 %v755_v0, %v220_v32  ;;  %v292_v47 = vmul.f32 %v755_v0, %v221_v33  ;;  %v232_v26 = vld [vmem:[%s760_s20 + $0x1d0] sm:$0xff]  ;;  %v234_v38 = vld [vmem:[%s760_s20 + $0x1e0] sm:$0xff] }
  0x4a   : > { %613 = vst [vmem:[%s793_s25 + $0x148] sm:$0xff] %v549_v39  ;;  %v551_v45 = vsel %vm423_vm11, %v359_v27, %v487_v37  ;;  %614 = vst [vmem:[%s793_s25 + $0x150] sm:$0xff] %v550_v44  ;;  %vm424_vm12 = vcmp.ge.f32.partialorder %v360_v40, 0.0  ;;  %v488_v50 = vmul.f32 0.2, %v360_v40  ;;  %vm425_vm13 = vcmp.ge.f32.partialorder %v361_v41, 0.0 }
  0x4b   : > { %615 = vst [vmem:[%s793_s25 + $0x158] sm:$0xff] %v551_v45  ;;  %v489_v51 = vmul.f32 0.2, %v361_v41  ;;  %v362_v52 = vadd.f32 %v765_v1, %v291_v46  ;;  %v363_v53 = vadd.f32 %v765_v1, %v292_v47  ;;  %v293_v54 = vmul.f32 %v755_v0, %v222_v42  ;;  %v233_v27 = vld [vmem:[%s760_s20 + $0x1d8] sm:$0xff]  ;;  %v235_v39 = vld [vmem:[%s760_s20 + $0x1e8] sm:$0xff] }
  0x4c   : > { %v294_v55 = vmul.f32 %v755_v0, %v223_v43  ;;  %v552_v56 = vsel %vm424_vm12, %v360_v40, %v488_v50  ;;  %v295_v58 = vmul.f32 %v755_v0, %v224_v48  ;;  %v296_v59 = vmul.f32 %v755_v0, %v225_v49  ;;  %v236_v50 = vld [vmem:[%s760_s20 + $0x1f0] sm:$0xff] }
  0x4d   : > { %v553_v57 = vsel %vm425_vm13, %v361_v41, %v489_v51  ;;  %616 = vst [vmem:[%s793_s25 + $0x160] sm:$0xff] %v552_v56  ;;  %vm426_vm14 = vcmp.ge.f32.partialorder %v362_v52, 0.0  ;;  %v490_v62 = vmul.f32 0.2, %v362_v52  ;;  %vm427_vm15 = vcmp.ge.f32.partialorder %v363_v53, 0.0  ;;  %v237_v51 = vld [vmem:[%s760_s20 + $0x1f8] sm:$0xff] }
  0x4e   : > { %617 = vst [vmem:[%s793_s25 + $0x168] sm:$0xff] %v553_v57  ;;  %v491_v63 = vmul.f32 0.2, %v363_v53  ;;  %v364_v2 = vadd.f32 %v765_v1, %v293_v54  ;;  %v365_v3 = vadd.f32 %v765_v1, %v294_v55  ;;  %v366_v4 = vadd.f32 %v765_v1, %v295_v58 }
  0x4f   : > { %v367_v5 = vadd.f32 %v765_v1, %v296_v59  ;;  %v554_v6 = vsel %vm426_vm14, %v362_v52, %v490_v62  ;;  %v297_v8 = vmul.f32 %v755_v0, %v226_v60  ;;  %v298_v9 = vmul.f32 %v755_v0, %v227_v61 }
  0x50   : > { %v555_v7 = vsel %vm427_vm15, %v363_v53, %v491_v63  ;;  %618 = vst [vmem:[%s793_s25 + $0x170] sm:$0xff] %v554_v6  ;;  %vm428_vm0 = vcmp.ge.f32.partialorder %v364_v2, 0.0  ;;  %v492_v12 = vmul.f32 0.2, %v364_v2  ;;  %vm429_vm1 = vcmp.ge.f32.partialorder %v365_v3, 0.0 }
  0x51   : > { %619 = vst [vmem:[%s793_s25 + $0x178] sm:$0xff] %v555_v7  ;;  %v493_v13 = vmul.f32 0.2, %v365_v3  ;;  %vm430_vm2 = vcmp.ge.f32.partialorder %v366_v4, 0.0  ;;  %v494_v14 = vmul.f32 0.2, %v366_v4  ;;  %v368_v18 = vadd.f32 %v765_v1, %v297_v8 }
  0x52   : > { %vm431_vm3 = vcmp.ge.f32.partialorder %v367_v5, 0.0  ;;  %v495_v15 = vmul.f32 0.2, %v367_v5  ;;  %v556_v16 = vsel %vm428_vm0, %v364_v2, %v492_v12  ;;  %v369_v19 = vadd.f32 %v765_v1, %v298_v9 }
  0x53   : > { %v557_v17 = vsel %vm429_vm1, %v365_v3, %v493_v13  ;;  %620 = vst [vmem:[%s793_s25 + $0x180] sm:$0xff] %v556_v16  ;;  %v558_v22 = vsel %vm430_vm2, %v366_v4, %v494_v14  ;;  %v299_v24 = vmul.f32 %v755_v0, %v228_v10  ;;  %v300_v25 = vmul.f32 %v755_v0, %v229_v11 }
  0x54   : > { %621 = vst [vmem:[%s793_s25 + $0x188] sm:$0xff] %v557_v17  ;;  %v559_v23 = vsel %vm431_vm3, %v367_v5, %v495_v15  ;;  %622 = vst [vmem:[%s793_s25 + $0x190] sm:$0xff] %v558_v22  ;;  %vm432_vm4 = vcmp.ge.f32.partialorder %v368_v18, 0.0  ;;  %v496_v28 = vmul.f32 0.2, %v368_v18  ;;  %vm433_vm5 = vcmp.ge.f32.partialorder %v369_v19, 0.0 }
  0x55   : > { %623 = vst [vmem:[%s793_s25 + $0x198] sm:$0xff] %v559_v23  ;;  %v497_v29 = vmul.f32 0.2, %v369_v19  ;;  %v370_v30 = vadd.f32 %v765_v1, %v299_v24  ;;  %v371_v31 = vadd.f32 %v765_v1, %v300_v25  ;;  %v301_v32 = vmul.f32 %v755_v0, %v230_v20 }
  0x56   : > { %v302_v33 = vmul.f32 %v755_v0, %v231_v21  ;;  %v560_v34 = vsel %vm432_vm4, %v368_v18, %v496_v28  ;;  %v303_v36 = vmul.f32 %v755_v0, %v232_v26  ;;  %v304_v37 = vmul.f32 %v755_v0, %v233_v27 }
  0x57   : > { %v561_v35 = vsel %vm433_vm5, %v369_v19, %v497_v29  ;;  %624 = vst [vmem:[%s793_s25 + $0x1a0] sm:$0xff] %v560_v34  ;;  %vm434_vm6 = vcmp.ge.f32.partialorder %v370_v30, 0.0  ;;  %v498_v40 = vmul.f32 0.2, %v370_v30  ;;  %vm435_vm7 = vcmp.ge.f32.partialorder %v371_v31, 0.0 }
  0x58   : > { %625 = vst [vmem:[%s793_s25 + $0x1a8] sm:$0xff] %v561_v35  ;;  %v499_v41 = vmul.f32 0.2, %v371_v31  ;;  %v372_v42 = vadd.f32 %v765_v1, %v301_v32  ;;  %v373_v43 = vadd.f32 %v765_v1, %v302_v33  ;;  %v374_v44 = vadd.f32 %v765_v1, %v303_v36 }
  0x59   : > { %v375_v45 = vadd.f32 %v765_v1, %v304_v37  ;;  %v562_v46 = vsel %vm434_vm6, %v370_v30, %v498_v40  ;;  %v305_v48 = vmul.f32 %v755_v0, %v234_v38  ;;  %v306_v49 = vmul.f32 %v755_v0, %v235_v39 }
  0x5a   : > { %v563_v47 = vsel %vm435_vm7, %v371_v31, %v499_v41  ;;  %626 = vst [vmem:[%s793_s25 + $0x1b0] sm:$0xff] %v562_v46  ;;  %vm436_vm8 = vcmp.ge.f32.partialorder %v372_v42, 0.0  ;;  %v500_v52 = vmul.f32 0.2, %v372_v42  ;;  %vm437_vm9 = vcmp.ge.f32.partialorder %v373_v43, 0.0 }
  0x5b   : > { %627 = vst [vmem:[%s793_s25 + $0x1b8] sm:$0xff] %v563_v47  ;;  %v501_v53 = vmul.f32 0.2, %v373_v43  ;;  %vm438_vm10 = vcmp.ge.f32.partialorder %v374_v44, 0.0  ;;  %v502_v54 = vmul.f32 0.2, %v374_v44  ;;  %v376_v58 = vadd.f32 %v765_v1, %v305_v48 }
  0x5c   : > { %vm439_vm11 = vcmp.ge.f32.partialorder %v375_v45, 0.0  ;;  %v503_v55 = vmul.f32 0.2, %v375_v45  ;;  %v564_v56 = vsel %vm436_vm8, %v372_v42, %v500_v52  ;;  %v377_v59 = vadd.f32 %v765_v1, %v306_v49 }
  0x5d   : > { %v565_v57 = vsel %vm437_vm9, %v373_v43, %v501_v53  ;;  %628 = vst [vmem:[%s793_s25 + $0x1c0] sm:$0xff] %v564_v56  ;;  %v566_v60 = vsel %vm438_vm10, %v374_v44, %v502_v54  ;;  %v307_v62 = vmul.f32 %v755_v0, %v236_v50  ;;  %v308_v63 = vmul.f32 %v755_v0, %v237_v51 }
  0x5e   : > { %629 = vst [vmem:[%s793_s25 + $0x1c8] sm:$0xff] %v565_v57  ;;  %v567_v61 = vsel %vm439_vm11, %v375_v45, %v503_v55  ;;  %630 = vst [vmem:[%s793_s25 + $0x1d0] sm:$0xff] %v566_v60  ;;  %vm440_vm12 = vcmp.ge.f32.partialorder %v376_v58, 0.0  ;;  %v504_v2 = vmul.f32 0.2, %v376_v58  ;;  %vm441_vm13 = vcmp.ge.f32.partialorder %v377_v59, 0.0 }
  0x5f   : > { %631 = vst [vmem:[%s793_s25 + $0x1d8] sm:$0xff] %v567_v61  ;;  %v505_v3 = vmul.f32 0.2, %v377_v59  ;;  %v378_v4 = vadd.f32 %v765_v1, %v307_v62  ;;  %v379_v5 = vadd.f32 %v765_v1, %v308_v63 }
  0x60   : > { %v568_v6 = vsel %vm440_vm12, %v376_v58, %v504_v2 }
  0x61   : > { %v569_v7 = vsel %vm441_vm13, %v377_v59, %v505_v3  ;;  %632 = vst [vmem:[%s793_s25 + $0x1e0] sm:$0xff] %v568_v6  ;;  %vm442_vm14 = vcmp.ge.f32.partialorder %v378_v4, 0.0  ;;  %v506_v8 = vmul.f32 0.2, %v378_v4  ;;  %vm443_vm15 = vcmp.ge.f32.partialorder %v379_v5, 0.0 }
  0x62   : > { %633 = vst [vmem:[%s793_s25 + $0x1e8] sm:$0xff] %v569_v7  ;;  %v507_v0 = vmul.f32 0.2, %v379_v5 }
  0x63   : > { %v570_v9 = vsel %vm442_vm14, %v378_v4, %v506_v8 }
  0x64   : > { %v571_v10 = vsel %vm443_vm15, %v379_v5, %v507_v0  ;;  %634 = vst [vmem:[%s793_s25 + $0x1f0] sm:$0xff] %v570_v9 }
  0x65   : > { %635 = vst [vmem:[%s793_s25 + $0x1f8] sm:$0xff] %v571_v10 }
  0x66 PF: > { %s13_s12 = sadd.s32 1, %s719_s12  }
  0x67   : > { %p10_p4 = scmp.ge.s32.totalorder %s13_s12, 6  }
  0x69   :  { %12 = sbr.rel (!%p10_p4) target bundleno = 1 (0x1), region = 62 }

// kernel: discriminator_forward.12
= control target key start
LH: loop header
LB: loop body
LE: loop exit
PB: predicated region body
PF: predicated region fallthrough
CT: control target
= control target key end

     0   :  { %s2390_s1 = inlined_call_operand.vmem [shape: bf16[128,128], index: 1, kind: input, shape index: {}]   ;;  %s2391_s0 = inlined_call_operand.vmem [shape: bf16[512,128], index: 0, kind: input, shape index: {}]   ;;  %s2392_s2 = inlined_call_operand.vmem [shape: f32[1,128], index: 2, kind: input, shape index: {}]   ;;  %s2393_s3 = inlined_call_operand.vmem [shape: f32[512,128], index: 3, kind: output, shape index: {0}]   ;;  %s2394_s4 = inlined_call_operand.vmem [shape: f32[1,1,128], index: 4, kind: output, shape index: {1}]   ;;  %s2395_s5 = inlined_call_operand.vmem [shape: f32[1,1,128], index: 5, kind: output, shape index: {2}]  }
   0x1   :  { %v1741_v0 = vld [vmem:[%s2390_s1] sm:$0xff]   ;;  %v1742_v1 = vld [vmem:[%s2390_s1 + $0x8] sm:$0xff]   ;;  %v1743_v2 = vld [vmem:[%s2390_s1 + $0x10] sm:$0xff]  }
   0x2   :  { %1645 = vmatprep.subr.bf16.mxu0 %v1741_v0  ;;  %1725 = vmatprep.subr.bf16.mxu1 %v1741_v0  ;;  %v1744_v3 = vld [vmem:[%s2390_s1 + $0x18] sm:$0xff]   ;;  %v1749_v4 = vld [vmem:[%s2391_s0] sm:$0xff]   ;;  %v1746_v6 = vld [vmem:[%s2390_s1 + $0x28] sm:$0xff]  }
   0x3   :  { %1646 = vmatpush3.bf16.msra.mxu0 %v1741_v0  ;;  %1733 = vmatpush3.bf16.msra.mxu1 %v1741_v0  ;;  %v1745_v5 = vld [vmem:[%s2390_s1 + $0x20] sm:$0xff]   ;;  %v1747_v7 = vld [vmem:[%s2390_s1 + $0x30] sm:$0xff]   ;;  %v1748_v8 = vld [vmem:[%s2390_s1 + $0x38] sm:$0xff]  }
   0x4   :  { %1647 = vmatprep.subr.bf16.mxu0 %v1742_v1  ;;  %1726 = vmatprep.subr.bf16.mxu1 %v1742_v1  ;;  %v1765_v9 = vld [vmem:[%s2391_s0 + $0x80] sm:$0xff]   ;;  %v1750_v10 = vld [vmem:[%s2391_s0 + $0x8] sm:$0xff]   ;;  %v1751_v11 = vld [vmem:[%s2391_s0 + $0x10] sm:$0xff]  }
   0x5   :  { %1661 = vmatprep.mubr.bf16.mxu0 %v1749_v4  ;;  %1693 = vmatprep.mubr.bf16.mxu1 %v1765_v9  ;;  %v1766_v12 = vld [vmem:[%s2391_s0 + $0x88] sm:$0xff]   ;;  %v1767_v13 = vld [vmem:[%s2391_s0 + $0x90] sm:$0xff]   ;;  %v1752_v14 = vld [vmem:[%s2391_s0 + $0x18] sm:$0xff]  }
   0x6   :  { %v1753_v15 = vld [vmem:[%s2391_s0 + $0x20] sm:$0xff]   ;;  %v1768_v16 = vld [vmem:[%s2391_s0 + $0x98] sm:$0xff]   ;;  %v1754_v18 = vld [vmem:[%s2391_s0 + $0x28] sm:$0xff]  }
   0x7   :  { %1648 = vmatpush3.bf16.msra.mxu0 %v1742_v1  ;;  %1734 = vmatpush3.bf16.msra.mxu1 %v1742_v1  ;;  %v1769_v17 = vld [vmem:[%s2391_s0 + $0xa0] sm:$0xff]   ;;  %v1770_v19 = vld [vmem:[%s2391_s0 + $0xa8] sm:$0xff]   ;;  %v1755_v20 = vld [vmem:[%s2391_s0 + $0x30] sm:$0xff]  }
   0x8   :  { %1649 = vmatprep.subr.bf16.mxu0 %v1743_v2  ;;  %1727 = vmatprep.subr.bf16.mxu1 %v1743_v2  ;;  %v1771_v21 = vld [vmem:[%s2391_s0 + $0xb0] sm:$0xff]   ;;  %v1756_v22 = vld [vmem:[%s2391_s0 + $0x38] sm:$0xff]   ;;  %v1757_v24 = vld [vmem:[%s2391_s0 + $0x40] sm:$0xff]  }
   0x9   :  { %v1772_v23 = vld [vmem:[%s2391_s0 + $0xb8] sm:$0xff]   ;;  %v1773_v25 = vld [vmem:[%s2391_s0 + $0xc0] sm:$0xff]   ;;  %v1758_v26 = vld [vmem:[%s2391_s0 + $0x48] sm:$0xff]  }
   0xa   :  { %v1774_v27 = vld [vmem:[%s2391_s0 + $0xc8] sm:$0xff]   ;;  %v1759_v28 = vld [vmem:[%s2391_s0 + $0x50] sm:$0xff]   ;;  %v1760_v30 = vld [vmem:[%s2391_s0 + $0x58] sm:$0xff]  }
   0xb   :  { %1650 = vmatpush3.bf16.msra.mxu0 %v1743_v2  ;;  %1735 = vmatpush3.bf16.msra.mxu1 %v1743_v2  ;;  %v1775_v29 = vld [vmem:[%s2391_s0 + $0xd0] sm:$0xff]   ;;  %v1776_v31 = vld [vmem:[%s2391_s0 + $0xd8] sm:$0xff]   ;;  %v1761_v32 = vld [vmem:[%s2391_s0 + $0x60] sm:$0xff]  }
   0xc   :  { %1651 = vmatprep.subr.bf16.mxu0 %v1744_v3  ;;  %1728 = vmatprep.subr.bf16.mxu1 %v1744_v3  ;;  %v1777_v33 = vld [vmem:[%s2391_s0 + $0xe0] sm:$0xff]   ;;  %v1762_v34 = vld [vmem:[%s2391_s0 + $0x68] sm:$0xff]   ;;  %v1763_v36 = vld [vmem:[%s2391_s0 + $0x70] sm:$0xff]  }
   0xd   :  { %v1778_v35 = vld [vmem:[%s2391_s0 + $0xe8] sm:$0xff]   ;;  %v1779_v37 = vld [vmem:[%s2391_s0 + $0xf0] sm:$0xff]   ;;  %v1764_v38 = vld [vmem:[%s2391_s0 + $0x78] sm:$0xff]  }
   0xe   :  { %v1780_v39 = vld [vmem:[%s2391_s0 + $0xf8] sm:$0xff]   ;;  %v1934_v40 = vld [vmem:[%s2392_s2] ss:$0 sm:$0xff] }
   0xf   :  { %1652 = vmatpush3.bf16.msra.mxu0 %v1744_v3  ;;  %1736 = vmatpush3.bf16.msra.mxu1 %v1744_v3 }
  0x10   :  { %1653 = vmatprep.subr.bf16.mxu0 %v1745_v5  ;;  %1729 = vmatprep.subr.bf16.mxu1 %v1745_v5 }
  0x13   :  { %1654 = vmatpush3.bf16.msra.mxu0 %v1745_v5  ;;  %1737 = vmatpush3.bf16.msra.mxu1 %v1745_v5 }
  0x14   :  { %1655 = vmatprep.subr.bf16.mxu0 %v1746_v6  ;;  %1730 = vmatprep.subr.bf16.mxu1 %v1746_v6 }
  0x17   :  { %1656 = vmatpush3.bf16.msra.mxu0 %v1746_v6  ;;  %1738 = vmatpush3.bf16.msra.mxu1 %v1746_v6 }
  0x18   :  { %1657 = vmatprep.subr.bf16.mxu0 %v1747_v7  ;;  %1731 = vmatprep.subr.bf16.mxu1 %v1747_v7 }
  0x1b   :  { %1658 = vmatpush3.bf16.msra.mxu0 %v1747_v7  ;;  %1739 = vmatpush3.bf16.msra.mxu1 %v1747_v7 }
  0x1c   :  { %1659 = vmatprep.subr.bf16.mxu0 %v1748_v8  ;;  %1732 = vmatprep.subr.bf16.mxu1 %v1748_v8 }
  0x1f   :  { %1660 = vmatpush3.bf16.msra.mxu0 %v1748_v8  ;;  %1740 = vmatpush3.bf16.msra.mxu1 %v1748_v8 }
  0x22   :  { %1662 = vmatmul.mubr.bf16.vlgmr.msra.gmra.mrb[0].mxu0 %v1750_v10  ;;  %1694 = vmatmul.mubr.bf16.vlgmr.msra.gmra.mrb[0].mxu1 %v1766_v12 }
  0x23   :  { %1665 = vmatprep.mubr.bf16.mxu0 %v1751_v11  ;;  %1697 = vmatprep.mubr.bf16.mxu1 %v1767_v13 }
  0x2a   :  { %1666 = vmatmul.mubr.bf16.gmra.mrb[4].mxu0 %v1752_v14  ;;  %1698 = vmatmul.mubr.bf16.gmra.mrb[4].mxu1 %v1768_v16 }
  0x2b   :  { %1669 = vmatprep.mubr.bf16.mxu0 %v1753_v15  ;;  %1701 = vmatprep.mubr.bf16.mxu1 %v1769_v17 }
  0x32   :  { %1670 = vmatmul.mubr.bf16.gmra.mrb[8].mxu0 %v1754_v18  ;;  %1702 = vmatmul.mubr.bf16.gmra.mrb[8].mxu1 %v1770_v19 }
  0x33   :  { %1673 = vmatprep.mubr.bf16.mxu0 %v1755_v20  ;;  %1705 = vmatprep.mubr.bf16.mxu1 %v1771_v21 }
  0x3a   :  { %1674 = vmatmul.mubr.bf16.gmra.mrb[12].mxu0 %v1756_v22  ;;  %1706 = vmatmul.mubr.bf16.gmra.mrb[12].mxu1 %v1772_v23 }
  0x3b   :  { %1677 = vmatprep.mubr.bf16.mxu0 %v1757_v24  ;;  %1709 = vmatprep.mubr.bf16.mxu1 %v1773_v25 }
  0x42   :  { %1678 = vmatmul.mubr.bf16.gmra.mrb[16].mxu0 %v1758_v26  ;;  %1710 = vmatmul.mubr.bf16.gmra.mrb[16].mxu1 %v1774_v27 }
  0x43   :  { %1681 = vmatprep.mubr.bf16.mxu0 %v1759_v28  ;;  %1713 = vmatprep.mubr.bf16.mxu1 %v1775_v29 }
  0x4a   :  { %1682 = vmatmul.mubr.bf16.gmra.mrb[20].mxu0 %v1760_v30  ;;  %1714 = vmatmul.mubr.bf16.gmra.mrb[20].mxu1 %v1776_v31 }
  0x4b   :  { %1685 = vmatprep.mubr.bf16.mxu0 %v1761_v32  ;;  %1717 = vmatprep.mubr.bf16.mxu1 %v1777_v33 }
  0x52   :  { %1686 = vmatmul.mubr.bf16.gmra.mrb[24].mxu0 %v1762_v34  ;;  %1718 = vmatmul.mubr.bf16.gmra.mrb[24].mxu1 %v1778_v35 }
  0x53   :  { %1689 = vmatprep.mubr.bf16.mxu0 %v1763_v36  ;;  %1721 = vmatprep.mubr.bf16.mxu1 %v1779_v37 }
  0x5a   :  { %1690 = vmatmul.mubr.bf16.gmra.mrb[28].mxu0 %v1764_v38  ;;  %1722 = vmatmul.mubr.bf16.gmra.mrb[28].mxu1 %v1780_v39 }
  0xf5   :  { %v1663_v41 = vpop.f32.mrb[0].mxu0  ;;  %v1695_v42 = vpop.f32.mrb[0].mxu1 }
  0xf6   :  { %v964_v43 = vadd.f32 %v1663_v41, %v1934_v40  ;;  %v505_v44 = vpop.f32.mrb[1].mxu0  ;;  %v1938_v45 = vadd.f32 %v1695_v42, %v1934_v40  ;;  %v633_v46 = vpop.f32.mrb[1].mxu1 }
  0xf7   :  { %v962_v47 = vadd.f32 %v1934_v40, %v505_v44  ;;  %v1664_v48 = vpop.f32.mrb[2].mxu0  ;;  %v1942_v49 = vadd.f32 %v1934_v40, %v633_v46  ;;  %v1696_v50 = vpop.f32.mrb[2].mxu1 }
  0xf8   :  { %1028 = vst [vmem:[%s2393_s3 + $0x10] sm:$0xff] %v964_v43  ;;  %v965_v51 = vadd.f32 %v1664_v48, %v1934_v40  ;;  %v508_v52 = vpop.f32.mrb[3].mxu0  ;;  %1060 = vst [vmem:[%s2393_s3 + $0x110] sm:$0xff] %v1938_v45  ;;  %v1953_v53 = vadd.f32 %v1696_v50, %v1934_v40  ;;  %v636_v54 = vpop.f32.mrb[3].mxu1  ;;  %v1420_v60 = vmul.f32 %v964_v43, %v964_v43 }
  0xf9   :  { %1026 = vst [vmem:[%s2393_s3] sm:$0xff] %v962_v47  ;;  %v963_v55 = vadd.f32 %v1934_v40, %v508_v52  ;;  %1058 = vst [vmem:[%s2393_s3 + $0x100] sm:$0xff] %v1942_v49  ;;  %v1964_v56 = vadd.f32 %v1934_v40, %v636_v54  ;;  %v1418_v57 = vmul.f32 %v962_v47, %v962_v47 }
  0xfa   :  { %1029 = vst [vmem:[%s2393_s3 + $0x18] sm:$0xff] %v965_v51  ;;  %1061 = vst [vmem:[%s2393_s3 + $0x118] sm:$0xff] %v1953_v53  ;;  %v1421_v1 = vmul.f32 %v965_v51, %v965_v51 }
  0xfb   :  { %1027 = vst [vmem:[%s2393_s3 + $0x8] sm:$0xff] %v963_v55  ;;  %v1348_v58 = vadd.f32 %v963_v55, %v962_v47  ;;  %v1419_v59 = vmul.f32 %v963_v55, %v963_v55  ;;  %1059 = vst [vmem:[%s2393_s3 + $0x108] sm:$0xff] %v1964_v56 }
  0xfd   :  { %v1349_v61 = vadd.f32 %v1348_v58, %v964_v43  ;;  %v1482_v62 = vadd.f32 %v1419_v59, %v1418_v57  ;;  %v1667_v63 = vpop.f32.mrb[4].mxu0  ;;  %v1699_v0 = vpop.f32.mrb[4].mxu1 }
  0xfe   :  { %v968_v2 = vadd.f32 %v1667_v63, %v1934_v40  ;;  %v521_v3 = vpop.f32.mrb[5].mxu0  ;;  %v1982_v4 = vadd.f32 %v1699_v0, %v1934_v40  ;;  %v649_v5 = vpop.f32.mrb[5].mxu1 }
  0xff   :  { %v1483_v6 = vadd.f32 %v1482_v62, %v1420_v60  ;;  %v966_v7 = vadd.f32 %v1934_v40, %v521_v3  ;;  %v1350_v8 = vadd.f32 %v1349_v61, %v965_v51  ;;  %v1668_v9 = vpop.f32.mrb[6].mxu0  ;;  %v1986_v10 = vadd.f32 %v1934_v40, %v649_v5  ;;  %v1700_v11 = vpop.f32.mrb[6].mxu1 }
 0x100   :  { %1032 = vst [vmem:[%s2393_s3 + $0x30] sm:$0xff] %v968_v2  ;;  %v969_v12 = vadd.f32 %v1668_v9, %v1934_v40  ;;  %v524_v13 = vpop.f32.mrb[7].mxu0  ;;  %1064 = vst [vmem:[%s2393_s3 + $0x130] sm:$0xff] %v1982_v4  ;;  %v1997_v14 = vadd.f32 %v1700_v11, %v1934_v40  ;;  %v652_v15 = vpop.f32.mrb[7].mxu1  ;;  %v1424_v24 = vmul.f32 %v968_v2, %v968_v2 }
 0x101   :  { %1030 = vst [vmem:[%s2393_s3 + $0x20] sm:$0xff] %v966_v7  ;;  %v1351_v16 = vadd.f32 %v1350_v8, %v966_v7  ;;  %v1422_v17 = vmul.f32 %v966_v7, %v966_v7  ;;  %v1484_v18 = vadd.f32 %v1483_v6, %v1421_v1  ;;  %v967_v19 = vadd.f32 %v1934_v40, %v524_v13 }
 0x102   :  { %1062 = vst [vmem:[%s2393_s3 + $0x120] sm:$0xff] %v1986_v10  ;;  %1033 = vst [vmem:[%s2393_s3 + $0x38] sm:$0xff] %v969_v12  ;;  %v2015_v20 = vadd.f32 %v1934_v40, %v652_v15  ;;  %v1425_v29 = vmul.f32 %v969_v12, %v969_v12 }
 0x103   :  { %1065 = vst [vmem:[%s2393_s3 + $0x138] sm:$0xff] %v1997_v14  ;;  %v1485_v21 = vadd.f32 %v1484_v18, %v1422_v17  ;;  %1031 = vst [vmem:[%s2393_s3 + $0x28] sm:$0xff] %v967_v19  ;;  %v1352_v22 = vadd.f32 %v1351_v16, %v967_v19  ;;  %v1423_v23 = vmul.f32 %v967_v19, %v967_v19 }
 0x104   :  { %1063 = vst [vmem:[%s2393_s3 + $0x128] sm:$0xff] %v2015_v20 }
 0x105   :  { %v1353_v25 = vadd.f32 %v1352_v22, %v968_v2  ;;  %v1486_v26 = vadd.f32 %v1485_v21, %v1423_v23  ;;  %v1671_v27 = vpop.f32.mrb[8].mxu0  ;;  %v1703_v28 = vpop.f32.mrb[8].mxu1 }
 0x106   :  { %v972_v30 = vadd.f32 %v1671_v27, %v1934_v40  ;;  %v537_v31 = vpop.f32.mrb[9].mxu0  ;;  %v2026_v32 = vadd.f32 %v1703_v28, %v1934_v40  ;;  %v665_v33 = vpop.f32.mrb[9].mxu1 }
 0x107   :  { %v1487_v34 = vadd.f32 %v1486_v26, %v1424_v24  ;;  %v970_v35 = vadd.f32 %v1934_v40, %v537_v31  ;;  %v1354_v36 = vadd.f32 %v1353_v25, %v969_v12  ;;  %v1672_v37 = vpop.f32.mrb[10].mxu0  ;;  %v2030_v38 = vadd.f32 %v1934_v40, %v665_v33  ;;  %v1704_v39 = vpop.f32.mrb[10].mxu1 }
 0x108   :  { %1036 = vst [vmem:[%s2393_s3 + $0x50] sm:$0xff] %v972_v30  ;;  %v973_v41 = vadd.f32 %v1672_v37, %v1934_v40  ;;  %v540_v42 = vpop.f32.mrb[11].mxu0  ;;  %1068 = vst [vmem:[%s2393_s3 + $0x150] sm:$0xff] %v2026_v32  ;;  %v2041_v43 = vadd.f32 %v1704_v39, %v1934_v40  ;;  %v668_v44 = vpop.f32.mrb[11].mxu1  ;;  %v1428_v57 = vmul.f32 %v972_v30, %v972_v30 }
 0x109   :  { %1034 = vst [vmem:[%s2393_s3 + $0x40] sm:$0xff] %v970_v35  ;;  %v1355_v46 = vadd.f32 %v1354_v36, %v970_v35  ;;  %v1426_v47 = vmul.f32 %v970_v35, %v970_v35  ;;  %v1488_v48 = vadd.f32 %v1487_v34, %v1425_v29  ;;  %v971_v50 = vadd.f32 %v1934_v40, %v540_v42 }
 0x10a   :  { %1066 = vst [vmem:[%s2393_s3 + $0x140] sm:$0xff] %v2030_v38  ;;  %1037 = vst [vmem:[%s2393_s3 + $0x58] sm:$0xff] %v973_v41  ;;  %v2059_v51 = vadd.f32 %v1934_v40, %v668_v44  ;;  %v1429_v62 = vmul.f32 %v973_v41, %v973_v41 }
 0x10b   :  { %1069 = vst [vmem:[%s2393_s3 + $0x158] sm:$0xff] %v2041_v43  ;;  %v1489_v52 = vadd.f32 %v1488_v48, %v1426_v47  ;;  %1035 = vst [vmem:[%s2393_s3 + $0x48] sm:$0xff] %v971_v50  ;;  %v1356_v54 = vadd.f32 %v1355_v46, %v971_v50  ;;  %v1427_v55 = vmul.f32 %v971_v50, %v971_v50 }
 0x10c   :  { %1067 = vst [vmem:[%s2393_s3 + $0x148] sm:$0xff] %v2059_v51 }
 0x10d   :  { %v1357_v58 = vadd.f32 %v1356_v54, %v972_v30  ;;  %v1490_v59 = vadd.f32 %v1489_v52, %v1427_v55  ;;  %v1675_v60 = vpop.f32.mrb[12].mxu0  ;;  %v1707_v61 = vpop.f32.mrb[12].mxu1 }
 0x10e   :  { %v976_v63 = vadd.f32 %v1675_v60, %v1934_v40  ;;  %v553_v0 = vpop.f32.mrb[13].mxu0  ;;  %v2070_v1 = vadd.f32 %v1707_v61, %v1934_v40  ;;  %v681_v2 = vpop.f32.mrb[13].mxu1 }
 0x10f   :  { %v1491_v3 = vadd.f32 %v1490_v59, %v1428_v57  ;;  %v974_v5 = vadd.f32 %v1934_v40, %v553_v0  ;;  %v1358_v6 = vadd.f32 %v1357_v58, %v973_v41  ;;  %v1676_v7 = vpop.f32.mrb[14].mxu0  ;;  %v2074_v8 = vadd.f32 %v1934_v40, %v681_v2  ;;  %v1708_v9 = vpop.f32.mrb[14].mxu1 }
 0x110   :  { %1040 = vst [vmem:[%s2393_s3 + $0x70] sm:$0xff] %v976_v63  ;;  %v977_v11 = vadd.f32 %v1676_v7, %v1934_v40  ;;  %v556_v12 = vpop.f32.mrb[15].mxu0  ;;  %1072 = vst [vmem:[%s2393_s3 + $0x170] sm:$0xff] %v2070_v1  ;;  %v2085_v13 = vadd.f32 %v1708_v9, %v1934_v40  ;;  %v684_v15 = vpop.f32.mrb[15].mxu1  ;;  %v1432_v25 = vmul.f32 %v976_v63, %v976_v63 }
 0x111   :  { %1038 = vst [vmem:[%s2393_s3 + $0x60] sm:$0xff] %v974_v5  ;;  %v1359_v16 = vadd.f32 %v1358_v6, %v974_v5  ;;  %v1430_v17 = vmul.f32 %v974_v5, %v974_v5  ;;  %v1492_v18 = vadd.f32 %v1491_v3, %v1429_v62  ;;  %v975_v19 = vadd.f32 %v1934_v40, %v556_v12 }
 0x112   :  { %1070 = vst [vmem:[%s2393_s3 + $0x160] sm:$0xff] %v2074_v8  ;;  %1041 = vst [vmem:[%s2393_s3 + $0x78] sm:$0xff] %v977_v11  ;;  %v2103_v21 = vadd.f32 %v1934_v40, %v684_v15  ;;  %v1433_v30 = vmul.f32 %v977_v11, %v977_v11 }
 0x113   :  { %1073 = vst [vmem:[%s2393_s3 + $0x178] sm:$0xff] %v2085_v13  ;;  %v1493_v22 = vadd.f32 %v1492_v18, %v1430_v17  ;;  %1039 = vst [vmem:[%s2393_s3 + $0x68] sm:$0xff] %v975_v19  ;;  %v1360_v23 = vadd.f32 %v1359_v16, %v975_v19  ;;  %v1431_v24 = vmul.f32 %v975_v19, %v975_v19 }
 0x114   :  { %1071 = vst [vmem:[%s2393_s3 + $0x168] sm:$0xff] %v2103_v21 }
 0x115   :  { %v1361_v26 = vadd.f32 %v1360_v23, %v976_v63  ;;  %v1494_v27 = vadd.f32 %v1493_v22, %v1431_v24  ;;  %v1679_v28 = vpop.f32.mrb[16].mxu0  ;;  %v1711_v29 = vpop.f32.mrb[16].mxu1 }
 0x116   :  { %v980_v31 = vadd.f32 %v1679_v28, %v1934_v40  ;;  %v569_v33 = vpop.f32.mrb[17].mxu0  ;;  %v2114_v34 = vadd.f32 %v1711_v29, %v1934_v40  ;;  %v697_v35 = vpop.f32.mrb[17].mxu1 }
 0x117   :  { %v1495_v36 = vadd.f32 %v1494_v27, %v1432_v25  ;;  %v978_v37 = vadd.f32 %v1934_v40, %v569_v33  ;;  %v1362_v39 = vadd.f32 %v1361_v26, %v977_v11  ;;  %v1680_v41 = vpop.f32.mrb[18].mxu0  ;;  %v2118_v42 = vadd.f32 %v1934_v40, %v697_v35  ;;  %v1712_v44 = vpop.f32.mrb[18].mxu1 }
 0x118   :  { %1044 = vst [vmem:[%s2393_s3 + $0x90] sm:$0xff] %v980_v31  ;;  %v981_v46 = vadd.f32 %v1680_v41, %v1934_v40  ;;  %v572_v47 = vpop.f32.mrb[19].mxu0  ;;  %1076 = vst [vmem:[%s2393_s3 + $0x190] sm:$0xff] %v2114_v34  ;;  %v2129_v48 = vadd.f32 %v1712_v44, %v1934_v40  ;;  %v700_v50 = vpop.f32.mrb[19].mxu1  ;;  %v1436_v62 = vmul.f32 %v980_v31, %v980_v31 }
 0x119   :  { %1042 = vst [vmem:[%s2393_s3 + $0x80] sm:$0xff] %v978_v37  ;;  %v1363_v52 = vadd.f32 %v1362_v39, %v978_v37  ;;  %v1434_v54 = vmul.f32 %v978_v37, %v978_v37  ;;  %v1496_v55 = vadd.f32 %v1495_v36, %v1433_v30  ;;  %v979_v57 = vadd.f32 %v1934_v40, %v572_v47 }
 0x11a   :  { %1074 = vst [vmem:[%s2393_s3 + $0x180] sm:$0xff] %v2118_v42  ;;  %1045 = vst [vmem:[%s2393_s3 + $0x98] sm:$0xff] %v981_v46  ;;  %v2147_v58 = vadd.f32 %v1934_v40, %v700_v50  ;;  %v1437_v5 = vmul.f32 %v981_v46, %v981_v46 }
 0x11b   :  { %1077 = vst [vmem:[%s2393_s3 + $0x198] sm:$0xff] %v2129_v48  ;;  %v1497_v59 = vadd.f32 %v1496_v55, %v1434_v54  ;;  %1043 = vst [vmem:[%s2393_s3 + $0x88] sm:$0xff] %v979_v57  ;;  %v1364_v60 = vadd.f32 %v1363_v52, %v979_v57  ;;  %v1435_v61 = vmul.f32 %v979_v57, %v979_v57 }
 0x11c   :  { %1075 = vst [vmem:[%s2393_s3 + $0x188] sm:$0xff] %v2147_v58 }
 0x11d   :  { %v1365_v63 = vadd.f32 %v1364_v60, %v980_v31  ;;  %v1498_v0 = vadd.f32 %v1497_v59, %v1435_v61  ;;  %v1683_v2 = vpop.f32.mrb[20].mxu0  ;;  %v1715_v3 = vpop.f32.mrb[20].mxu1 }
 0x11e   :  { %v984_v6 = vadd.f32 %v1683_v2, %v1934_v40  ;;  %v585_v7 = vpop.f32.mrb[21].mxu0  ;;  %v2158_v9 = vadd.f32 %v1715_v3, %v1934_v40  ;;  %v713_v11 = vpop.f32.mrb[21].mxu1 }
 0x11f   :  { %v1499_v12 = vadd.f32 %v1498_v0, %v1436_v62  ;;  %v982_v15 = vadd.f32 %v1934_v40, %v585_v7  ;;  %v1366_v16 = vadd.f32 %v1365_v63, %v981_v46  ;;  %v1684_v17 = vpop.f32.mrb[22].mxu0  ;;  %v2162_v18 = vadd.f32 %v1934_v40, %v713_v11  ;;  %v1716_v19 = vpop.f32.mrb[22].mxu1 }
 0x120   :  { %1048 = vst [vmem:[%s2393_s3 + $0xb0] sm:$0xff] %v984_v6  ;;  %v985_v22 = vadd.f32 %v1684_v17, %v1934_v40  ;;  %v588_v23 = vpop.f32.mrb[23].mxu0  ;;  %1080 = vst [vmem:[%s2393_s3 + $0x1b0] sm:$0xff] %v2158_v9  ;;  %v2173_v24 = vadd.f32 %v1716_v19, %v1934_v40  ;;  %v716_v25 = vpop.f32.mrb[23].mxu1  ;;  %v1440_v36 = vmul.f32 %v984_v6, %v984_v6 }
 0x121   :  { %1046 = vst [vmem:[%s2393_s3 + $0xa0] sm:$0xff] %v982_v15  ;;  %v1367_v26 = vadd.f32 %v1366_v16, %v982_v15  ;;  %v1438_v27 = vmul.f32 %v982_v15, %v982_v15  ;;  %v1500_v28 = vadd.f32 %v1499_v12, %v1437_v5  ;;  %v983_v29 = vadd.f32 %v1934_v40, %v588_v23 }
 0x122   :  { %1078 = vst [vmem:[%s2393_s3 + $0x1a0] sm:$0xff] %v2162_v18  ;;  %1049 = vst [vmem:[%s2393_s3 + $0xb8] sm:$0xff] %v985_v22  ;;  %v2191_v30 = vadd.f32 %v1934_v40, %v716_v25  ;;  %v1441_v46 = vmul.f32 %v985_v22, %v985_v22 }
 0x123   :  { %1081 = vst [vmem:[%s2393_s3 + $0x1b8] sm:$0xff] %v2173_v24  ;;  %v1501_v31 = vadd.f32 %v1500_v28, %v1438_v27  ;;  %1047 = vst [vmem:[%s2393_s3 + $0xa8] sm:$0xff] %v983_v29  ;;  %v1368_v33 = vadd.f32 %v1367_v26, %v983_v29  ;;  %v1439_v35 = vmul.f32 %v983_v29, %v983_v29 }
 0x124   :  { %1079 = vst [vmem:[%s2393_s3 + $0x1a8] sm:$0xff] %v2191_v30 }
 0x125   :  { %v1369_v37 = vadd.f32 %v1368_v33, %v984_v6  ;;  %v1502_v39 = vadd.f32 %v1501_v31, %v1439_v35  ;;  %v1687_v41 = vpop.f32.mrb[24].mxu0  ;;  %v1719_v44 = vpop.f32.mrb[24].mxu1 }
 0x126   :  { %v988_v47 = vadd.f32 %v1687_v41, %v1934_v40  ;;  %v601_v50 = vpop.f32.mrb[25].mxu0  ;;  %v2202_v52 = vadd.f32 %v1719_v44, %v1934_v40  ;;  %v729_v54 = vpop.f32.mrb[25].mxu1 }
 0x127   :  { %v1503_v55 = vadd.f32 %v1502_v39, %v1440_v36  ;;  %v986_v57 = vadd.f32 %v1934_v40, %v601_v50  ;;  %v1370_v59 = vadd.f32 %v1369_v37, %v985_v22  ;;  %v1688_v60 = vpop.f32.mrb[26].mxu0  ;;  %v2206_v61 = vadd.f32 %v1934_v40, %v729_v54  ;;  %v1720_v62 = vpop.f32.mrb[26].mxu1 }
 0x128   :  { %1052 = vst [vmem:[%s2393_s3 + $0xd0] sm:$0xff] %v988_v47  ;;  %v989_v63 = vadd.f32 %v1688_v60, %v1934_v40  ;;  %v604_v0 = vpop.f32.mrb[27].mxu0  ;;  %1084 = vst [vmem:[%s2393_s3 + $0x1d0] sm:$0xff] %v2202_v52  ;;  %v2217_v2 = vadd.f32 %v1720_v62, %v1934_v40  ;;  %v732_v3 = vpop.f32.mrb[27].mxu1  ;;  %v1444_v19 = vmul.f32 %v988_v47, %v988_v47 }
 0x129   :  { %1050 = vst [vmem:[%s2393_s3 + $0xc0] sm:$0xff] %v986_v57  ;;  %v1371_v5 = vadd.f32 %v1370_v59, %v986_v57  ;;  %v1442_v6 = vmul.f32 %v986_v57, %v986_v57  ;;  %v1504_v7 = vadd.f32 %v1503_v55, %v1441_v46  ;;  %v987_v11 = vadd.f32 %v1934_v40, %v604_v0 }
 0x12a   :  { %1082 = vst [vmem:[%s2393_s3 + $0x1c0] sm:$0xff] %v2206_v61  ;;  %1053 = vst [vmem:[%s2393_s3 + $0xd8] sm:$0xff] %v989_v63  ;;  %v2235_v12 = vadd.f32 %v1934_v40, %v732_v3  ;;  %v1445_v27 = vmul.f32 %v989_v63, %v989_v63 }
 0x12b   :  { %1085 = vst [vmem:[%s2393_s3 + $0x1d8] sm:$0xff] %v2217_v2  ;;  %v1505_v15 = vadd.f32 %v1504_v7, %v1442_v6  ;;  %1051 = vst [vmem:[%s2393_s3 + $0xc8] sm:$0xff] %v987_v11  ;;  %v1372_v16 = vadd.f32 %v1371_v5, %v987_v11  ;;  %v1443_v17 = vmul.f32 %v987_v11, %v987_v11 }
 0x12c   :  { %1083 = vst [vmem:[%s2393_s3 + $0x1c8] sm:$0xff] %v2235_v12 }
 0x12d   :  { %v1373_v22 = vadd.f32 %v1372_v16, %v988_v47  ;;  %v1506_v23 = vadd.f32 %v1505_v15, %v1443_v17  ;;  %v1691_v25 = vpop.f32.mrb[28].mxu0  ;;  %v1723_v26 = vpop.f32.mrb[28].mxu1 }
 0x12e   :  { %v992_v28 = vadd.f32 %v1691_v25, %v1934_v40  ;;  %v617_v29 = vpop.f32.mrb[29].mxu0  ;;  %v2246_v31 = vadd.f32 %v1723_v26, %v1934_v40  ;;  %v745_v33 = vpop.f32.mrb[29].mxu1  ;;  %v1451_v25 = vmul.f32 %v1964_v56, %v1964_v56  ;;  %v1452_v26 = vmul.f32 %v1938_v45, %v1938_v45 }
 0x12f   :  { %v1507_v35 = vadd.f32 %v1506_v23, %v1444_v19  ;;  %v990_v36 = vadd.f32 %v1934_v40, %v617_v29  ;;  %v1374_v37 = vadd.f32 %v1373_v22, %v989_v63  ;;  %v1692_v39 = vpop.f32.mrb[30].mxu0  ;;  %v2250_v41 = vadd.f32 %v1934_v40, %v745_v33  ;;  %v1724_v44 = vpop.f32.mrb[30].mxu1 }
 0x130   :  { %1056 = vst [vmem:[%s2393_s3 + $0xf0] sm:$0xff] %v992_v28  ;;  %v993_v46 = vadd.f32 %v1692_v39, %v1934_v40  ;;  %v620_v47 = vpop.f32.mrb[31].mxu0  ;;  %1088 = vst [vmem:[%s2393_s3 + $0x1f0] sm:$0xff] %v2246_v31  ;;  %v2261_v50 = vadd.f32 %v1724_v44, %v1934_v40  ;;  %v748_v54 = vpop.f32.mrb[31].mxu1  ;;  %v1448_v5 = vmul.f32 %v992_v28, %v992_v28 }
 0x131   :  { %1054 = vst [vmem:[%s2393_s3 + $0xe0] sm:$0xff] %v990_v36  ;;  %v1375_v55 = vadd.f32 %v1374_v37, %v990_v36  ;;  %v1446_v57 = vmul.f32 %v990_v36, %v990_v36  ;;  %v1508_v59 = vadd.f32 %v1507_v35, %v1445_v27  ;;  %v991_v60 = vadd.f32 %v1934_v40, %v620_v47 }
 0x132   :  { %1086 = vst [vmem:[%s2393_s3 + $0x1e0] sm:$0xff] %v2250_v41  ;;  %1057 = vst [vmem:[%s2393_s3 + $0xf8] sm:$0xff] %v993_v46  ;;  %v2279_v62 = vadd.f32 %v1934_v40, %v748_v54  ;;  %v1449_v11 = vmul.f32 %v993_v46, %v993_v46  ;;  %v1450_v40 = vmul.f32 %v1942_v49, %v1942_v49 }
 0x133   :  { %1089 = vst [vmem:[%s2393_s3 + $0x1f8] sm:$0xff] %v2261_v50  ;;  %v1509_v63 = vadd.f32 %v1508_v59, %v1446_v57  ;;  %1055 = vst [vmem:[%s2393_s3 + $0xe8] sm:$0xff] %v991_v60  ;;  %v1376_v0 = vadd.f32 %v1375_v55, %v991_v60  ;;  %v1447_v3 = vmul.f32 %v991_v60, %v991_v60 }
 0x134   :  { %1087 = vst [vmem:[%s2393_s3 + $0x1e8] sm:$0xff] %v2279_v62  ;;  %v1453_v29 = vmul.f32 %v1953_v53, %v1953_v53  ;;  %v1455_v44 = vmul.f32 %v2015_v20, %v2015_v20 }
 0x135   :  { %v1377_v6 = vadd.f32 %v1376_v0, %v992_v28  ;;  %v1510_v7 = vadd.f32 %v1509_v63, %v1447_v3  ;;  %v1459_v63 = vmul.f32 %v2059_v51, %v2059_v51 }
 0x137   :  { %v1511_v15 = vadd.f32 %v1510_v7, %v1448_v5  ;;  %v1378_v16 = vadd.f32 %v1377_v6, %v993_v46 }
 0x139   :  { %v1379_v17 = vadd.f32 %v1378_v16, %v1942_v49  ;;  %v1512_v19 = vadd.f32 %v1511_v15, %v1449_v11  ;;  %v1454_v49 = vmul.f32 %v1986_v10, %v1986_v10  ;;  %v1463_v16 = vmul.f32 %v2103_v21, %v2103_v21 }
 0x13b   :  { %v1513_v22 = vadd.f32 %v1512_v19, %v1450_v40  ;;  %v1380_v23 = vadd.f32 %v1379_v17, %v1964_v56 }
 0x13d   :  { %v1381_v27 = vadd.f32 %v1380_v23, %v1938_v45  ;;  %v1514_v28 = vadd.f32 %v1513_v22, %v1451_v25  ;;  %v1456_v45 = vmul.f32 %v1982_v4, %v1982_v4 }
 0x13f   :  { %v1515_v33 = vadd.f32 %v1514_v28, %v1452_v26  ;;  %v1382_v35 = vadd.f32 %v1381_v27, %v1953_v53  ;;  %v1457_v53 = vmul.f32 %v1997_v14, %v1997_v14  ;;  %v1467_v27 = vmul.f32 %v2147_v58, %v2147_v58 }
 0x141   :  { %v1383_v36 = vadd.f32 %v1382_v35, %v1986_v10  ;;  %v1516_v37 = vadd.f32 %v1515_v33, %v1453_v29  ;;  %v1458_v10 = vmul.f32 %v2030_v38, %v2030_v38 }
 0x143   :  { %v1517_v39 = vadd.f32 %v1516_v37, %v1454_v49  ;;  %v1384_v56 = vadd.f32 %v1383_v36, %v2015_v20 }
 0x145   :  { %v1385_v46 = vadd.f32 %v1384_v56, %v1982_v4  ;;  %v1518_v47 = vadd.f32 %v1517_v39, %v1455_v44  ;;  %v1460_v4 = vmul.f32 %v2026_v32, %v2026_v32  ;;  %v1471_v39 = vmul.f32 %v2191_v30, %v2191_v30 }
 0x147   :  { %v1519_v54 = vadd.f32 %v1518_v47, %v1456_v45  ;;  %v1386_v55 = vadd.f32 %v1385_v46, %v1997_v14  ;;  %v1461_v14 = vmul.f32 %v2041_v43, %v2041_v43 }
 0x149   :  { %v1387_v57 = vadd.f32 %v1386_v55, %v2030_v38  ;;  %v1520_v59 = vadd.f32 %v1519_v54, %v1457_v53  ;;  %v1462_v38 = vmul.f32 %v2074_v8, %v2074_v8  ;;  %v1475_v55 = vmul.f32 %v2235_v12, %v2235_v12 }
 0x14b   :  { %v1521_v60 = vadd.f32 %v1520_v59, %v1458_v10  ;;  %v1388_v20 = vadd.f32 %v1387_v57, %v2059_v51 }
 0x14d   :  { %v1389_v0 = vadd.f32 %v1388_v20, %v2026_v32  ;;  %v1522_v3 = vadd.f32 %v1521_v60, %v1459_v63  ;;  %v1464_v32 = vmul.f32 %v2070_v1, %v2070_v1 }
 0x14f   :  { %v1523_v5 = vadd.f32 %v1522_v3, %v1460_v4  ;;  %v1390_v6 = vadd.f32 %v1389_v0, %v2041_v43  ;;  %v1465_v43 = vmul.f32 %v2085_v13, %v2085_v13  ;;  %v1479_v0 = vmul.f32 %v2279_v62, %v2279_v62 }
 0x151   :  { %v1391_v7 = vadd.f32 %v1390_v6, %v2074_v8  ;;  %v1524_v11 = vadd.f32 %v1523_v5, %v1461_v14  ;;  %v1466_v8 = vmul.f32 %v2118_v42, %v2118_v42 }
 0x153   :  { %v1525_v15 = vadd.f32 %v1524_v11, %v1462_v38  ;;  %v1392_v51 = vadd.f32 %v1391_v7, %v2103_v21 }
 0x155   :  { %v1393_v40 = vadd.f32 %v1392_v51, %v2070_v1  ;;  %v1526_v17 = vadd.f32 %v1525_v15, %v1463_v16  ;;  %v1468_v1 = vmul.f32 %v2114_v34, %v2114_v34 }
 0x157   :  { %v1527_v19 = vadd.f32 %v1526_v17, %v1464_v32  ;;  %v1394_v22 = vadd.f32 %v1393_v40, %v2085_v13  ;;  %v1469_v13 = vmul.f32 %v2129_v48, %v2129_v48 }
 0x159   :  { %v1395_v23 = vadd.f32 %v1394_v22, %v2118_v42  ;;  %v1528_v25 = vadd.f32 %v1527_v19, %v1465_v43  ;;  %v1470_v42 = vmul.f32 %v2162_v18, %v2162_v18 }
 0x15b   :  { %v1529_v26 = vadd.f32 %v1528_v25, %v1466_v8  ;;  %v1396_v21 = vadd.f32 %v1395_v23, %v2147_v58 }
 0x15d   :  { %v1397_v28 = vadd.f32 %v1396_v21, %v2114_v34  ;;  %v1530_v29 = vadd.f32 %v1529_v26, %v1467_v27  ;;  %v1472_v34 = vmul.f32 %v2158_v9, %v2158_v9 }
 0x15f   :  { %v1531_v33 = vadd.f32 %v1530_v29, %v1468_v1  ;;  %v1398_v35 = vadd.f32 %v1397_v28, %v2129_v48  ;;  %v1473_v48 = vmul.f32 %v2173_v24, %v2173_v24 }
 0x161   :  { %v1399_v49 = vadd.f32 %v1398_v35, %v2162_v18  ;;  %v1532_v36 = vadd.f32 %v1531_v33, %v1469_v13  ;;  %v1474_v18 = vmul.f32 %v2206_v61, %v2206_v61 }
 0x163   :  { %v1533_v37 = vadd.f32 %v1532_v36, %v1470_v42  ;;  %v1400_v58 = vadd.f32 %v1399_v49, %v2191_v30 }
 0x165   :  { %v1401_v56 = vadd.f32 %v1400_v58, %v2158_v9  ;;  %v1534_v44 = vadd.f32 %v1533_v37, %v1471_v39  ;;  %v1476_v9 = vmul.f32 %v2202_v52, %v2202_v52 }
 0x167   :  { %v1535_v45 = vadd.f32 %v1534_v44, %v1472_v34  ;;  %v1402_v46 = vadd.f32 %v1401_v56, %v2173_v24  ;;  %v1477_v24 = vmul.f32 %v2217_v2, %v2217_v2 }
 0x169   :  { %v1403_v47 = vadd.f32 %v1402_v46, %v2206_v61  ;;  %v1536_v53 = vadd.f32 %v1535_v45, %v1473_v48  ;;  %v1478_v61 = vmul.f32 %v2250_v41, %v2250_v41 }
 0x16b   :  { %v1537_v54 = vadd.f32 %v1536_v53, %v1474_v18  ;;  %v1404_v30 = vadd.f32 %v1403_v47, %v2235_v12 }
 0x16d   :  { %v1405_v10 = vadd.f32 %v1404_v30, %v2202_v52  ;;  %v1538_v57 = vadd.f32 %v1537_v54, %v1475_v55  ;;  %v1480_v52 = vmul.f32 %v2246_v31, %v2246_v31 }
 0x16f   :  { %v1539_v59 = vadd.f32 %v1538_v57, %v1476_v9  ;;  %v1406_v60 = vadd.f32 %v1405_v10, %v2217_v2  ;;  %v1481_v2 = vmul.f32 %v2261_v50, %v2261_v50 }
 0x171   :  { %v1407_v20 = vadd.f32 %v1406_v60, %v2250_v41  ;;  %v1540_v63 = vadd.f32 %v1539_v59, %v1477_v24 }
 0x173   :  { %v1541_v4 = vadd.f32 %v1540_v63, %v1478_v61  ;;  %v1408_v12 = vadd.f32 %v1407_v20, %v2279_v62 }
 0x175   :  { %v1409_v3 = vadd.f32 %v1408_v12, %v2246_v31  ;;  %v1542_v14 = vadd.f32 %v1541_v4, %v1479_v0 }
 0x177   :  { %v1410_v5 = vadd.f32 %v1409_v3, %v2261_v50  ;;  %v1543_v6 = vadd.f32 %v1542_v14, %v1480_v52 }
 0x179   :  { %v1411_v41 = vrot.slane %v1410_v5, 4  ;;  %v1544_v38 = vadd.f32 %v1543_v6, %v1481_v2 }
 0x17b   :  { %v1412_v7 = vadd.f32 %v1411_v41, %v1410_v5  ;;  %v1545_v11 = vrot.slane %v1544_v38, 4 }
 0x17d   :  { %v1413_v15 = vrot.slane %v1412_v7, 2  ;;  %v1546_v51 = vadd.f32 %v1545_v11, %v1544_v38 }
 0x17f   :  { %v1414_v16 = vadd.f32 %v1413_v15, %v1412_v7  ;;  %v1547_v62 = vrot.slane %v1546_v51, 2 }
 0x181   :  { %v1415_v32 = vrot.slane %v1414_v16, 1  ;;  %v1548_v40 = vadd.f32 %v1547_v62, %v1546_v51 }
 0x183   :  { %v1416_v17 = vadd.f32 %v1415_v32, %v1414_v16  ;;  %v1549_v43 = vrot.slane %v1548_v40, 1 }
 0x185   :  { %1417 = vst [vmem:[%s2394_s4] sm:$0x1] %v1416_v17  ;;  %v1550_v31 = vadd.f32 %v1549_v43, %v1548_v40 }
 0x187   :  { %1551 = vst [vmem:[%s2395_s5] sm:$0x1] %v1550_v31 }

// kernel: discriminator_forward.13
= control target key start
LH: loop header
LB: loop body
LE: loop exit
PB: predicated region body
PF: predicated region fallthrough
CT: control target
= control target key end

     0   :  { %s1030_s0 = inlined_call_operand.vmem [shape: f32[512,128], index: 0, kind: input, shape index: {}]   ;;  %s1031_s1 = inlined_call_operand.vmem [shape: f32[1,128], index: 1, kind: input, shape index: {}]   ;;  %s1032_s2 = inlined_call_operand.vmem [shape: f32[1,128], index: 2, kind: input, shape index: {}]   ;;  %s1033_s3 = inlined_call_operand.vmem [shape: f32[512,128], index: 3, kind: output, shape index: {}]  }
   0x1   :  { %v14_v0 = vld [vmem:[%s1030_s0] sm:$0xff]  ;;  %v15_v4 = vld [vmem:[%s1030_s0 + $0x8] sm:$0xff]  ;;  %v16_v5 = vld [vmem:[%s1030_s0 + $0x10] sm:$0xff] }
   0x2   :  { %v508_v1 = vld [vmem:[%s1031_s1] ss:$0 sm:$0xff]  ;;  %v17_v6 = vld [vmem:[%s1030_s0 + $0x18] sm:$0xff]  ;;  %v19_v11 = vld [vmem:[%s1030_s0 + $0x28] sm:$0xff] }
   0x3   :  { %v513_v2 = vld [vmem:[%s1032_s2] ss:$0 sm:$0xff]  ;;  %v85_v3 = vmul.f32 %v508_v1, %v14_v0  ;;  %v86_v7 = vmul.f32 %v508_v1, %v15_v4  ;;  %v87_v8 = vmul.f32 %v508_v1, %v16_v5  ;;  %v88_v9 = vmul.f32 %v508_v1, %v17_v6  ;;  %v20_v12 = vld [vmem:[%s1030_s0 + $0x30] sm:$0xff]  ;;  %v21_v17 = vld [vmem:[%s1030_s0 + $0x38] sm:$0xff] }
   0x4   :  { %v18_v10 = vld [vmem:[%s1030_s0 + $0x20] sm:$0xff]  ;;  %v90_v15 = vmul.f32 %v508_v1, %v19_v11  ;;  %v91_v16 = vmul.f32 %v508_v1, %v20_v12  ;;  %v92_v21 = vmul.f32 %v508_v1, %v21_v17  ;;  %v23_v30 = vld [vmem:[%s1030_s0 + $0x48] sm:$0xff]  ;;  %v24_v31 = vld [vmem:[%s1030_s0 + $0x50] sm:$0xff] }
   0x5   :  { %v156_v13 = vadd.f32 %v513_v2, %v85_v3  ;;  %v89_v14 = vmul.f32 %v508_v1, %v18_v10  ;;  %v157_v18 = vadd.f32 %v513_v2, %v86_v7  ;;  %v158_v19 = vadd.f32 %v513_v2, %v87_v8  ;;  %v22_v25 = vld [vmem:[%s1030_s0 + $0x40] sm:$0xff]  ;;  %v25_v43 = vld [vmem:[%s1030_s0 + $0x58] sm:$0xff]  ;;  %v27_v45 = vld [vmem:[%s1030_s0 + $0x68] sm:$0xff] }
   0x6   :  { %v159_v20 = vadd.f32 %v513_v2, %v88_v9  ;;  %v161_v24 = vadd.f32 %v513_v2, %v90_v15  ;;  %v162_v37 = vadd.f32 %v513_v2, %v91_v16  ;;  %v163_v38 = vadd.f32 %v513_v2, %v92_v21  ;;  %v26_v44 = vld [vmem:[%s1030_s0 + $0x60] sm:$0xff]  ;;  %v28_v56 = vld [vmem:[%s1030_s0 + $0x70] sm:$0xff]  ;;  %v29_v4 = vld [vmem:[%s1030_s0 + $0x78] sm:$0xff] }
   0x7   :  { %vm220_vm0 = vcmp.ge.f32.partialorder %v156_v13, 0.0  ;;  %v284_v22 = vmul.f32 0.2, %v156_v13  ;;  %v160_v23 = vadd.f32 %v513_v2, %v89_v14  ;;  %vm221_vm1 = vcmp.ge.f32.partialorder %v157_v18, 0.0  ;;  %v30_v5 = vld [vmem:[%s1030_s0 + $0x80] sm:$0xff]  ;;  %v31_v9 = vld [vmem:[%s1030_s0 + $0x88] sm:$0xff] }
   0x8   :  { %v285_v26 = vmul.f32 0.2, %v157_v18  ;;  %vm222_vm2 = vcmp.ge.f32.partialorder %v158_v19, 0.0  ;;  %v286_v27 = vmul.f32 0.2, %v158_v19  ;;  %vm223_vm3 = vcmp.ge.f32.partialorder %v159_v20, 0.0 }
   0x9   :  { %v348_v28 = vsel %vm220_vm0, %v156_v13, %v284_v22  ;;  %v287_v29 = vmul.f32 0.2, %v159_v20  ;;  %vm224_vm4 = vcmp.ge.f32.partialorder %v160_v23, 0.0  ;;  %v288_v34 = vmul.f32 0.2, %v160_v23  ;;  %v32_v10 = vld [vmem:[%s1030_s0 + $0x90] sm:$0xff] }
   0xa   :  { %412 = vst [vmem:[%s1033_s3] sm:$0xff] %v348_v28  ;;  %v349_v32 = vsel %vm221_vm1, %v157_v18, %v285_v26  ;;  %v350_v33 = vsel %vm222_vm2, %v158_v19, %v286_v27  ;;  %vm225_vm5 = vcmp.ge.f32.partialorder %v161_v24, 0.0  ;;  %v289_v36 = vmul.f32 0.2, %v161_v24  ;;  %v33_v17 = vld [vmem:[%s1030_s0 + $0x98] sm:$0xff]  ;;  %v34_v18 = vld [vmem:[%s1030_s0 + $0xa0] sm:$0xff] }
   0xb   :  { %413 = vst [vmem:[%s1033_s3 + $0x8] sm:$0xff] %v349_v32  ;;  %414 = vst [vmem:[%s1033_s3 + $0x10] sm:$0xff] %v350_v33  ;;  %v351_v35 = vsel %vm223_vm3, %v159_v20, %v287_v29  ;;  %v352_v39 = vsel %vm224_vm4, %v160_v23, %v288_v34  ;;  %v93_v40 = vmul.f32 %v508_v1, %v22_v25  ;;  %vm226_vm6 = vcmp.ge.f32.partialorder %v162_v37, 0.0  ;;  %v35_v32 = vld [vmem:[%s1030_s0 + $0xa8] sm:$0xff]  ;;  %v36_v33 = vld [vmem:[%s1030_s0 + $0xb0] sm:$0xff] }
   0xc   :  { %415 = vst [vmem:[%s1033_s3 + $0x18] sm:$0xff] %v351_v35  ;;  %v94_v41 = vmul.f32 %v508_v1, %v23_v30  ;;  %v95_v42 = vmul.f32 %v508_v1, %v24_v31  ;;  %416 = vst [vmem:[%s1033_s3 + $0x20] sm:$0xff] %v352_v39  ;;  %v353_v46 = vsel %vm225_vm5, %v161_v24, %v289_v36  ;;  %v290_v47 = vmul.f32 0.2, %v162_v37 }
   0xd   :  { %vm227_vm7 = vcmp.ge.f32.partialorder %v163_v38, 0.0  ;;  %417 = vst [vmem:[%s1033_s3 + $0x28] sm:$0xff] %v353_v46  ;;  %v291_v48 = vmul.f32 0.2, %v163_v38  ;;  %v164_v49 = vadd.f32 %v513_v2, %v93_v40  ;;  %v96_v53 = vmul.f32 %v508_v1, %v25_v43  ;;  %v37_v40 = vld [vmem:[%s1030_s0 + $0xb8] sm:$0xff]  ;;  %v39_v46 = vld [vmem:[%s1030_s0 + $0xc8] sm:$0xff] }
   0xe   :  { %v165_v50 = vadd.f32 %v513_v2, %v94_v41  ;;  %v166_v51 = vadd.f32 %v513_v2, %v95_v42  ;;  %v354_v52 = vsel %vm226_vm6, %v162_v37, %v290_v47  ;;  %v97_v54 = vmul.f32 %v508_v1, %v26_v44  ;;  %v40_v47 = vld [vmem:[%s1030_s0 + $0xd0] sm:$0xff] }
   0xf   :  { %v98_v55 = vmul.f32 %v508_v1, %v27_v45  ;;  %418 = vst [vmem:[%s1033_s3 + $0x30] sm:$0xff] %v354_v52  ;;  %v355_v57 = vsel %vm227_vm7, %v163_v38, %v291_v48  ;;  %vm228_vm8 = vcmp.ge.f32.partialorder %v164_v49, 0.0  ;;  %v292_v58 = vmul.f32 0.2, %v164_v49  ;;  %v38_v45 = vld [vmem:[%s1030_s0 + $0xc0] sm:$0xff] }
  0x10   :  { %vm229_vm9 = vcmp.ge.f32.partialorder %v165_v50, 0.0  ;;  %419 = vst [vmem:[%s1033_s3 + $0x38] sm:$0xff] %v355_v57  ;;  %v293_v59 = vmul.f32 0.2, %v165_v50  ;;  %vm230_vm10 = vcmp.ge.f32.partialorder %v166_v51, 0.0  ;;  %v167_v61 = vadd.f32 %v513_v2, %v96_v53 }
  0x11   :  { %v294_v60 = vmul.f32 0.2, %v166_v51  ;;  %v356_v62 = vsel %vm228_vm8, %v164_v49, %v292_v58  ;;  %v168_v63 = vadd.f32 %v513_v2, %v97_v54  ;;  %v169_v0 = vadd.f32 %v513_v2, %v98_v55  ;;  %v41_v58 = vld [vmem:[%s1030_s0 + $0xd8] sm:$0xff] }
  0x12   :  { %v99_v3 = vmul.f32 %v508_v1, %v28_v56  ;;  %420 = vst [vmem:[%s1033_s3 + $0x40] sm:$0xff] %v356_v62  ;;  %v357_v6 = vsel %vm229_vm9, %v165_v50, %v293_v59  ;;  %vm231_vm11 = vcmp.ge.f32.partialorder %v167_v61, 0.0  ;;  %v295_v8 = vmul.f32 0.2, %v167_v61  ;;  %v42_v59 = vld [vmem:[%s1030_s0 + $0xe0] sm:$0xff] }
  0x13   :  { %v358_v7 = vsel %vm230_vm10, %v166_v51, %v294_v60  ;;  %421 = vst [vmem:[%s1033_s3 + $0x48] sm:$0xff] %v357_v6  ;;  %vm232_vm12 = vcmp.ge.f32.partialorder %v168_v63, 0.0  ;;  %v296_v11 = vmul.f32 0.2, %v168_v63  ;;  %vm233_vm13 = vcmp.ge.f32.partialorder %v169_v0, 0.0 }
  0x14   :  { %422 = vst [vmem:[%s1033_s3 + $0x50] sm:$0xff] %v358_v7  ;;  %v297_v12 = vmul.f32 0.2, %v169_v0  ;;  %v359_v13 = vsel %vm231_vm11, %v167_v61, %v295_v8  ;;  %v170_v14 = vadd.f32 %v513_v2, %v99_v3  ;;  %v100_v15 = vmul.f32 %v508_v1, %v29_v4 }
  0x15   :  { %v101_v16 = vmul.f32 %v508_v1, %v30_v5  ;;  %423 = vst [vmem:[%s1033_s3 + $0x58] sm:$0xff] %v359_v13  ;;  %v360_v19 = vsel %vm232_vm12, %v168_v63, %v296_v11  ;;  %v102_v21 = vmul.f32 %v508_v1, %v31_v9  ;;  %v103_v22 = vmul.f32 %v508_v1, %v32_v10  ;;  %v43_v10 = vld [vmem:[%s1030_s0 + $0xe8] sm:$0xff]  ;;  %v44_v11 = vld [vmem:[%s1030_s0 + $0xf0] sm:$0xff] }
  0x16   :  { %v361_v20 = vsel %vm233_vm13, %v169_v0, %v297_v12  ;;  %424 = vst [vmem:[%s1033_s3 + $0x60] sm:$0xff] %v360_v19  ;;  %vm234_vm14 = vcmp.ge.f32.partialorder %v170_v14, 0.0  ;;  %v298_v23 = vmul.f32 0.2, %v170_v14  ;;  %v171_v24 = vadd.f32 %v513_v2, %v100_v15 }
  0x17   :  { %425 = vst [vmem:[%s1033_s3 + $0x68] sm:$0xff] %v361_v20  ;;  %v172_v25 = vadd.f32 %v513_v2, %v101_v16  ;;  %v173_v26 = vadd.f32 %v513_v2, %v102_v21  ;;  %v174_v27 = vadd.f32 %v513_v2, %v103_v22  ;;  %v104_v28 = vmul.f32 %v508_v1, %v33_v17 }
  0x18   :  { %v105_v29 = vmul.f32 %v508_v1, %v34_v18  ;;  %v362_v30 = vsel %vm234_vm14, %v170_v14, %v298_v23  ;;  %vm235_vm15 = vcmp.ge.f32.partialorder %v171_v24, 0.0  ;;  %v299_v31 = vmul.f32 0.2, %v171_v24  ;;  %v45_v18 = vld [vmem:[%s1030_s0 + $0xf8] sm:$0xff]  ;;  %v46_v23 = vld [vmem:[%s1030_s0 + $0x100] sm:$0xff] }
  0x19   :  { %vm236_vm0 = vcmp.ge.f32.partialorder %v172_v25, 0.0  ;;  %426 = vst [vmem:[%s1033_s3 + $0x70] sm:$0xff] %v362_v30  ;;  %v300_v34 = vmul.f32 0.2, %v172_v25  ;;  %vm237_vm1 = vcmp.ge.f32.partialorder %v173_v26, 0.0  ;;  %vm238_vm2 = vcmp.ge.f32.partialorder %v174_v27, 0.0 }
  0x1a   :  { %v301_v35 = vmul.f32 0.2, %v173_v26  ;;  %v363_v36 = vsel %vm235_vm15, %v171_v24, %v299_v31  ;;  %v302_v37 = vmul.f32 0.2, %v174_v27  ;;  %v175_v38 = vadd.f32 %v513_v2, %v104_v28  ;;  %v47_v24 = vld [vmem:[%s1030_s0 + $0x108] sm:$0xff] }
  0x1b   :  { %v176_v39 = vadd.f32 %v513_v2, %v105_v29  ;;  %427 = vst [vmem:[%s1033_s3 + $0x78] sm:$0xff] %v363_v36  ;;  %v364_v41 = vsel %vm236_vm0, %v172_v25, %v300_v34  ;;  %v106_v43 = vmul.f32 %v508_v1, %v35_v32  ;;  %v107_v44 = vmul.f32 %v508_v1, %v36_v33  ;;  %v48_v25 = vld [vmem:[%s1030_s0 + $0x110] sm:$0xff]  ;;  %v49_v36 = vld [vmem:[%s1030_s0 + $0x118] sm:$0xff] }
  0x1c   :  { %v365_v42 = vsel %vm237_vm1, %v173_v26, %v301_v35  ;;  %428 = vst [vmem:[%s1033_s3 + $0x80] sm:$0xff] %v364_v41  ;;  %v366_v48 = vsel %vm238_vm2, %v174_v27, %v302_v37  ;;  %vm239_vm3 = vcmp.ge.f32.partialorder %v175_v38, 0.0  ;;  %v303_v49 = vmul.f32 0.2, %v175_v38  ;;  %v50_v37 = vld [vmem:[%s1030_s0 + $0x120] sm:$0xff] }
  0x1d   :  { %429 = vst [vmem:[%s1033_s3 + $0x88] sm:$0xff] %v365_v42  ;;  %vm240_vm4 = vcmp.ge.f32.partialorder %v176_v39, 0.0  ;;  %430 = vst [vmem:[%s1033_s3 + $0x90] sm:$0xff] %v366_v48  ;;  %v304_v50 = vmul.f32 0.2, %v176_v39  ;;  %v177_v51 = vadd.f32 %v513_v2, %v106_v43  ;;  %v178_v52 = vadd.f32 %v513_v2, %v107_v44 }
  0x1e   :  { %v108_v53 = vmul.f32 %v508_v1, %v37_v40  ;;  %v367_v54 = vsel %vm239_vm3, %v175_v38, %v303_v49  ;;  %v109_v55 = vmul.f32 %v508_v1, %v38_v45  ;;  %v110_v56 = vmul.f32 %v508_v1, %v39_v46 }
  0x1f   :  { %v111_v57 = vmul.f32 %v508_v1, %v40_v47  ;;  %431 = vst [vmem:[%s1033_s3 + $0x98] sm:$0xff] %v367_v54  ;;  %v368_v60 = vsel %vm240_vm4, %v176_v39, %v304_v50  ;;  %vm241_vm5 = vcmp.ge.f32.partialorder %v177_v51, 0.0  ;;  %v305_v61 = vmul.f32 0.2, %v177_v51  ;;  %v51_v50 = vld [vmem:[%s1030_s0 + $0x128] sm:$0xff] }
  0x20   :  { %vm242_vm6 = vcmp.ge.f32.partialorder %v178_v52, 0.0  ;;  %432 = vst [vmem:[%s1033_s3 + $0xa0] sm:$0xff] %v368_v60  ;;  %v306_v62 = vmul.f32 0.2, %v178_v52  ;;  %v179_v63 = vadd.f32 %v513_v2, %v108_v53  ;;  %v180_v0 = vadd.f32 %v513_v2, %v109_v55 }
  0x21   :  { %v181_v3 = vadd.f32 %v513_v2, %v110_v56  ;;  %v369_v4 = vsel %vm241_vm5, %v177_v51, %v305_v61  ;;  %v182_v5 = vadd.f32 %v513_v2, %v111_v57  ;;  %v112_v6 = vmul.f32 %v508_v1, %v41_v58  ;;  %v52_v51 = vld [vmem:[%s1030_s0 + $0x130] sm:$0xff]  ;;  %v53_v58 = vld [vmem:[%s1030_s0 + $0x138] sm:$0xff] }
  0x22   :  { %v113_v7 = vmul.f32 %v508_v1, %v42_v59  ;;  %433 = vst [vmem:[%s1033_s3 + $0xa8] sm:$0xff] %v369_v4  ;;  %v370_v8 = vsel %vm242_vm6, %v178_v52, %v306_v62  ;;  %vm243_vm7 = vcmp.ge.f32.partialorder %v179_v63, 0.0  ;;  %v307_v9 = vmul.f32 0.2, %v179_v63 }
  0x23   :  { %vm244_vm8 = vcmp.ge.f32.partialorder %v180_v0, 0.0  ;;  %434 = vst [vmem:[%s1033_s3 + $0xb0] sm:$0xff] %v370_v8  ;;  %v308_v12 = vmul.f32 0.2, %v180_v0  ;;  %vm245_vm9 = vcmp.ge.f32.partialorder %v181_v3, 0.0  ;;  %vm246_vm10 = vcmp.ge.f32.partialorder %v182_v5, 0.0 }
  0x24   :  { %v309_v13 = vmul.f32 0.2, %v181_v3  ;;  %v371_v14 = vsel %vm243_vm7, %v179_v63, %v307_v9  ;;  %v310_v15 = vmul.f32 0.2, %v182_v5  ;;  %v183_v16 = vadd.f32 %v513_v2, %v112_v6  ;;  %v54_v63 = vld [vmem:[%s1030_s0 + $0x140] sm:$0xff] }
  0x25   :  { %v184_v17 = vadd.f32 %v513_v2, %v113_v7  ;;  %435 = vst [vmem:[%s1033_s3 + $0xb8] sm:$0xff] %v371_v14  ;;  %v372_v19 = vsel %vm244_vm8, %v180_v0, %v308_v12  ;;  %v114_v21 = vmul.f32 %v508_v1, %v43_v10  ;;  %v115_v22 = vmul.f32 %v508_v1, %v44_v11  ;;  %v55_v0 = vld [vmem:[%s1030_s0 + $0x148] sm:$0xff]  ;;  %v57_v14 = vld [vmem:[%s1030_s0 + $0x158] sm:$0xff] }
  0x26   :  { %v373_v20 = vsel %vm245_vm9, %v181_v3, %v309_v13  ;;  %436 = vst [vmem:[%s1033_s3 + $0xc0] sm:$0xff] %v372_v19  ;;  %v374_v26 = vsel %vm246_vm10, %v182_v5, %v310_v15  ;;  %vm247_vm11 = vcmp.ge.f32.partialorder %v183_v16, 0.0  ;;  %v311_v27 = vmul.f32 0.2, %v183_v16  ;;  %v56_v3 = vld [vmem:[%s1030_s0 + $0x150] sm:$0xff]  ;;  %v58_v15 = vld [vmem:[%s1030_s0 + $0x160] sm:$0xff] }
  0x27   :  { %437 = vst [vmem:[%s1033_s3 + $0xc8] sm:$0xff] %v373_v20  ;;  %vm248_vm12 = vcmp.ge.f32.partialorder %v184_v17, 0.0  ;;  %438 = vst [vmem:[%s1033_s3 + $0xd0] sm:$0xff] %v374_v26  ;;  %v312_v28 = vmul.f32 0.2, %v184_v17  ;;  %v185_v29 = vadd.f32 %v513_v2, %v114_v21  ;;  %v186_v30 = vadd.f32 %v513_v2, %v115_v22 }
  0x28   :  { %v116_v31 = vmul.f32 %v508_v1, %v45_v18  ;;  %v375_v32 = vsel %vm247_vm11, %v183_v16, %v311_v27  ;;  %v117_v33 = vmul.f32 %v508_v1, %v46_v23  ;;  %v118_v34 = vmul.f32 %v508_v1, %v47_v24 }
  0x29   :  { %v119_v35 = vmul.f32 %v508_v1, %v48_v25  ;;  %439 = vst [vmem:[%s1033_s3 + $0xd8] sm:$0xff] %v375_v32  ;;  %v376_v38 = vsel %vm248_vm12, %v184_v17, %v312_v28  ;;  %vm249_vm13 = vcmp.ge.f32.partialorder %v185_v29, 0.0  ;;  %v313_v39 = vmul.f32 0.2, %v185_v29  ;;  %v59_v28 = vld [vmem:[%s1030_s0 + $0x168] sm:$0xff] }
  0x2a   :  { %vm250_vm14 = vcmp.ge.f32.partialorder %v186_v30, 0.0  ;;  %440 = vst [vmem:[%s1033_s3 + $0xe0] sm:$0xff] %v376_v38  ;;  %v314_v40 = vmul.f32 0.2, %v186_v30  ;;  %v187_v41 = vadd.f32 %v513_v2, %v116_v31  ;;  %v188_v42 = vadd.f32 %v513_v2, %v117_v33 }
  0x2b   :  { %v189_v43 = vadd.f32 %v513_v2, %v118_v34  ;;  %v377_v44 = vsel %vm249_vm13, %v185_v29, %v313_v39  ;;  %v190_v45 = vadd.f32 %v513_v2, %v119_v35  ;;  %v120_v46 = vmul.f32 %v508_v1, %v49_v36  ;;  %v60_v29 = vld [vmem:[%s1030_s0 + $0x170] sm:$0xff]  ;;  %v61_v36 = vld [vmem:[%s1030_s0 + $0x178] sm:$0xff] }
  0x2c   :  { %v121_v47 = vmul.f32 %v508_v1, %v50_v37  ;;  %441 = vst [vmem:[%s1033_s3 + $0xe8] sm:$0xff] %v377_v44  ;;  %v378_v48 = vsel %vm250_vm14, %v186_v30, %v314_v40  ;;  %vm251_vm15 = vcmp.ge.f32.partialorder %v187_v41, 0.0  ;;  %v315_v49 = vmul.f32 0.2, %v187_v41 }
  0x2d   :  { %vm252_vm0 = vcmp.ge.f32.partialorder %v188_v42, 0.0  ;;  %442 = vst [vmem:[%s1033_s3 + $0xf0] sm:$0xff] %v378_v48  ;;  %v316_v52 = vmul.f32 0.2, %v188_v42  ;;  %vm253_vm1 = vcmp.ge.f32.partialorder %v189_v43, 0.0  ;;  %vm254_vm2 = vcmp.ge.f32.partialorder %v190_v45, 0.0 }
  0x2e   :  { %v317_v53 = vmul.f32 0.2, %v189_v43  ;;  %v379_v54 = vsel %vm251_vm15, %v187_v41, %v315_v49  ;;  %v318_v55 = vmul.f32 0.2, %v190_v45  ;;  %v191_v56 = vadd.f32 %v513_v2, %v120_v46  ;;  %v62_v41 = vld [vmem:[%s1030_s0 + $0x180] sm:$0xff] }
  0x2f   :  { %v192_v57 = vadd.f32 %v513_v2, %v121_v47  ;;  %443 = vst [vmem:[%s1033_s3 + $0xf8] sm:$0xff] %v379_v54  ;;  %v380_v59 = vsel %vm252_vm0, %v188_v42, %v316_v52  ;;  %v122_v61 = vmul.f32 %v508_v1, %v51_v50  ;;  %v123_v62 = vmul.f32 %v508_v1, %v52_v51  ;;  %v63_v42 = vld [vmem:[%s1030_s0 + $0x188] sm:$0xff]  ;;  %v65_v54 = vld [vmem:[%s1030_s0 + $0x198] sm:$0xff] }
  0x30   :  { %v381_v60 = vsel %vm253_vm1, %v189_v43, %v317_v53  ;;  %444 = vst [vmem:[%s1033_s3 + $0x100] sm:$0xff] %v380_v59  ;;  %v382_v4 = vsel %vm254_vm2, %v190_v45, %v318_v55  ;;  %vm255_vm3 = vcmp.ge.f32.partialorder %v191_v56, 0.0  ;;  %v319_v5 = vmul.f32 0.2, %v191_v56  ;;  %v64_v43 = vld [vmem:[%s1030_s0 + $0x190] sm:$0xff]  ;;  %v66_v55 = vld [vmem:[%s1030_s0 + $0x1a0] sm:$0xff] }
  0x31   :  { %445 = vst [vmem:[%s1033_s3 + $0x108] sm:$0xff] %v381_v60  ;;  %vm256_vm4 = vcmp.ge.f32.partialorder %v192_v57, 0.0  ;;  %446 = vst [vmem:[%s1033_s3 + $0x110] sm:$0xff] %v382_v4  ;;  %v320_v6 = vmul.f32 0.2, %v192_v57  ;;  %v193_v7 = vadd.f32 %v513_v2, %v122_v61  ;;  %v194_v8 = vadd.f32 %v513_v2, %v123_v62 }
  0x32   :  { %v124_v9 = vmul.f32 %v508_v1, %v53_v58  ;;  %v383_v10 = vsel %vm255_vm3, %v191_v56, %v319_v5  ;;  %v125_v11 = vmul.f32 %v508_v1, %v54_v63  ;;  %v126_v12 = vmul.f32 %v508_v1, %v55_v0 }
  0x33   :  { %v127_v13 = vmul.f32 %v508_v1, %v56_v3  ;;  %447 = vst [vmem:[%s1033_s3 + $0x118] sm:$0xff] %v383_v10  ;;  %v384_v16 = vsel %vm256_vm4, %v192_v57, %v320_v6  ;;  %vm257_vm5 = vcmp.ge.f32.partialorder %v193_v7, 0.0  ;;  %v321_v17 = vmul.f32 0.2, %v193_v7  ;;  %v67_v6 = vld [vmem:[%s1030_s0 + $0x1a8] sm:$0xff] }
  0x34   :  { %vm258_vm6 = vcmp.ge.f32.partialorder %v194_v8, 0.0  ;;  %448 = vst [vmem:[%s1033_s3 + $0x120] sm:$0xff] %v384_v16  ;;  %v322_v18 = vmul.f32 0.2, %v194_v8  ;;  %v195_v19 = vadd.f32 %v513_v2, %v124_v9  ;;  %v196_v20 = vadd.f32 %v513_v2, %v125_v11 }
  0x35   :  { %v197_v21 = vadd.f32 %v513_v2, %v126_v12  ;;  %v385_v22 = vsel %vm257_vm5, %v193_v7, %v321_v17  ;;  %v198_v23 = vadd.f32 %v513_v2, %v127_v13  ;;  %v128_v24 = vmul.f32 %v508_v1, %v57_v14  ;;  %v68_v7 = vld [vmem:[%s1030_s0 + $0x1b0] sm:$0xff]  ;;  %v69_v14 = vld [vmem:[%s1030_s0 + $0x1b8] sm:$0xff] }
  0x36   :  { %v129_v25 = vmul.f32 %v508_v1, %v58_v15  ;;  %449 = vst [vmem:[%s1033_s3 + $0x128] sm:$0xff] %v385_v22  ;;  %v386_v26 = vsel %vm258_vm6, %v194_v8, %v322_v18  ;;  %vm259_vm7 = vcmp.ge.f32.partialorder %v195_v19, 0.0  ;;  %v323_v27 = vmul.f32 0.2, %v195_v19 }
  0x37   :  { %vm260_vm8 = vcmp.ge.f32.partialorder %v196_v20, 0.0  ;;  %450 = vst [vmem:[%s1033_s3 + $0x130] sm:$0xff] %v386_v26  ;;  %v324_v30 = vmul.f32 0.2, %v196_v20  ;;  %vm261_vm9 = vcmp.ge.f32.partialorder %v197_v21, 0.0  ;;  %vm262_vm10 = vcmp.ge.f32.partialorder %v198_v23, 0.0 }
  0x38   :  { %v325_v31 = vmul.f32 0.2, %v197_v21  ;;  %v387_v32 = vsel %vm259_vm7, %v195_v19, %v323_v27  ;;  %v326_v33 = vmul.f32 0.2, %v198_v23  ;;  %v199_v34 = vadd.f32 %v513_v2, %v128_v24  ;;  %v70_v19 = vld [vmem:[%s1030_s0 + $0x1c0] sm:$0xff] }
  0x39   :  { %v200_v35 = vadd.f32 %v513_v2, %v129_v25  ;;  %451 = vst [vmem:[%s1033_s3 + $0x138] sm:$0xff] %v387_v32  ;;  %v388_v37 = vsel %vm260_vm8, %v196_v20, %v324_v30  ;;  %v130_v39 = vmul.f32 %v508_v1, %v59_v28  ;;  %v131_v40 = vmul.f32 %v508_v1, %v60_v29  ;;  %v71_v20 = vld [vmem:[%s1030_s0 + $0x1c8] sm:$0xff]  ;;  %v73_v32 = vld [vmem:[%s1030_s0 + $0x1d8] sm:$0xff] }
  0x3a   :  { %v389_v38 = vsel %vm261_vm9, %v197_v21, %v325_v31  ;;  %452 = vst [vmem:[%s1033_s3 + $0x140] sm:$0xff] %v388_v37  ;;  %v390_v44 = vsel %vm262_vm10, %v198_v23, %v326_v33  ;;  %vm263_vm11 = vcmp.ge.f32.partialorder %v199_v34, 0.0  ;;  %v327_v45 = vmul.f32 0.2, %v199_v34  ;;  %v72_v21 = vld [vmem:[%s1030_s0 + $0x1d0] sm:$0xff]  ;;  %v74_v33 = vld [vmem:[%s1030_s0 + $0x1e0] sm:$0xff] }
  0x3b   :  { %453 = vst [vmem:[%s1033_s3 + $0x148] sm:$0xff] %v389_v38  ;;  %vm264_vm12 = vcmp.ge.f32.partialorder %v200_v35, 0.0  ;;  %454 = vst [vmem:[%s1033_s3 + $0x150] sm:$0xff] %v390_v44  ;;  %v328_v46 = vmul.f32 0.2, %v200_v35  ;;  %v201_v47 = vadd.f32 %v513_v2, %v130_v39  ;;  %v202_v48 = vadd.f32 %v513_v2, %v131_v40 }
  0x3c   :  { %v132_v49 = vmul.f32 %v508_v1, %v61_v36  ;;  %v391_v50 = vsel %vm263_vm11, %v199_v34, %v327_v45  ;;  %v133_v51 = vmul.f32 %v508_v1, %v62_v41  ;;  %v134_v52 = vmul.f32 %v508_v1, %v63_v42 }
  0x3d   :  { %v135_v53 = vmul.f32 %v508_v1, %v64_v43  ;;  %455 = vst [vmem:[%s1033_s3 + $0x158] sm:$0xff] %v391_v50  ;;  %v392_v56 = vsel %vm264_vm12, %v200_v35, %v328_v46  ;;  %vm265_vm13 = vcmp.ge.f32.partialorder %v201_v47, 0.0  ;;  %v329_v57 = vmul.f32 0.2, %v201_v47  ;;  %v75_v46 = vld [vmem:[%s1030_s0 + $0x1e8] sm:$0xff] }
  0x3e   :  { %vm266_vm14 = vcmp.ge.f32.partialorder %v202_v48, 0.0  ;;  %456 = vst [vmem:[%s1033_s3 + $0x160] sm:$0xff] %v392_v56  ;;  %v330_v58 = vmul.f32 0.2, %v202_v48  ;;  %v203_v59 = vadd.f32 %v513_v2, %v132_v49  ;;  %v204_v60 = vadd.f32 %v513_v2, %v133_v51 }
  0x3f   :  { %v205_v61 = vadd.f32 %v513_v2, %v134_v52  ;;  %v393_v62 = vsel %vm265_vm13, %v201_v47, %v329_v57  ;;  %v206_v63 = vadd.f32 %v513_v2, %v135_v53  ;;  %v136_v0 = vmul.f32 %v508_v1, %v65_v54  ;;  %v76_v47 = vld [vmem:[%s1030_s0 + $0x1f0] sm:$0xff]  ;;  %v77_v54 = vld [vmem:[%s1030_s0 + $0x1f8] sm:$0xff] }
  0x40   :  { %v137_v3 = vmul.f32 %v508_v1, %v66_v55  ;;  %457 = vst [vmem:[%s1033_s3 + $0x168] sm:$0xff] %v393_v62  ;;  %v394_v4 = vsel %vm266_vm14, %v202_v48, %v330_v58  ;;  %vm267_vm15 = vcmp.ge.f32.partialorder %v203_v59, 0.0  ;;  %v331_v5 = vmul.f32 0.2, %v203_v59 }
  0x41   :  { %vm268_vm0 = vcmp.ge.f32.partialorder %v204_v60, 0.0  ;;  %458 = vst [vmem:[%s1033_s3 + $0x170] sm:$0xff] %v394_v4  ;;  %v332_v8 = vmul.f32 0.2, %v204_v60  ;;  %vm269_vm1 = vcmp.ge.f32.partialorder %v205_v61, 0.0  ;;  %vm270_vm2 = vcmp.ge.f32.partialorder %v206_v63, 0.0 }
  0x42   :  { %v333_v9 = vmul.f32 0.2, %v205_v61  ;;  %v395_v10 = vsel %vm267_vm15, %v203_v59, %v331_v5  ;;  %v334_v11 = vmul.f32 0.2, %v206_v63  ;;  %v207_v12 = vadd.f32 %v513_v2, %v136_v0 }
  0x43   :  { %v208_v13 = vadd.f32 %v513_v2, %v137_v3  ;;  %459 = vst [vmem:[%s1033_s3 + $0x178] sm:$0xff] %v395_v10  ;;  %v396_v15 = vsel %vm268_vm0, %v204_v60, %v332_v8  ;;  %v138_v17 = vmul.f32 %v508_v1, %v67_v6  ;;  %v139_v18 = vmul.f32 %v508_v1, %v68_v7 }
  0x44   :  { %v397_v16 = vsel %vm269_vm1, %v205_v61, %v333_v9  ;;  %460 = vst [vmem:[%s1033_s3 + $0x180] sm:$0xff] %v396_v15  ;;  %v398_v22 = vsel %vm270_vm2, %v206_v63, %v334_v11  ;;  %vm271_vm3 = vcmp.ge.f32.partialorder %v207_v12, 0.0  ;;  %v335_v23 = vmul.f32 0.2, %v207_v12 }
  0x45   :  { %461 = vst [vmem:[%s1033_s3 + $0x188] sm:$0xff] %v397_v16  ;;  %vm272_vm4 = vcmp.ge.f32.partialorder %v208_v13, 0.0  ;;  %462 = vst [vmem:[%s1033_s3 + $0x190] sm:$0xff] %v398_v22  ;;  %v336_v24 = vmul.f32 0.2, %v208_v13  ;;  %v209_v25 = vadd.f32 %v513_v2, %v138_v17  ;;  %v210_v26 = vadd.f32 %v513_v2, %v139_v18 }
  0x46   :  { %v140_v27 = vmul.f32 %v508_v1, %v69_v14  ;;  %v399_v28 = vsel %vm271_vm3, %v207_v12, %v335_v23  ;;  %v141_v29 = vmul.f32 %v508_v1, %v70_v19  ;;  %v142_v30 = vmul.f32 %v508_v1, %v71_v20 }
  0x47   :  { %v143_v31 = vmul.f32 %v508_v1, %v72_v21  ;;  %463 = vst [vmem:[%s1033_s3 + $0x198] sm:$0xff] %v399_v28  ;;  %v400_v34 = vsel %vm272_vm4, %v208_v13, %v336_v24  ;;  %vm273_vm5 = vcmp.ge.f32.partialorder %v209_v25, 0.0  ;;  %v337_v35 = vmul.f32 0.2, %v209_v25 }
  0x48   :  { %vm274_vm6 = vcmp.ge.f32.partialorder %v210_v26, 0.0  ;;  %464 = vst [vmem:[%s1033_s3 + $0x1a0] sm:$0xff] %v400_v34  ;;  %v338_v36 = vmul.f32 0.2, %v210_v26  ;;  %v211_v37 = vadd.f32 %v513_v2, %v140_v27  ;;  %v212_v38 = vadd.f32 %v513_v2, %v141_v29 }
  0x49   :  { %v213_v39 = vadd.f32 %v513_v2, %v142_v30  ;;  %v401_v40 = vsel %vm273_vm5, %v209_v25, %v337_v35  ;;  %v214_v41 = vadd.f32 %v513_v2, %v143_v31  ;;  %v144_v42 = vmul.f32 %v508_v1, %v73_v32 }
  0x4a   :  { %v145_v43 = vmul.f32 %v508_v1, %v74_v33  ;;  %465 = vst [vmem:[%s1033_s3 + $0x1a8] sm:$0xff] %v401_v40  ;;  %v402_v44 = vsel %vm274_vm6, %v210_v26, %v338_v36  ;;  %vm275_vm7 = vcmp.ge.f32.partialorder %v211_v37, 0.0  ;;  %v339_v45 = vmul.f32 0.2, %v211_v37 }
  0x4b   :  { %vm276_vm8 = vcmp.ge.f32.partialorder %v212_v38, 0.0  ;;  %466 = vst [vmem:[%s1033_s3 + $0x1b0] sm:$0xff] %v402_v44  ;;  %v340_v48 = vmul.f32 0.2, %v212_v38  ;;  %vm277_vm9 = vcmp.ge.f32.partialorder %v213_v39, 0.0  ;;  %vm278_vm10 = vcmp.ge.f32.partialorder %v214_v41, 0.0 }
  0x4c   :  { %v341_v49 = vmul.f32 0.2, %v213_v39  ;;  %v403_v50 = vsel %vm275_vm7, %v211_v37, %v339_v45  ;;  %v342_v51 = vmul.f32 0.2, %v214_v41  ;;  %v215_v52 = vadd.f32 %v513_v2, %v144_v42 }
  0x4d   :  { %v216_v53 = vadd.f32 %v513_v2, %v145_v43  ;;  %467 = vst [vmem:[%s1033_s3 + $0x1b8] sm:$0xff] %v403_v50  ;;  %v404_v55 = vsel %vm276_vm8, %v212_v38, %v340_v48  ;;  %v146_v57 = vmul.f32 %v508_v1, %v75_v46  ;;  %v147_v58 = vmul.f32 %v508_v1, %v76_v47 }
  0x4e   :  { %v405_v56 = vsel %vm277_vm9, %v213_v39, %v341_v49  ;;  %468 = vst [vmem:[%s1033_s3 + $0x1c0] sm:$0xff] %v404_v55  ;;  %v406_v59 = vsel %vm278_vm10, %v214_v41, %v342_v51  ;;  %vm279_vm11 = vcmp.ge.f32.partialorder %v215_v52, 0.0  ;;  %v343_v60 = vmul.f32 0.2, %v215_v52 }
  0x4f   :  { %469 = vst [vmem:[%s1033_s3 + $0x1c8] sm:$0xff] %v405_v56  ;;  %vm280_vm12 = vcmp.ge.f32.partialorder %v216_v53, 0.0  ;;  %470 = vst [vmem:[%s1033_s3 + $0x1d0] sm:$0xff] %v406_v59  ;;  %v344_v61 = vmul.f32 0.2, %v216_v53  ;;  %v217_v62 = vadd.f32 %v513_v2, %v146_v57  ;;  %v218_v63 = vadd.f32 %v513_v2, %v147_v58 }
  0x50   :  { %v148_v0 = vmul.f32 %v508_v1, %v77_v54  ;;  %v407_v3 = vsel %vm279_vm11, %v215_v52, %v343_v60 }
  0x51   :  { %471 = vst [vmem:[%s1033_s3 + $0x1d8] sm:$0xff] %v407_v3  ;;  %v408_v4 = vsel %vm280_vm12, %v216_v53, %v344_v61  ;;  %vm281_vm13 = vcmp.ge.f32.partialorder %v217_v62, 0.0  ;;  %v345_v5 = vmul.f32 0.2, %v217_v62  ;;  %vm282_vm14 = vcmp.ge.f32.partialorder %v218_v63, 0.0 }
  0x52   :  { %472 = vst [vmem:[%s1033_s3 + $0x1e0] sm:$0xff] %v408_v4  ;;  %v346_v6 = vmul.f32 0.2, %v218_v63  ;;  %v219_v7 = vadd.f32 %v513_v2, %v148_v0 }
  0x53   :  { %v409_v8 = vsel %vm281_vm13, %v217_v62, %v345_v5 }
  0x54   :  { %473 = vst [vmem:[%s1033_s3 + $0x1e8] sm:$0xff] %v409_v8  ;;  %v410_v1 = vsel %vm282_vm14, %v218_v63, %v346_v6  ;;  %vm283_vm15 = vcmp.ge.f32.partialorder %v219_v7, 0.0  ;;  %v347_v9 = vmul.f32 0.2, %v219_v7 }
  0x55   :  { %474 = vst [vmem:[%s1033_s3 + $0x1f0] sm:$0xff] %v410_v1 }
  0x56   :  { %v411_v10 = vsel %vm283_vm15, %v219_v7, %v347_v9 }
  0x57   :  { %475 = vst [vmem:[%s1033_s3 + $0x1f8] sm:$0xff] %v411_v10 }

// kernel: discriminator_forward.14
= control target key start
LH: loop header
LB: loop body
LE: loop exit
PB: predicated region body
PF: predicated region fallthrough
CT: control target
= control target key end

     0   :  { %s982_s1 = inlined_call_operand.vmem [shape: bf16[256,128], index: 1, kind: input, shape index: {}]   ;;  %s983_s0 = inlined_call_operand.vmem [shape: bf16[128,256], index: 0, kind: input, shape index: {}]   ;;  %s984_s2 = inlined_call_operand.vmem [shape: f32[1,128], index: 2, kind: input, shape index: {}]   ;;  %s985_s3 = inlined_call_operand.vmem [shape: f32[128,128], index: 3, kind: output, shape index: {0}]   ;;  %s986_s4 = inlined_call_operand.vmem [shape: f32[1,1,128], index: 4, kind: output, shape index: {1}]   ;;  %s987_s5 = inlined_call_operand.vmem [shape: f32[1,1,128], index: 5, kind: output, shape index: {2}]  }
   0x1   :  { %v717_v0 = vld [vmem:[%s982_s1 + $0x40] sm:$0xff]   ;;  %v719_v2 = vld [vmem:[%s982_s1 + $0x48] sm:$0xff]   ;;  %v721_v4 = vld [vmem:[%s982_s1 + $0x50] sm:$0xff]  }
   0x2   :  { %v718_v1 = vld [vmem:[%s982_s1] sm:$0xff]   ;;  %637 = vmatprep.subr.bf16.mxu0 %v717_v0  ;;  %701 = vmatprep.subr.bf16.mxu1 %v717_v0  ;;  %v720_v3 = vld [vmem:[%s982_s1 + $0x8] sm:$0xff]   ;;  %v722_v5 = vld [vmem:[%s982_s1 + $0x10] sm:$0xff]  }
   0x3   :  { %638 = vmatpush3.bf16.msra.mxu0 %v718_v1  ;;  %709 = vmatpush3.bf16.msra.mxu1 %v718_v1  ;;  %v723_v6 = vld [vmem:[%s982_s1 + $0x58] sm:$0xff]   ;;  %v725_v8 = vld [vmem:[%s982_s1 + $0x60] sm:$0xff]   ;;  %v727_v10 = vld [vmem:[%s982_s1 + $0x68] sm:$0xff]  }
   0x4   :  { %639 = vmatprep.subr.bf16.mxu0 %v719_v2  ;;  %702 = vmatprep.subr.bf16.mxu1 %v719_v2  ;;  %v724_v7 = vld [vmem:[%s982_s1 + $0x18] sm:$0xff]   ;;  %v726_v9 = vld [vmem:[%s982_s1 + $0x20] sm:$0xff]   ;;  %v728_v12 = vld [vmem:[%s982_s1 + $0x28] sm:$0xff]  }
   0x5   :  { %v735_v11 = vld [vmem:[%s983_s0 + $0x4] ss:$8 sps:$4 sm:$0xff]   ;;  %v729_v14 = vld [vmem:[%s982_s1 + $0x70] sm:$0xff]   ;;  %v731_v16 = vld [vmem:[%s982_s1 + $0x78] sm:$0xff]  }
   0x6   :  { %v741_v13 = vld [vmem:[%s983_s0 + $0x44] ss:$8 sps:$4 sm:$0xff]   ;;  %311 = vmatprep.mubr.bf16.mxu0 %v735_v11  ;;  %v730_v15 = vld [vmem:[%s982_s1 + $0x30] sm:$0xff]   ;;  %v732_v17 = vld [vmem:[%s982_s1 + $0x38] sm:$0xff]  }
   0x7   :  { %640 = vmatpush3.bf16.msra.mxu0 %v720_v3  ;;  %710 = vmatpush3.bf16.msra.mxu1 %v720_v3  ;;  %v733_v18 = vld [vmem:[%s983_s0] ss:$8 sps:$4 sm:$0xff]   ;;  %v736_v20 = vld [vmem:[%s983_s0 + $0x14] ss:$8 sps:$4 sm:$0xff]   ;;  %v738_v22 = vld [vmem:[%s983_s0 + $0x10] ss:$8 sps:$4 sm:$0xff]  }
   0x8   :  { %641 = vmatprep.subr.bf16.mxu0 %v721_v4  ;;  %703 = vmatprep.subr.bf16.mxu1 %v721_v4  ;;  %v739_v19 = vld [vmem:[%s983_s0 + $0x40] ss:$8 sps:$4 sm:$0xff]   ;;  %v745_v21 = vld [vmem:[%s983_s0 + $0x54] ss:$8 sps:$4 sm:$0xff]   ;;  %v747_v23 = vld [vmem:[%s983_s0 + $0x50] ss:$8 sps:$4 sm:$0xff]  }
   0x9   :  { %343 = vmatprep.mubr.bf16.mxu1 %v741_v13  ;;  %v742_v24 = vld [vmem:[%s983_s0 + $0x24] ss:$8 sps:$4 sm:$0xff]   ;;  %v744_v26 = vld [vmem:[%s983_s0 + $0x20] ss:$8 sps:$4 sm:$0xff]   ;;  %v748_v28 = vld [vmem:[%s983_s0 + $0x34] ss:$8 sps:$4 sm:$0xff]  }
   0xa   :  { %v751_v25 = vld [vmem:[%s983_s0 + $0x64] ss:$8 sps:$4 sm:$0xff]   ;;  %v753_v27 = vld [vmem:[%s983_s0 + $0x60] ss:$8 sps:$4 sm:$0xff]   ;;  %v754_v29 = vld [vmem:[%s983_s0 + $0x74] ss:$8 sps:$4 sm:$0xff]  }
   0xb   :  { %642 = vmatpush3.bf16.msra.mxu0 %v722_v5  ;;  %711 = vmatpush3.bf16.msra.mxu1 %v722_v5  ;;  %v750_v30 = vld [vmem:[%s983_s0 + $0x30] ss:$8 sps:$4 sm:$0xff]   ;;  %v886_v35 = vld [vmem:[%s984_s2] ss:$0 sm:$0xff] }
   0xc   :  { %643 = vmatprep.subr.bf16.mxu0 %v723_v6  ;;  %704 = vmatprep.subr.bf16.mxu1 %v723_v6  ;;  %v756_v31 = vld [vmem:[%s983_s0 + $0x70] ss:$8 sps:$4 sm:$0xff]  }
   0xf   :  { %644 = vmatpush3.bf16.msra.mxu0 %v724_v7  ;;  %712 = vmatpush3.bf16.msra.mxu1 %v724_v7 }
  0x10   :  { %645 = vmatprep.subr.bf16.mxu0 %v725_v8  ;;  %705 = vmatprep.subr.bf16.mxu1 %v725_v8 }
  0x13   :  { %646 = vmatpush3.bf16.msra.mxu0 %v726_v9  ;;  %713 = vmatpush3.bf16.msra.mxu1 %v726_v9 }
  0x14   :  { %647 = vmatprep.subr.bf16.mxu0 %v727_v10  ;;  %706 = vmatprep.subr.bf16.mxu1 %v727_v10 }
  0x17   :  { %648 = vmatpush3.bf16.msra.mxu0 %v728_v12  ;;  %714 = vmatpush3.bf16.msra.mxu1 %v728_v12 }
  0x18   :  { %649 = vmatprep.subr.bf16.mxu0 %v729_v14  ;;  %707 = vmatprep.subr.bf16.mxu1 %v729_v14 }
  0x1b   :  { %650 = vmatpush3.bf16.msra.mxu0 %v730_v15  ;;  %715 = vmatpush3.bf16.msra.mxu1 %v730_v15 }
  0x1c   :  { %651 = vmatprep.subr.bf16.mxu0 %v731_v16  ;;  %708 = vmatprep.subr.bf16.mxu1 %v731_v16 }
  0x1f   :  { %652 = vmatpush3.bf16.msra.mxu0 %v732_v17  ;;  %716 = vmatpush3.bf16.msra.mxu1 %v732_v17 }
  0x22   :  { %312 = vmatmul.mubr.bf16.vlgmr.msra.gmra.mrb[0].mxu0 %v733_v18  ;;  %344 = vmatmul.mubr.bf16.vlgmr.msra.gmra.mrb[0].mxu1 %v739_v19 }
  0x23   :  { %319 = vmatprep.mubr.bf16.mxu0 %v736_v20  ;;  %351 = vmatprep.mubr.bf16.mxu1 %v745_v21 }
  0x2a   :  { %320 = vmatmul.mubr.bf16.gmra.mrb[4].mxu0 %v738_v22  ;;  %352 = vmatmul.mubr.bf16.gmra.mrb[4].mxu1 %v747_v23 }
  0x2b   :  { %327 = vmatprep.mubr.bf16.mxu0 %v742_v24  ;;  %359 = vmatprep.mubr.bf16.mxu1 %v751_v25 }
  0x32   :  { %328 = vmatmul.mubr.bf16.gmra.mrb[8].mxu0 %v744_v26  ;;  %360 = vmatmul.mubr.bf16.gmra.mrb[8].mxu1 %v753_v27 }
  0x33   :  { %335 = vmatprep.mubr.bf16.mxu0 %v748_v28  ;;  %367 = vmatprep.mubr.bf16.mxu1 %v754_v29 }
  0x3a   :  { %336 = vmatmul.mubr.bf16.gmra.mrb[12].mxu0 %v750_v30  ;;  %368 = vmatmul.mubr.bf16.gmra.mrb[12].mxu1 %v756_v31 }
  0xf5   :  { %v653_v32 = vpop.f32.mrb[0].mxu0  ;;  %v677_v33 = vpop.f32.mrb[0].mxu1 }
  0xf6   :  { %v654_v34 = vpop.f32.mrb[1].mxu0  ;;  %v678_v36 = vpop.f32.mrb[1].mxu1 }
  0xf7   :  { %v655_v37 = vadd.f32 %v654_v34, %v653_v32  ;;  %v656_v38 = vpop.f32.mrb[2].mxu0  ;;  %v679_v39 = vadd.f32 %v678_v36, %v677_v33  ;;  %v680_v40 = vpop.f32.mrb[2].mxu1 }
  0xf8   :  { %v657_v41 = vpop.f32.mrb[3].mxu0  ;;  %v681_v42 = vpop.f32.mrb[3].mxu1 }
  0xf9   :  { %v434_v43 = vadd.f32 %v655_v37, %v886_v35  ;;  %v658_v44 = vadd.f32 %v657_v41, %v656_v38  ;;  %v890_v45 = vadd.f32 %v679_v39, %v886_v35  ;;  %v682_v46 = vadd.f32 %v681_v42, %v680_v40 }
  0xfb   :  { %450 = vst [vmem:[%s985_s3] sm:$0xff] %v434_v43  ;;  %v435_v47 = vadd.f32 %v658_v44, %v886_v35  ;;  %458 = vst [vmem:[%s985_s3 + $0x40] sm:$0xff] %v890_v45  ;;  %v901_v48 = vadd.f32 %v682_v46, %v886_v35  ;;  %v554_v49 = vmul.f32 %v434_v43, %v434_v43 }
  0xfd   :  { %451 = vst [vmem:[%s985_s3 + $0x8] sm:$0xff] %v435_v47  ;;  %v532_v50 = vadd.f32 %v435_v47, %v434_v43  ;;  %v555_v51 = vmul.f32 %v435_v47, %v435_v47  ;;  %v659_v52 = vpop.f32.mrb[4].mxu0  ;;  %459 = vst [vmem:[%s985_s3 + $0x48] sm:$0xff] %v901_v48  ;;  %v683_v53 = vpop.f32.mrb[4].mxu1 }
  0xfe   :  { %v660_v54 = vpop.f32.mrb[5].mxu0  ;;  %v684_v55 = vpop.f32.mrb[5].mxu1 }
  0xff   :  { %v570_v56 = vadd.f32 %v555_v51, %v554_v49  ;;  %v661_v57 = vadd.f32 %v660_v54, %v659_v52  ;;  %v662_v58 = vpop.f32.mrb[6].mxu0  ;;  %v685_v59 = vadd.f32 %v684_v55, %v683_v53  ;;  %v686_v60 = vpop.f32.mrb[6].mxu1 }
 0x100   :  { %v663_v61 = vpop.f32.mrb[7].mxu0  ;;  %v687_v62 = vpop.f32.mrb[7].mxu1 }
 0x101   :  { %v436_v63 = vadd.f32 %v661_v57, %v886_v35  ;;  %v664_v0 = vadd.f32 %v663_v61, %v662_v58  ;;  %v912_v1 = vadd.f32 %v685_v59, %v886_v35  ;;  %v688_v2 = vadd.f32 %v687_v62, %v686_v60 }
 0x102   :  { %v562_v57 = vmul.f32 %v890_v45, %v890_v45 }
 0x103   :  { %452 = vst [vmem:[%s985_s3 + $0x10] sm:$0xff] %v436_v63  ;;  %v533_v3 = vadd.f32 %v532_v50, %v436_v63  ;;  %v556_v4 = vmul.f32 %v436_v63, %v436_v63  ;;  %v437_v5 = vadd.f32 %v664_v0, %v886_v35  ;;  %460 = vst [vmem:[%s985_s3 + $0x50] sm:$0xff] %v912_v1 }
 0x104   :  { %v923_v6 = vadd.f32 %v688_v2, %v886_v35  ;;  %v564_v62 = vmul.f32 %v912_v1, %v912_v1 }
 0x105   :  { %v571_v7 = vadd.f32 %v570_v56, %v556_v4  ;;  %453 = vst [vmem:[%s985_s3 + $0x18] sm:$0xff] %v437_v5  ;;  %v534_v8 = vadd.f32 %v533_v3, %v437_v5  ;;  %v557_v9 = vmul.f32 %v437_v5, %v437_v5  ;;  %v665_v10 = vpop.f32.mrb[8].mxu0  ;;  %v689_v11 = vpop.f32.mrb[8].mxu1 }
 0x106   :  { %v666_v12 = vpop.f32.mrb[9].mxu0  ;;  %461 = vst [vmem:[%s985_s3 + $0x58] sm:$0xff] %v923_v6  ;;  %v690_v13 = vpop.f32.mrb[9].mxu1  ;;  %v565_v2 = vmul.f32 %v923_v6, %v923_v6 }
 0x107   :  { %v572_v14 = vadd.f32 %v571_v7, %v557_v9  ;;  %v667_v15 = vadd.f32 %v666_v12, %v665_v10  ;;  %v668_v16 = vpop.f32.mrb[10].mxu0  ;;  %v691_v17 = vadd.f32 %v690_v13, %v689_v11  ;;  %v692_v18 = vpop.f32.mrb[10].mxu1 }
 0x108   :  { %v669_v19 = vpop.f32.mrb[11].mxu0  ;;  %v693_v20 = vpop.f32.mrb[11].mxu1 }
 0x109   :  { %v438_v21 = vadd.f32 %v667_v15, %v886_v35  ;;  %v670_v22 = vadd.f32 %v669_v19, %v668_v16  ;;  %v446_v23 = vadd.f32 %v691_v17, %v886_v35  ;;  %v694_v24 = vadd.f32 %v693_v20, %v692_v18 }
 0x10b   :  { %454 = vst [vmem:[%s985_s3 + $0x20] sm:$0xff] %v438_v21  ;;  %v535_v25 = vadd.f32 %v534_v8, %v438_v21  ;;  %v558_v26 = vmul.f32 %v438_v21, %v438_v21  ;;  %v439_v27 = vadd.f32 %v670_v22, %v886_v35  ;;  %462 = vst [vmem:[%s985_s3 + $0x60] sm:$0xff] %v446_v23 }
 0x10c   :  { %v447_v28 = vadd.f32 %v694_v24, %v886_v35  ;;  %v566_v5 = vmul.f32 %v446_v23, %v446_v23 }
 0x10d   :  { %v573_v29 = vadd.f32 %v572_v14, %v558_v26  ;;  %455 = vst [vmem:[%s985_s3 + $0x28] sm:$0xff] %v439_v27  ;;  %v536_v30 = vadd.f32 %v535_v25, %v439_v27  ;;  %v559_v31 = vmul.f32 %v439_v27, %v439_v27  ;;  %v671_v32 = vpop.f32.mrb[12].mxu0  ;;  %v695_v33 = vpop.f32.mrb[12].mxu1 }
 0x10e   :  { %v672_v34 = vpop.f32.mrb[13].mxu0  ;;  %463 = vst [vmem:[%s985_s3 + $0x68] sm:$0xff] %v447_v28  ;;  %v696_v36 = vpop.f32.mrb[13].mxu1  ;;  %v567_v10 = vmul.f32 %v447_v28, %v447_v28 }
 0x10f   :  { %v574_v37 = vadd.f32 %v573_v29, %v559_v31  ;;  %v673_v38 = vadd.f32 %v672_v34, %v671_v32  ;;  %v674_v39 = vpop.f32.mrb[14].mxu0  ;;  %v697_v40 = vadd.f32 %v696_v36, %v695_v33  ;;  %v698_v41 = vpop.f32.mrb[14].mxu1 }
 0x110   :  { %v675_v42 = vpop.f32.mrb[15].mxu0  ;;  %v699_v43 = vpop.f32.mrb[15].mxu1 }
 0x111   :  { %v440_v44 = vadd.f32 %v673_v38, %v886_v35  ;;  %v676_v46 = vadd.f32 %v675_v42, %v674_v39  ;;  %v448_v47 = vadd.f32 %v697_v40, %v886_v35  ;;  %v700_v49 = vadd.f32 %v699_v43, %v698_v41 }
 0x113   :  { %456 = vst [vmem:[%s985_s3 + $0x30] sm:$0xff] %v440_v44  ;;  %v537_v50 = vadd.f32 %v536_v30, %v440_v44  ;;  %v560_v51 = vmul.f32 %v440_v44, %v440_v44  ;;  %v441_v52 = vadd.f32 %v676_v46, %v886_v35  ;;  %464 = vst [vmem:[%s985_s3 + $0x70] sm:$0xff] %v448_v47 }
 0x114   :  { %v449_v53 = vadd.f32 %v700_v49, %v886_v35  ;;  %v563_v35 = vmul.f32 %v901_v48, %v901_v48 }
 0x115   :  { %v575_v54 = vadd.f32 %v574_v37, %v560_v51  ;;  %457 = vst [vmem:[%s985_s3 + $0x38] sm:$0xff] %v441_v52  ;;  %v538_v55 = vadd.f32 %v537_v50, %v441_v52  ;;  %v561_v56 = vmul.f32 %v441_v52, %v441_v52 }
 0x116   :  { %465 = vst [vmem:[%s985_s3 + $0x78] sm:$0xff] %v449_v53  ;;  %v569_v15 = vmul.f32 %v449_v53, %v449_v53 }
 0x117   :  { %v539_v58 = vadd.f32 %v538_v55, %v890_v45  ;;  %v576_v59 = vadd.f32 %v575_v54, %v561_v56 }
 0x119   :  { %v540_v60 = vadd.f32 %v539_v58, %v901_v48  ;;  %v577_v61 = vadd.f32 %v576_v59, %v562_v57  ;;  %v568_v48 = vmul.f32 %v448_v47, %v448_v47 }
 0x11b   :  { %v578_v63 = vadd.f32 %v577_v61, %v563_v35  ;;  %v541_v0 = vadd.f32 %v540_v60, %v912_v1 }
 0x11d   :  { %v542_v3 = vadd.f32 %v541_v0, %v923_v6  ;;  %v579_v4 = vadd.f32 %v578_v63, %v564_v62 }
 0x11f   :  { %v543_v45 = vadd.f32 %v542_v3, %v446_v23  ;;  %v580_v7 = vadd.f32 %v579_v4, %v565_v2 }
 0x121   :  { %v581_v8 = vadd.f32 %v580_v7, %v566_v5  ;;  %v544_v9 = vadd.f32 %v543_v45, %v447_v28 }
 0x123   :  { %v582_v11 = vadd.f32 %v581_v8, %v567_v10  ;;  %v545_v12 = vadd.f32 %v544_v9, %v448_v47 }
 0x125   :  { %v583_v13 = vadd.f32 %v582_v11, %v568_v48  ;;  %v546_v14 = vadd.f32 %v545_v12, %v449_v53 }
 0x127   :  { %v547_v16 = vrot.slane %v546_v14, 4  ;;  %v584_v1 = vadd.f32 %v583_v13, %v569_v15 }
 0x129   :  { %v548_v17 = vadd.f32 %v547_v16, %v546_v14  ;;  %v585_v18 = vrot.slane %v584_v1, 4 }
 0x12b   :  { %v549_v19 = vrot.slane %v548_v17, 2  ;;  %v586_v20 = vadd.f32 %v585_v18, %v584_v1 }
 0x12d   :  { %v550_v6 = vadd.f32 %v549_v19, %v548_v17  ;;  %v587_v21 = vrot.slane %v586_v20, 2 }
 0x12f   :  { %v551_v22 = vrot.slane %v550_v6, 1  ;;  %v588_v23 = vadd.f32 %v587_v21, %v586_v20 }
 0x131   :  { %v552_v24 = vadd.f32 %v551_v22, %v550_v6  ;;  %v589_v25 = vrot.slane %v588_v23, 1 }
 0x133   :  { %553 = vst [vmem:[%s986_s4] sm:$0x1] %v552_v24  ;;  %v590_v26 = vadd.f32 %v589_v25, %v588_v23 }
 0x135   :  { %591 = vst [vmem:[%s987_s5] sm:$0x1] %v590_v26 }

// kernel: discriminator_forward.15
= control target key start
LH: loop header
LB: loop body
LE: loop exit
PB: predicated region body
PF: predicated region fallthrough
CT: control target
= control target key end

     0   :  { %s305_s0 = inlined_call_operand.vmem [shape: f32[128,128], index: 0, kind: input, shape index: {}]   ;;  %s306_s1 = inlined_call_operand.vmem [shape: f32[1,128], index: 1, kind: input, shape index: {}]   ;;  %s307_s2 = inlined_call_operand.vmem [shape: f32[1,128], index: 2, kind: input, shape index: {}]   ;;  %s308_s3 = inlined_call_operand.vmem [shape: f32[128,128], index: 3, kind: output, shape index: {}]  }
   0x1   :  { %v14_v0 = vld [vmem:[%s305_s0] sm:$0xff]  ;;  %v15_v4 = vld [vmem:[%s305_s0 + $0x8] sm:$0xff]  ;;  %v16_v5 = vld [vmem:[%s305_s0 + $0x10] sm:$0xff] }
   0x2   :  { %v172_v1 = vld [vmem:[%s306_s1] ss:$0 sm:$0xff]  ;;  %v17_v6 = vld [vmem:[%s305_s0 + $0x18] sm:$0xff]  ;;  %v19_v11 = vld [vmem:[%s305_s0 + $0x28] sm:$0xff] }
   0x3   :  { %v177_v2 = vld [vmem:[%s307_s2] ss:$0 sm:$0xff]  ;;  %v37_v3 = vmul.f32 %v172_v1, %v14_v0  ;;  %v38_v7 = vmul.f32 %v172_v1, %v15_v4  ;;  %v39_v8 = vmul.f32 %v172_v1, %v16_v5  ;;  %v40_v9 = vmul.f32 %v172_v1, %v17_v6  ;;  %v20_v12 = vld [vmem:[%s305_s0 + $0x30] sm:$0xff]  ;;  %v21_v17 = vld [vmem:[%s305_s0 + $0x38] sm:$0xff] }
   0x4   :  { %v18_v10 = vld [vmem:[%s305_s0 + $0x20] sm:$0xff]  ;;  %v42_v15 = vmul.f32 %v172_v1, %v19_v11  ;;  %v43_v16 = vmul.f32 %v172_v1, %v20_v12  ;;  %v44_v21 = vmul.f32 %v172_v1, %v21_v17  ;;  %v23_v30 = vld [vmem:[%s305_s0 + $0x48] sm:$0xff]  ;;  %v24_v31 = vld [vmem:[%s305_s0 + $0x50] sm:$0xff] }
   0x5   :  { %v60_v13 = vadd.f32 %v177_v2, %v37_v3  ;;  %v41_v14 = vmul.f32 %v172_v1, %v18_v10  ;;  %v61_v18 = vadd.f32 %v177_v2, %v38_v7  ;;  %v62_v19 = vadd.f32 %v177_v2, %v39_v8  ;;  %v22_v25 = vld [vmem:[%s305_s0 + $0x40] sm:$0xff]  ;;  %v25_v43 = vld [vmem:[%s305_s0 + $0x58] sm:$0xff]  ;;  %v27_v45 = vld [vmem:[%s305_s0 + $0x68] sm:$0xff] }
   0x6   :  { %v63_v20 = vadd.f32 %v177_v2, %v40_v9  ;;  %v65_v24 = vadd.f32 %v177_v2, %v42_v15  ;;  %v66_v37 = vadd.f32 %v177_v2, %v43_v16  ;;  %v67_v38 = vadd.f32 %v177_v2, %v44_v21  ;;  %v26_v44 = vld [vmem:[%s305_s0 + $0x60] sm:$0xff]  ;;  %v28_v56 = vld [vmem:[%s305_s0 + $0x70] sm:$0xff]  ;;  %v29_v4 = vld [vmem:[%s305_s0 + $0x78] sm:$0xff] }
   0x7   :  { %vm76_vm0 = vcmp.ge.f32.partialorder %v60_v13, 0.0  ;;  %v92_v22 = vmul.f32 0.2, %v60_v13  ;;  %v64_v23 = vadd.f32 %v177_v2, %v41_v14  ;;  %vm77_vm1 = vcmp.ge.f32.partialorder %v61_v18, 0.0 }
   0x8   :  { %v93_v26 = vmul.f32 0.2, %v61_v18  ;;  %vm78_vm2 = vcmp.ge.f32.partialorder %v62_v19, 0.0  ;;  %v94_v27 = vmul.f32 0.2, %v62_v19  ;;  %vm79_vm3 = vcmp.ge.f32.partialorder %v63_v20, 0.0 }
   0x9   :  { %v108_v28 = vsel %vm76_vm0, %v60_v13, %v92_v22  ;;  %v95_v29 = vmul.f32 0.2, %v63_v20  ;;  %vm80_vm4 = vcmp.ge.f32.partialorder %v64_v23, 0.0  ;;  %v96_v34 = vmul.f32 0.2, %v64_v23 }
   0xa   :  { %124 = vst [vmem:[%s308_s3] sm:$0xff] %v108_v28  ;;  %v109_v32 = vsel %vm77_vm1, %v61_v18, %v93_v26  ;;  %v110_v33 = vsel %vm78_vm2, %v62_v19, %v94_v27  ;;  %vm81_vm5 = vcmp.ge.f32.partialorder %v65_v24, 0.0  ;;  %v97_v36 = vmul.f32 0.2, %v65_v24 }
   0xb   :  { %125 = vst [vmem:[%s308_s3 + $0x8] sm:$0xff] %v109_v32  ;;  %126 = vst [vmem:[%s308_s3 + $0x10] sm:$0xff] %v110_v33  ;;  %v111_v35 = vsel %vm79_vm3, %v63_v20, %v95_v29  ;;  %v112_v39 = vsel %vm80_vm4, %v64_v23, %v96_v34  ;;  %v45_v40 = vmul.f32 %v172_v1, %v22_v25  ;;  %vm82_vm6 = vcmp.ge.f32.partialorder %v66_v37, 0.0 }
   0xc   :  { %127 = vst [vmem:[%s308_s3 + $0x18] sm:$0xff] %v111_v35  ;;  %v46_v41 = vmul.f32 %v172_v1, %v23_v30  ;;  %v47_v42 = vmul.f32 %v172_v1, %v24_v31  ;;  %128 = vst [vmem:[%s308_s3 + $0x20] sm:$0xff] %v112_v39  ;;  %v113_v46 = vsel %vm81_vm5, %v65_v24, %v97_v36  ;;  %v98_v47 = vmul.f32 0.2, %v66_v37 }
   0xd   :  { %vm83_vm7 = vcmp.ge.f32.partialorder %v67_v38, 0.0  ;;  %129 = vst [vmem:[%s308_s3 + $0x28] sm:$0xff] %v113_v46  ;;  %v99_v48 = vmul.f32 0.2, %v67_v38  ;;  %v68_v49 = vadd.f32 %v177_v2, %v45_v40  ;;  %v48_v53 = vmul.f32 %v172_v1, %v25_v43 }
   0xe   :  { %v69_v50 = vadd.f32 %v177_v2, %v46_v41  ;;  %v70_v51 = vadd.f32 %v177_v2, %v47_v42  ;;  %v114_v52 = vsel %vm82_vm6, %v66_v37, %v98_v47  ;;  %v49_v54 = vmul.f32 %v172_v1, %v26_v44 }
   0xf   :  { %v50_v55 = vmul.f32 %v172_v1, %v27_v45  ;;  %130 = vst [vmem:[%s308_s3 + $0x30] sm:$0xff] %v114_v52  ;;  %v115_v57 = vsel %vm83_vm7, %v67_v38, %v99_v48  ;;  %vm84_vm8 = vcmp.ge.f32.partialorder %v68_v49, 0.0  ;;  %v100_v58 = vmul.f32 0.2, %v68_v49 }
  0x10   :  { %vm85_vm9 = vcmp.ge.f32.partialorder %v69_v50, 0.0  ;;  %131 = vst [vmem:[%s308_s3 + $0x38] sm:$0xff] %v115_v57  ;;  %v101_v59 = vmul.f32 0.2, %v69_v50  ;;  %vm86_vm10 = vcmp.ge.f32.partialorder %v70_v51, 0.0  ;;  %v71_v61 = vadd.f32 %v177_v2, %v48_v53 }
  0x11   :  { %v102_v60 = vmul.f32 0.2, %v70_v51  ;;  %v116_v62 = vsel %vm84_vm8, %v68_v49, %v100_v58  ;;  %v72_v63 = vadd.f32 %v177_v2, %v49_v54  ;;  %v73_v0 = vadd.f32 %v177_v2, %v50_v55 }
  0x12   :  { %v51_v3 = vmul.f32 %v172_v1, %v28_v56  ;;  %132 = vst [vmem:[%s308_s3 + $0x40] sm:$0xff] %v116_v62  ;;  %v117_v5 = vsel %vm85_vm9, %v69_v50, %v101_v59  ;;  %vm87_vm11 = vcmp.ge.f32.partialorder %v71_v61, 0.0  ;;  %v103_v7 = vmul.f32 0.2, %v71_v61 }
  0x13   :  { %v118_v6 = vsel %vm86_vm10, %v70_v51, %v102_v60  ;;  %133 = vst [vmem:[%s308_s3 + $0x48] sm:$0xff] %v117_v5  ;;  %vm88_vm12 = vcmp.ge.f32.partialorder %v72_v63, 0.0  ;;  %v104_v8 = vmul.f32 0.2, %v72_v63  ;;  %vm89_vm13 = vcmp.ge.f32.partialorder %v73_v0, 0.0 }
  0x14   :  { %134 = vst [vmem:[%s308_s3 + $0x50] sm:$0xff] %v118_v6  ;;  %v105_v9 = vmul.f32 0.2, %v73_v0  ;;  %v119_v10 = vsel %vm87_vm11, %v71_v61, %v103_v7  ;;  %v74_v11 = vadd.f32 %v177_v2, %v51_v3  ;;  %v52_v12 = vmul.f32 %v172_v1, %v29_v4 }
  0x15   :  { %135 = vst [vmem:[%s308_s3 + $0x58] sm:$0xff] %v119_v10  ;;  %v120_v13 = vsel %vm88_vm12, %v72_v63, %v104_v8 }
  0x16   :  { %v121_v14 = vsel %vm89_vm13, %v73_v0, %v105_v9  ;;  %136 = vst [vmem:[%s308_s3 + $0x60] sm:$0xff] %v120_v13  ;;  %vm90_vm14 = vcmp.ge.f32.partialorder %v74_v11, 0.0  ;;  %v106_v15 = vmul.f32 0.2, %v74_v11  ;;  %v75_v16 = vadd.f32 %v177_v2, %v52_v12 }
  0x17   :  { %137 = vst [vmem:[%s308_s3 + $0x68] sm:$0xff] %v121_v14 }
  0x18   :  { %v122_v17 = vsel %vm90_vm14, %v74_v11, %v106_v15  ;;  %vm91_vm15 = vcmp.ge.f32.partialorder %v75_v16, 0.0  ;;  %v107_v1 = vmul.f32 0.2, %v75_v16 }
  0x19   :  { %138 = vst [vmem:[%s308_s3 + $0x70] sm:$0xff] %v122_v17 }
  0x1a   :  { %v123_v18 = vsel %vm91_vm15, %v75_v16, %v107_v1 }
  0x1b   :  { %139 = vst [vmem:[%s308_s3 + $0x78] sm:$0xff] %v123_v18 }

// kernel: discriminator_forward.16
= control target key start
LH: loop header
LB: loop body
LE: loop exit
PB: predicated region body
PF: predicated region fallthrough
CT: control target
= control target key end

     0   :  { %s514_s1 = inlined_call_operand.vmem [shape: bf16[256,128], index: 1, kind: input, shape index: {}]   ;;  %s515_s0 = inlined_call_operand.vmem [shape: bf16[32,256], index: 0, kind: input, shape index: {}]   ;;  %s516_s2 = inlined_call_operand.vmem [shape: f32[1,128], index: 2, kind: input, shape index: {}]   ;;  %s517_s3 = inlined_call_operand.vmem [shape: f32[32,128], index: 3, kind: output, shape index: {0}]   ;;  %s518_s4 = inlined_call_operand.vmem [shape: f32[1,1,128], index: 4, kind: output, shape index: {1}]   ;;  %s519_s5 = inlined_call_operand.vmem [shape: f32[1,1,128], index: 5, kind: output, shape index: {2}]  }
   0x1   :  { %v381_v0 = vld [vmem:[%s514_s1 + $0x40] sm:$0xff]   ;;  %v383_v2 = vld [vmem:[%s514_s1 + $0x48] sm:$0xff]   ;;  %v385_v4 = vld [vmem:[%s514_s1 + $0x50] sm:$0xff]  }
   0x2   :  { %v382_v1 = vld [vmem:[%s514_s1] sm:$0xff]   ;;  %337 = vmatprep.subr.bf16.mxu0 %v381_v0  ;;  %365 = vmatprep.subr.bf16.mxu1 %v381_v0  ;;  %v384_v3 = vld [vmem:[%s514_s1 + $0x8] sm:$0xff]   ;;  %v386_v5 = vld [vmem:[%s514_s1 + $0x10] sm:$0xff]  }
   0x3   :  { %338 = vmatpush3.bf16.msra.mxu0 %v382_v1  ;;  %373 = vmatpush3.bf16.msra.mxu1 %v382_v1  ;;  %v387_v6 = vld [vmem:[%s514_s1 + $0x58] sm:$0xff]   ;;  %v389_v8 = vld [vmem:[%s514_s1 + $0x60] sm:$0xff]   ;;  %v391_v10 = vld [vmem:[%s514_s1 + $0x68] sm:$0xff]  }
   0x4   :  { %339 = vmatprep.subr.bf16.mxu0 %v383_v2  ;;  %366 = vmatprep.subr.bf16.mxu1 %v383_v2  ;;  %v388_v7 = vld [vmem:[%s514_s1 + $0x18] sm:$0xff]   ;;  %v390_v9 = vld [vmem:[%s514_s1 + $0x20] sm:$0xff]   ;;  %v392_v13 = vld [vmem:[%s514_s1 + $0x28] sm:$0xff]  }
   0x5   :  { %v399_v11 = vld [vmem:[%s515_s0 + $0x4] ss:$8 sps:$4 sm:$0xff]   ;;  %v402_v12 = vld [vmem:[%s515_s0 + $0x14] ss:$8 sps:$4 sm:$0xff]   ;;  %v397_v18 = vld [vmem:[%s515_s0] ss:$8 sps:$4 sm:$0xff]  }
   0x6   :  { %v393_v14 = vld [vmem:[%s514_s1 + $0x70] sm:$0xff]   ;;  %215 = vmatprep.mubr.bf16.mxu0 %v399_v11  ;;  %223 = vmatprep.mubr.bf16.mxu1 %v402_v12  ;;  %v395_v16 = vld [vmem:[%s514_s1 + $0x78] sm:$0xff]   ;;  %v336_v23 = vld [vmem:[%s516_s2] ss:$0 sm:$0xff] }
   0x7   :  { %340 = vmatpush3.bf16.msra.mxu0 %v384_v3  ;;  %374 = vmatpush3.bf16.msra.mxu1 %v384_v3  ;;  %v394_v15 = vld [vmem:[%s514_s1 + $0x30] sm:$0xff]   ;;  %v396_v17 = vld [vmem:[%s514_s1 + $0x38] sm:$0xff]  }
   0x8   :  { %341 = vmatprep.subr.bf16.mxu0 %v385_v4  ;;  %367 = vmatprep.subr.bf16.mxu1 %v385_v4  ;;  %v400_v19 = vld [vmem:[%s515_s0 + $0x10] ss:$8 sps:$4 sm:$0xff]  }
   0xb   :  { %342 = vmatpush3.bf16.msra.mxu0 %v386_v5  ;;  %375 = vmatpush3.bf16.msra.mxu1 %v386_v5 }
   0xc   :  { %343 = vmatprep.subr.bf16.mxu0 %v387_v6  ;;  %368 = vmatprep.subr.bf16.mxu1 %v387_v6 }
   0xf   :  { %344 = vmatpush3.bf16.msra.mxu0 %v388_v7  ;;  %376 = vmatpush3.bf16.msra.mxu1 %v388_v7 }
  0x10   :  { %345 = vmatprep.subr.bf16.mxu0 %v389_v8  ;;  %369 = vmatprep.subr.bf16.mxu1 %v389_v8 }
  0x13   :  { %346 = vmatpush3.bf16.msra.mxu0 %v390_v9  ;;  %377 = vmatpush3.bf16.msra.mxu1 %v390_v9 }
  0x14   :  { %347 = vmatprep.subr.bf16.mxu0 %v391_v10  ;;  %370 = vmatprep.subr.bf16.mxu1 %v391_v10 }
  0x17   :  { %348 = vmatpush3.bf16.msra.mxu0 %v392_v13  ;;  %378 = vmatpush3.bf16.msra.mxu1 %v392_v13 }
  0x18   :  { %349 = vmatprep.subr.bf16.mxu0 %v393_v14  ;;  %371 = vmatprep.subr.bf16.mxu1 %v393_v14 }
  0x1b   :  { %350 = vmatpush3.bf16.msra.mxu0 %v394_v15  ;;  %379 = vmatpush3.bf16.msra.mxu1 %v394_v15 }
  0x1c   :  { %351 = vmatprep.subr.bf16.mxu0 %v395_v16  ;;  %372 = vmatprep.subr.bf16.mxu1 %v395_v16 }
  0x1f   :  { %352 = vmatpush3.bf16.msra.mxu0 %v396_v17  ;;  %380 = vmatpush3.bf16.msra.mxu1 %v396_v17 }
  0x22   :  { %216 = vmatmul.mubr.bf16.vlgmr.msra.gmra.mrb[0].mxu0 %v397_v18  ;;  %224 = vmatmul.mubr.bf16.vlgmr.msra.gmra.mrb[0].mxu1 %v400_v19 }
  0xf5   :  { %v353_v20 = vpop.f32.mrb[0].mxu0  ;;  %v359_v21 = vpop.f32.mrb[0].mxu1 }
  0xf6   :  { %v354_v22 = vpop.f32.mrb[1].mxu0  ;;  %v360_v24 = vpop.f32.mrb[1].mxu1 }
  0xf7   :  { %v355_v25 = vadd.f32 %v354_v22, %v353_v20  ;;  %v356_v26 = vpop.f32.mrb[2].mxu0  ;;  %v361_v27 = vadd.f32 %v360_v24, %v359_v21  ;;  %v362_v28 = vpop.f32.mrb[2].mxu1 }
  0xf8   :  { %v357_v29 = vpop.f32.mrb[3].mxu0  ;;  %v363_v30 = vpop.f32.mrb[3].mxu1 }
  0xf9   :  { %v254_v31 = vadd.f32 %v355_v25, %v336_v23  ;;  %v256_v32 = vadd.f32 %v361_v27, %v336_v23  ;;  %v358_v33 = vadd.f32 %v357_v29, %v356_v26  ;;  %v364_v34 = vadd.f32 %v363_v30, %v362_v28 }
  0xfb   :  { %258 = vst [vmem:[%s517_s3] sm:$0xff] %v254_v31  ;;  %260 = vst [vmem:[%s517_s3 + $0x10] sm:$0xff] %v256_v32  ;;  %v255_v35 = vadd.f32 %v358_v33, %v336_v23  ;;  %v257_v36 = vadd.f32 %v364_v34, %v336_v23  ;;  %v290_v37 = vmul.f32 %v254_v31, %v254_v31 }
  0xfc   :  { %v292_v38 = vmul.f32 %v256_v32, %v256_v32 }
  0xfd   :  { %259 = vst [vmem:[%s517_s3 + $0x8] sm:$0xff] %v255_v35  ;;  %v280_v39 = vadd.f32 %v255_v35, %v254_v31  ;;  %v291_v40 = vmul.f32 %v255_v35, %v255_v35  ;;  %261 = vst [vmem:[%s517_s3 + $0x18] sm:$0xff] %v257_v36  ;;  %v293_v44 = vmul.f32 %v257_v36, %v257_v36 }
  0xff   :  { %v294_v41 = vadd.f32 %v291_v40, %v290_v37  ;;  %v281_v42 = vadd.f32 %v280_v39, %v256_v32 }
 0x101   :  { %v282_v43 = vadd.f32 %v281_v42, %v257_v36  ;;  %v295_v45 = vadd.f32 %v294_v41, %v292_v38 }
 0x103   :  { %v283_v46 = vrot.slane %v282_v43, 4  ;;  %v296_v47 = vadd.f32 %v295_v45, %v293_v44 }
 0x105   :  { %v284_v48 = vadd.f32 %v283_v46, %v282_v43  ;;  %v297_v49 = vrot.slane %v296_v47, 4 }
 0x107   :  { %v285_v50 = vrot.slane %v284_v48, 2  ;;  %v298_v51 = vadd.f32 %v297_v49, %v296_v47 }
 0x109   :  { %v286_v52 = vadd.f32 %v285_v50, %v284_v48  ;;  %v299_v53 = vrot.slane %v298_v51, 2 }
 0x10b   :  { %v287_v54 = vrot.slane %v286_v52, 1  ;;  %v300_v55 = vadd.f32 %v299_v53, %v298_v51 }
 0x10d   :  { %v288_v56 = vadd.f32 %v287_v54, %v286_v52  ;;  %v301_v57 = vrot.slane %v300_v55, 1 }
 0x10f   :  { %289 = vst [vmem:[%s518_s4] sm:$0x1] %v288_v56  ;;  %v302_v58 = vadd.f32 %v301_v57, %v300_v55 }
 0x111   :  { %303 = vst [vmem:[%s519_s5] sm:$0x1] %v302_v58 }

// kernel: discriminator_forward.17
= control target key start
LH: loop header
LB: loop body
LE: loop exit
PB: predicated region body
PF: predicated region fallthrough
CT: control target
= control target key end

     0   :  { %s112_s0 = inlined_call_operand.vmem [shape: f32[32,128], index: 0, kind: input, shape index: {}]   ;;  %s113_s1 = inlined_call_operand.vmem [shape: f32[1,128], index: 1, kind: input, shape index: {}]   ;;  %s114_s2 = inlined_call_operand.vmem [shape: f32[1,128], index: 2, kind: input, shape index: {}]   ;;  %s115_s3 = inlined_call_operand.vmem [shape: f32[32,128], index: 3, kind: output, shape index: {}]  }
   0x1   :  { %v14_v0 = vld [vmem:[%s112_s0] sm:$0xff]  ;;  %v15_v4 = vld [vmem:[%s112_s0 + $0x8] sm:$0xff]  ;;  %v16_v5 = vld [vmem:[%s112_s0 + $0x10] sm:$0xff] }
   0x2   :  { %v60_v1 = vld [vmem:[%s113_s1] ss:$0 sm:$0xff]  ;;  %v17_v6 = vld [vmem:[%s112_s0 + $0x18] sm:$0xff] }
   0x3   :  { %v61_v2 = vld [vmem:[%s114_s2] ss:$0 sm:$0xff]  ;;  %v25_v3 = vmul.f32 %v60_v1, %v14_v0  ;;  %v26_v7 = vmul.f32 %v60_v1, %v15_v4  ;;  %v27_v8 = vmul.f32 %v60_v1, %v16_v5  ;;  %v28_v9 = vmul.f32 %v60_v1, %v17_v6 }
   0x5   :  { %v36_v10 = vadd.f32 %v61_v2, %v25_v3  ;;  %v37_v11 = vadd.f32 %v61_v2, %v26_v7  ;;  %v38_v12 = vadd.f32 %v61_v2, %v27_v8  ;;  %v39_v13 = vadd.f32 %v61_v2, %v28_v9 }
   0x7   :  { %vm40_vm0 = vcmp.ge.f32.partialorder %v36_v10, 0.0  ;;  %v44_v14 = vmul.f32 0.2, %v36_v10  ;;  %vm41_vm1 = vcmp.ge.f32.partialorder %v37_v11, 0.0  ;;  %v45_v15 = vmul.f32 0.2, %v37_v11 }
   0x8   :  { %vm42_vm2 = vcmp.ge.f32.partialorder %v38_v12, 0.0  ;;  %v46_v16 = vmul.f32 0.2, %v38_v12  ;;  %vm43_vm3 = vcmp.ge.f32.partialorder %v39_v13, 0.0  ;;  %v47_v18 = vmul.f32 0.2, %v39_v13 }
   0x9   :  { %v48_v17 = vsel %vm40_vm0, %v36_v10, %v44_v14  ;;  %v49_v19 = vsel %vm41_vm1, %v37_v11, %v45_v15 }
   0xa   :  { %52 = vst [vmem:[%s115_s3] sm:$0xff] %v48_v17  ;;  %v50_v20 = vsel %vm42_vm2, %v38_v12, %v46_v16  ;;  %53 = vst [vmem:[%s115_s3 + $0x8] sm:$0xff] %v49_v19  ;;  %v51_v21 = vsel %vm43_vm3, %v39_v13, %v47_v18 }
   0xb   :  { %54 = vst [vmem:[%s115_s3 + $0x10] sm:$0xff] %v50_v20  ;;  %55 = vst [vmem:[%s115_s3 + $0x18] sm:$0xff] %v51_v21 }

// kernel: discriminator_forward.18
= control target key start
LH: loop header
LB: loop body
LE: loop exit
PB: predicated region body
PF: predicated region fallthrough
CT: control target
= control target key end

     0   :  { %v14_v0 = vlaneseq  ;;  %v142_v1 = vmov 1983009808   ;;  %s173_s0 = inlined_call_operand.vmem [shape: f32[2,256], index: 0, kind: input, shape index: {}]   ;;  %s174_s1 = inlined_call_operand.hbm [shape: f32[1,1], index: 1, kind: output, shape index: {}]  }
   0x1   :  { %v12_v2 = vunpack.c.l.s4 %v142_v1 }
   0x2   :  { %6 = vsyncpa [#allocation3], 0  ;;  %v15_v3 = vshrl.u32 %v14_v0, 7  ;;  %v9_v5 = vld [vmem:[%s173_s0] sm:$0xf]  ;;  %vm21_vm0 = vcmask 1041408  }
   0x3   :  { %v13_v4 = vunpack.c.0.s8 %v12_v2  ;;  %s143_s0 = smov [#allocation2]   ;;  %vm96_vm5 = vcmask 0  }
   0x4   :  { %s104_s8 = sshll.u32 %s143_s0, 4  ;;  %s105_s8 = int_to_ptr.vmem [resolvable:$true] %s104_s8 }
   0x5   :  { %v16_v6 = vsub.s32 %v13_v4, %v15_v3  ;;  %s118_s9 = scalar_lea.vmem %s105_s8, 16  ;;  %s122_s10 = scalar_lea.vmem %s105_s8, 32 }
   0x6   :  { %p119_p0 = scmp.ne.s32.totalorder %s105_s8, %s118_s9  ;;  %p123_p1 = scmp.lt.s32.totalorder %s105_s8, %s105_s8 }
   0x7   :  { %v17_v7 = vrot.slane %v9_v5, %v16_v6  ;;  %p124_p2 = scmp.lt.s32.totalorder %s122_s10, %s118_s9 }
   0x9   :  { %v18_v8 = vcombine.high %v17_v7, %v17_v7  ;;  %v22_v9 = vsel %vm21_vm0, %v17_v7, 0.0  ;;  %p125_p3 = por %p124_p2, %p123_p1 }
   0xa   :  { %v23_v10 = vrot.slane %v22_v9, 4 }
   0xb   :  { %v29_v11 = vsel %vm21_vm0, %v18_v8, 0.0  ;;  %p126_p4 = pnand %p125_p3, %p119_p0 }
   0xc   :  { %v24_v12 = vadd.f32 %v23_v10, %v22_v9  ;;  %v30_v13 = vrot.slane %v29_v11, 4 }
   0xe   :  { %v25_v14 = vrot.slane %v24_v12, 2  ;;  %v31_v15 = vadd.f32 %v30_v13, %v29_v11 }
  0x10   :  { %v26_v16 = vadd.f32 %v25_v14, %v24_v12  ;;  %v32_v17 = vrot.slane %v31_v15, 2 }
  0x12   :  { %v27_v18 = vrot.slane %v26_v16, 1  ;;  %v33_v19 = vadd.f32 %v32_v17, %v31_v15 }
  0x14   :  { %v28_v20 = vadd.f32 %v27_v18, %v26_v16  ;;  %v34_v21 = vrot.slane %v33_v19, 1 }
  0x16   :  { %v35_v22 = vadd.f32 %v34_v21, %v33_v19  ;;  %v37_v23 = vmul.f32 0.5, %v28_v20 }
  0x18   :  { %v38_v24 = vmul.f32 0.5, %v35_v22 }
  0x1a   :  { %v41_v25 = vcombine.low %v37_v23, %v38_v24 }
  0x1c   :  { %v48_v26 = vrot.slane %v41_v25, %v16_v6 }
  0x1e   :  { %v50_v27 = vsub.f32 %v9_v5, %v48_v26 }
  0x20   :  { %v51_v28 = vmul.f32 %v50_v27, %v50_v27 }
  0x22   :  { %v59_v29 = vrot.slane %v51_v28, %v16_v6 }
  0x24   :  { %v60_v30 = vcombine.high %v59_v29, %v59_v29  ;;  %v63_v31 = vsel %vm21_vm0, %v59_v29, 0.0 }
  0x25   :  { %v64_v32 = vrot.slane %v63_v31, 4 }
  0x26   :  { %v70_v33 = vsel %vm21_vm0, %v60_v30, 0.0 }
  0x27   :  { %v65_v34 = vadd.f32 %v64_v32, %v63_v31  ;;  %v71_v35 = vrot.slane %v70_v33, 4 }
  0x29   :  { %v66_v36 = vrot.slane %v65_v34, 2  ;;  %v72_v37 = vadd.f32 %v71_v35, %v70_v33 }
  0x2b   :  { %v67_v38 = vadd.f32 %v66_v36, %v65_v34  ;;  %v73_v39 = vrot.slane %v72_v37, 2 }
  0x2d   :  { %v68_v40 = vrot.slane %v67_v38, 1  ;;  %v74_v41 = vadd.f32 %v73_v39, %v72_v37 }
  0x2f   :  { %v69_v42 = vadd.f32 %v68_v40, %v67_v38  ;;  %v75_v43 = vrot.slane %v74_v41, 1 }
  0x31   :  { %v76_v44 = vadd.f32 %v75_v43, %v74_v41  ;;  %114 = vrsqrt.f32 %v69_v42  ;;  %vm79_vm1 = vcmp.eq.f32.partialorder %v69_v42, inf  ;;  %v82_v46 = vand.u32 2147483648, %v69_v42 }
  0x32   :  { %vm81_vm2 = vcmp.eq.f32.partialorder %v69_v42, 0.0 }
  0x33   :  { %116 = vrsqrt.f32 %v76_v44  ;;  %vm86_vm3 = vcmp.eq.f32.partialorder %v76_v44, inf  ;;  %v89_v49 = vand.u32 2147483648, %v76_v44  ;;  %vm88_vm4 = vcmp.eq.f32.partialorder %v76_v44, 0.0 }
  0x3b   :  { %v115_v45 = vpop.eup %114 }
  0x3c   :  { %v78_v47 = vmul.f32 %v115_v45, %v69_v42 }
  0x3d   :  { %v117_v48 = vpop.eup %116 }
  0x3e   :  { %v80_v50 = vsel %vm79_vm1, %v69_v42, %v78_v47  ;;  %v85_v51 = vmul.f32 %v117_v48, %v76_v44 }
  0x3f   :  { %v83_v52 = vsel %vm81_vm2, %v82_v46, %v80_v50 }
  0x40   :  { %v87_v53 = vsel %vm86_vm3, %v76_v44, %v85_v51 }
  0x41   :  { %v90_v54 = vsel %vm88_vm4, %v89_v49, %v87_v53 }
  0x42   :  { %v91_v55 = vadd.f32 %v90_v54, %v83_v52 }
  0x44   :  { %92 = vadd.xlane.f32.xlu0 %v91_v55 }
  0xd1   :  { %v93_v56 = vpop.xlane.xlu0 %92 }
  0xd2   :  { %v95_v57 = vmul.f32 0.00390625, %v93_v56 }
  0xd4   :  { %97 = vst.msk [vmem:[#allocation2] sm:$0x1] %vm96_vm5, %v95_v57 }
  0xd5   :  { %129 = shalt.err (!%p126_p4)
}
  0xd6   :  { %s130_s13 = scalar_lea.hbm %s174_s1, 16 }
  0xd7   :  { %p131_p5 = scmp.ne.s32.totalorder %s174_s1, %s130_s13  ;;  %p134_p6 = scmp.lt.u32.totalorder %s130_s13, %s174_s1 }
  0xd9   :  { %p136_p7 = pnand %p134_p6, %p131_p5 }
  0xdb   :  { %139 = shalt.err (!%p136_p7)
}
  0xdc   :  { %107 = dma.vmem_to_hbm [thread:$0]  %s105_s8, 16, %s174_s1, [#allocation3]  }
  0xdd   :  { %140 = dma.done.wait [#allocation3], 16  }
  0xde   :  { %141 = vsyncadd [#allocation3], 4294967280 }
  0xdf   :  { %111 = vsyncpa [#allocation3], 1 }

// kernel: discriminator_forward.19
= control target key start
LH: loop header
LB: loop body
LE: loop exit
PB: predicated region body
PF: predicated region fallthrough
CT: control target
= control target key end

     0   :  { %s352_s1 = inlined_call_operand.vmem [shape: bf16[256,128], index: 1, kind: input, shape index: {}]   ;;  %s353_s0 = inlined_call_operand.vmem [shape: bf16[8,256], index: 0, kind: input, shape index: {}]   ;;  %s354_s2 = inlined_call_operand.vmem [shape: f32[1,128], index: 2, kind: input, shape index: {}]   ;;  %s355_s3 = inlined_call_operand.vmem [shape: f32[8,128], index: 3, kind: output, shape index: {}]  }
   0x1   :  { %v257_v0 = vld [vmem:[%s352_s1 + $0x40] sm:$0xff]   ;;  %v259_v2 = vld [vmem:[%s352_s1 + $0x48] sm:$0xff]   ;;  %v261_v4 = vld [vmem:[%s352_s1 + $0x50] sm:$0xff]  }
   0x2   :  { %v258_v1 = vld [vmem:[%s352_s1] sm:$0xff]   ;;  %235 = vmatprep.subr.bf16.mxu0 %v257_v0  ;;  %v260_v3 = vld [vmem:[%s352_s1 + $0x8] sm:$0xff]   ;;  %v262_v5 = vld [vmem:[%s352_s1 + $0x10] sm:$0xff]  }
   0x3   :  { %236 = vmatpush3.bf16.msra.mxu0 %v258_v1  ;;  %v263_v6 = vld [vmem:[%s352_s1 + $0x58] sm:$0xff]   ;;  %v265_v8 = vld [vmem:[%s352_s1 + $0x60] sm:$0xff]   ;;  %v267_v10 = vld [vmem:[%s352_s1 + $0x68] sm:$0xff]  }
   0x4   :  { %237 = vmatprep.subr.bf16.mxu0 %v259_v2  ;;  %v264_v7 = vld [vmem:[%s352_s1 + $0x18] sm:$0xff]   ;;  %v266_v9 = vld [vmem:[%s352_s1 + $0x20] sm:$0xff]   ;;  %v268_v13 = vld [vmem:[%s352_s1 + $0x28] sm:$0xff]  }
   0x5   :  { %v21_v11 = vld [vmem:[%s353_s0] sm:$0xff]  ;;  %v269_v14 = vld [vmem:[%s352_s1 + $0x70] sm:$0xff]   ;;  %v271_v16 = vld [vmem:[%s352_s1 + $0x78] sm:$0xff]  }
   0x6   :  { %v217_v12 = vcombine.high %v21_v11, %v21_v11  ;;  %v270_v15 = vld [vmem:[%s352_s1 + $0x30] sm:$0xff]   ;;  %v272_v17 = vld [vmem:[%s352_s1 + $0x38] sm:$0xff]   ;;  %v216_v18 = vcombine.low %v21_v11, %v21_v11  ;;  %v234_v21 = vld [vmem:[%s354_s2] ss:$0 sm:$0xff] }
   0x7   :  { %238 = vmatpush3.bf16.msra.mxu0 %v260_v3 }
   0x8   :  { %239 = vmatprep.subr.bf16.mxu0 %v261_v4  ;;  %189 = vmatprep.mubr.bf16.mxu0 %v217_v12 }
   0xb   :  { %240 = vmatpush3.bf16.msra.mxu0 %v262_v5 }
   0xc   :  { %241 = vmatprep.subr.bf16.mxu0 %v263_v6 }
   0xf   :  { %242 = vmatpush3.bf16.msra.mxu0 %v264_v7 }
  0x10   :  { %243 = vmatprep.subr.bf16.mxu0 %v265_v8 }
  0x13   :  { %244 = vmatpush3.bf16.msra.mxu0 %v266_v9 }
  0x14   :  { %245 = vmatprep.subr.bf16.mxu0 %v267_v10 }
  0x17   :  { %246 = vmatpush3.bf16.msra.mxu0 %v268_v13 }
  0x18   :  { %247 = vmatprep.subr.bf16.mxu0 %v269_v14 }
  0x1b   :  { %248 = vmatpush3.bf16.msra.mxu0 %v270_v15 }
  0x1c   :  { %249 = vmatprep.subr.bf16.mxu0 %v271_v16 }
  0x1f   :  { %250 = vmatpush3.bf16.msra.mxu0 %v272_v17 }
  0x22   :  { %190 = vmatmul.mubr.bf16.vlgmr.msra.gmra.mrb[0].mxu0 %v216_v18 }
  0xf5   :  { %v251_v19 = vpop.f32.mrb[0].mxu0 }
  0xf6   :  { %v252_v20 = vpop.f32.mrb[1].mxu0 }
  0xf7   :  { %v253_v22 = vadd.f32 %v252_v20, %v251_v19  ;;  %v254_v23 = vpop.f32.mrb[2].mxu0 }
  0xf8   :  { %v255_v24 = vpop.f32.mrb[3].mxu0 }
  0xf9   :  { %v210_v25 = vadd.f32 %v253_v22, %v234_v21 }
  0xfb   :  { %211 = vst [vmem:[%s355_s3] sm:$0xff] %v210_v25 }

</bundles_post_ra>
